<compile_context>
chip_gen: v5e
topology: v5e:2x2
jax: 0.10.0
libtpu: 0.0.40
codegen_flags: <defaults>
</compile_context>

<pallas_src>
import functools

import jax
import jax.numpy as jnp
from jax.experimental import pallas as pl
from jax.experimental.pallas import tpu as pltpu


def _round_up(a, b):
    return ((a + b - 1) // b) * b


def _gru_recurrence_kernel(*refs, hidden, time_block, add_residual,
                           t_actual, guard_time):
    """One grid step == `time_block` GRU time steps for one batch block.

    refs = (gx_ref, whh_rz_ref, whh_n_ref, bhhn_ref, [xres_ref], o_ref, h_ref)
      gx_ref    : (bn, TS, 3H) bf16  precomputed x@W_ih + b_ih (+ b_hh for r,z)
      whh_rz_ref: (H, 2H)      bf16  recurrent weights for r|z gates (resident)
      whh_n_ref : (H, H)       bf16  recurrent weights for n gate    (resident)
      bhhn_ref  : (1, H)       f32   recurrent bias of the n gate (inside r*(.))
      xres_ref  : (bn, TS, F)        optional residual input (original dtype)
      o_ref     : (bn, TS, H)        output block
      h_ref     : (bn, H)      f32   hidden-state scratch carried over time
    """
    if add_residual:
        (gx_ref, whh_rz_ref, whh_n_ref, bhhn_ref, xres_ref,
         o_ref, h_ref) = refs
    else:
        gx_ref, whh_rz_ref, whh_n_ref, bhhn_ref, o_ref, h_ref = refs
        xres_ref = None

    H = hidden

    # Time axis is grid axis 1; reset the hidden state at the start of every
    # (independent) batch block.
    @pl.when(pl.program_id(1) == 0)
    def _():
        h_ref[...] = jnp.zeros_like(h_ref)

    # Resident (single-buffered, constant block index) recurrent params.
    whh_rz = whh_rz_ref[...]                        # (H, 2H) bf16
    whh_n = whh_n_ref[...]                          # (H, H)  bf16
    bhh_n = bhhn_ref[...].astype(jnp.float32)       # (1, H)

    # Fully unrolled short inner loop (time_block is a compile-time constant)
    # so the scheduler can overlap across steps / gates.
    for s in range(time_block):
        def step(s=s):
            h = h_ref[...]                          # (bn, H) f32
            h_bf = h.astype(jnp.bfloat16)
            # Gate-split: r/z sigmoids (EUP) can start while the n-gate
            # matmul is still on the MXU.
            gh_rz = jnp.dot(h_bf, whh_rz,
                            preferred_element_type=jnp.float32)   # (bn, 2H)
            gh_n = jnp.dot(h_bf, whh_n,
                           preferred_element_type=jnp.float32)    # (bn, H)
            # Per-step, per-gate reads straight off the refs — never
            # materialize the whole (bn, TS, 3H) block as a value.
            gx_r = gx_ref[:, s, 0:H].astype(jnp.float32)
            gx_z = gx_ref[:, s, H:2 * H].astype(jnp.float32)
            gx_n = gx_ref[:, s, 2 * H:3 * H].astype(jnp.float32)
            r = jax.nn.sigmoid(gx_r + gh_rz[:, 0:H])
            z = jax.nn.sigmoid(gx_z + gh_rz[:, H:2 * H])
            c = jnp.tanh(gx_n + r * (gh_n + bhh_n))
            h_new = (1.0 - z) * c + z * h
            if add_residual:
                y = h_new + xres_ref[:, s, :].astype(jnp.float32)
            else:
                y = h_new
            o_ref[:, s, :] = y.astype(o_ref.dtype)
            h_ref[...] = h_new

        if guard_time:
            # Skip padded trailing time steps entirely (no wasted MXU work).
            pl.when(pl.program_id(1) * time_block + s < t_actual)(step)
        else:
            step()


@functools.partial(jax.jit,
                   static_argnames=("use_residual", "time_block", "batch_block"))
def temporal_encoder_pallas(x, w_ih_t, w_hh_t, b_ih, b_hh, *, use_residual=True,
                            time_block=16, batch_block=None):
    """TemporalEncoder forward.  x: (N, T, F) batch-major.
    Weights pre-transposed: w_ih_t (F, 3H), w_hh_t (H, 3H); biases (1, 3H)."""
    n, t, f = x.shape
    H = w_hh_t.shape[0]
    out_dtype = x.dtype
    add_residual = bool(use_residual) and (H == f)

    # ---- Batch block: fill the MXU M dimension (multiple of 16 for bf16
    # sublane packing of h), keep >= 2 blocks for megacore when batch allows.
    if batch_block is None:
        if n >= 512:
            batch_block = 256
        elif n >= 32:
            batch_block = _round_up(-(-n // 2), 16)
        else:
            batch_block = n
    batch_block = int(batch_block)
    tb = int(time_block)

    # ---- Hoisted input projection: ONE big matmul on the bf16 MXU path with
    # f32 accumulation.  Fold b_ih (all gates) + b_hh (r,z gates) into it;
    # b_hh for the n gate must stay inside r*(h@W_hn + b_hn).
    b_ih32 = b_ih.astype(jnp.float32)
    b_hh32 = b_hh.astype(jnp.float32)
    bias_fold = b_ih32 + jnp.concatenate(
        [b_hh32[:, :2 * H], jnp.zeros((1, H), jnp.float32)], axis=-1)  # (1,3H)
    b_hh_n = b_hh32[:, 2 * H:]                                         # (1, H)

    gx = jnp.dot(x.reshape(n * t, f).astype(jnp.bfloat16),
                 w_ih_t.astype(jnp.bfloat16),
                 preferred_element_type=jnp.float32) + bias_fold
    gx = gx.astype(jnp.bfloat16).reshape(n, t, 3 * H)   # bf16 HBM stream

    # ---- Pad batch / time to the block grid (pad region is discarded).
    t_pad = _round_up(t, tb)
    n_pad = _round_up(n, batch_block)
    guard_time = (t_pad != t)
    if (t_pad != t) or (n_pad != n):
        gx = jnp.pad(gx, ((0, n_pad - n), (0, t_pad - t), (0, 0)))
        x_res = jnp.pad(x, ((0, n_pad - n), (0, t_pad - t), (0, 0)))
    else:
        x_res = x

    # Gate-split bf16 recurrent weights (r|z block and n block).
    w_hh_rz = w_hh_t[:, :2 * H].astype(jnp.bfloat16)
    w_hh_n = w_hh_t[:, 2 * H:].astype(jnp.bfloat16)

    kernel = functools.partial(
        _gru_recurrence_kernel, hidden=H, time_block=tb,
        add_residual=add_residual, t_actual=t, guard_time=guard_time)

    resident = pl.Buffered(1)   # constant-index blocks: single VMEM buffer
    in_specs = [
        # gx tiles, batch-major blocks straight from (N, T, 3H) — no transpose.
        pl.BlockSpec((batch_block, tb, 3 * H), lambda bi, ti: (bi, ti, 0)),
        # Recurrent weights / bias resident across all grid steps.
        pl.BlockSpec((H, 2 * H), lambda bi, ti: (0, 0), pipeline_mode=resident),
        pl.BlockSpec((H, H), lambda bi, ti: (0, 0), pipeline_mode=resident),
        pl.BlockSpec((1, H), lambda bi, ti: (0, 0), pipeline_mode=resident),
    ]
    inputs = [gx, w_hh_rz, w_hh_n, b_hh_n]
    if add_residual:
        in_specs.append(
            pl.BlockSpec((batch_block, tb, f), lambda bi, ti: (bi, ti, 0)))
        inputs.append(x_res)   # original dtype; cast in-kernel (free VPU op)

    # ---- Per-generation VMEM budget: 3/4 of physical, capped at 100 MiB
    # (v7x: ~48 MiB of its 64 MiB/core; v5e/v6e: 96 MiB of 128 MiB).
    try:
        vmem_cap = int(pltpu.get_tpu_info().vmem_capacity_bytes)
    except Exception:
        vmem_cap = 128 * 1024 * 1024
    vmem_limit = int(min(vmem_cap * 3 // 4, 100 * 1024 * 1024))

    y = pl.pallas_call(
        kernel,
        out_shape=jax.ShapeDtypeStruct((n_pad, t_pad, H), out_dtype),
        grid_spec=pltpu.PrefetchScalarGridSpec(
            num_scalar_prefetch=0,
            grid=(n_pad // batch_block, t_pad // tb),
            in_specs=in_specs,
            out_specs=pl.BlockSpec((batch_block, tb, H),
                                   lambda bi, ti: (bi, ti, 0)),
            scratch_shapes=[pltpu.VMEM((batch_block, H), jnp.float32)],
        ),
        compiler_params=pltpu.CompilerParams(
            # batch blocks are independent -> parallel (megacore on v7x);
            # the time axis carries h in scratch -> strictly sequential.
            dimension_semantics=("parallel", "arbitrary"),
            vmem_limit_bytes=vmem_limit,
        ),
    )(*inputs)

    return y[:n, :t, :]


def vibe_forward(x, params, *, time_block=16, batch_block=None):
    """VIBE forward (temporal-encoder portion).  x: (batch, seqlen, feat)."""
    feature = temporal_encoder_pallas(
        x, params["w_ih_t"], params["w_hh_t"], params["b_ih"], params["b_hh"],
        use_residual=True, time_block=time_block, batch_block=batch_block)
    # TODO(synk): smpl Regressor head (theta/verts/kp_2d/kp_3d/rotmat) omitted —
    # its class definition is not part of the given module source.
    return feature


def _gru_reference(x, w_ih_t, w_hh_t, b_ih, b_hh, use_residual=True):
    """Pure-JAX lax.scan reference with identical semantics and matched
    matmul precision (bf16 weight/activation matmuls, f32 gates/state)."""
    n, t, f = x.shape
    H = w_hh_t.shape[0]
    w_ih_bf = w_ih_t.astype(jnp.bfloat16)
    w_hh_bf = w_hh_t.astype(jnp.bfloat16)
    b_ih32 = b_ih.astype(jnp.float32)[0]
    b_hh32 = b_hh.astype(jnp.float32)[0]
    bias_fold = b_ih32 + jnp.concatenate(
        [b_hh32[:2 * H], jnp.zeros((H,), jnp.float32)])
    b_hh_n = b_hh32[2 * H:]
    x_tnf = jnp.transpose(x, (1, 0, 2))

    def step(h, xt):
        gx = (jnp.dot(xt.astype(jnp.bfloat16), w_ih_bf,
                      preferred_element_type=jnp.float32) + bias_fold)
        gx = gx.astype(jnp.bfloat16).astype(jnp.float32)
        gh = jnp.dot(h.astype(jnp.bfloat16), w_hh_bf,
                     preferred_element_type=jnp.float32)
        r = jax.nn.sigmoid(gx[:, :H] + gh[:, :H])
        z = jax.nn.sigmoid(gx[:, H:2 * H] + gh[:, H:2 * H])
        c = jnp.tanh(gx[:, 2 * H:] + r * (gh[:, 2 * H:] + b_hh_n))
        h_new = (1.0 - z) * c + z * h
        return h_new, h_new

    h0 = jnp.zeros((n, H), jnp.float32)
    _, ys = jax.lax.scan(step, h0, x_tnf)
    if use_residual and H == f:
        ys = ys + x_tnf.astype(jnp.float32)
    return jnp.transpose(ys, (1, 0, 2)).astype(x.dtype)


def init_params(key, feat_dim, hidden):
    """Deterministic PyTorch-style GRU init: U(-1/sqrt(H), 1/sqrt(H))."""
    k = 1.0 / jnp.sqrt(jnp.float32(hidden))
    k1, k2, k3, k4 = jax.random.split(key, 4)
    return {
        # stored pre-transposed for the kernel: (F, 3H) / (H, 3H)
        "w_ih_t": jax.random.uniform(k1, (feat_dim, 3 * hidden), jnp.float32, -k, k),
        "w_hh_t": jax.random.uniform(k2, (hidden, 3 * hidden), jnp.float32, -k, k),
        "b_ih": jax.random.uniform(k3, (1, 3 * hidden), jnp.float32, -k, k),
        "b_hh": jax.random.uniform(k4, (1, 3 * hidden), jnp.float32, -k, k),
    }


if __name__ == "__main__":
    key = jax.random.PRNGKey(0)
    # Scaled-down VIBE config (hidden == feat so the residual is active).
    # seqlen=12 exercises the padded-time pl.when guard (padded to tb=16);
    # batch=4 with batch_block=2 exercises the parallel batch-block axis.
    batch, seqlen, feat = 4, 12, 32
    hidden = 32

    kx, kp = jax.random.split(key)
    x = jax.random.normal(kx, (batch, seqlen, feat), jnp.float32)
    params = init_params(kp, feat, hidden)

    y = jax.block_until_ready(
        vibe_forward(x, params, time_block=16, batch_block=2))
    y_ref = jax.block_until_ready(
        _gru_reference(x, params["w_ih_t"], params["w_hh_t"],
                       params["b_ih"], params["b_hh"], use_residual=True))

    assert y.shape == (batch, seqlen, hidden)
    err = jnp.max(jnp.abs(y - y_ref))
    assert jnp.allclose(y, y_ref, atol=1e-2, rtol=1e-2), f"max err {err}"
    print("KERNEL_OK")
</pallas_src>

<mosaic_0001>
module attributes {stable_mosaic.version = 11 : i64} {
  func.func @_gru_recurrence_kernel(%arg0: i32, %arg1: i32, %arg2: memref<2x16x96xbf16, #tpu.memory_space<vmem>>, %arg3: memref<32x64xbf16, #tpu.memory_space<vmem>>, %arg4: memref<32x32xbf16, #tpu.memory_space<vmem>>, %arg5: memref<1x32xf32, #tpu.memory_space<vmem>>, %arg6: memref<2x16x32xf32, #tpu.memory_space<vmem>>, %arg7: memref<2x16x32xf32, #tpu.memory_space<vmem>>, %arg8: memref<2x32xf32, #tpu.memory_space<vmem>>) attributes {dimension_semantics = [#tpu.dimension_semantics<parallel>, #tpu.dimension_semantics<arbitrary>], iteration_bounds = array<i64: 2, 1>, scalar_prefetch = 0 : i64, scratch_operands = 1 : i64, tpu.core_type = #tpu.core_type<tc>, window_params = [{transform_indices = @transform_0, window_bounds = array<i64: 2, 16, 96>}, {pipeline_mode = #tpu.pipeline_mode<synchronous>, transform_indices = @transform_1, window_bounds = array<i64: 32, 64>}, {pipeline_mode = #tpu.pipeline_mode<synchronous>, transform_indices = @transform_2, window_bounds = array<i64: 32, 32>}, {pipeline_mode = #tpu.pipeline_mode<synchronous>, transform_indices = @transform_3, window_bounds = array<i64: 1, 32>}, {transform_indices = @transform_4, window_bounds = array<i64: 2, 16, 32>}, {transform_indices = @transform_5, window_bounds = array<i64: 2, 16, 32>}]} {
    %c0_i32 = arith.constant 0 : i32
    %0 = arith.cmpi eq, %arg1, %c0_i32 : i32
    %1 = arith.extui %0 : i1 to i32
    %c0_i32_0 = arith.constant 0 : i32
    %2 = arith.cmpi ne, %1, %c0_i32_0 : i32
    scf.if %2 {
      %cst = arith.constant 0.000000e+00 : f32
      %86 = vector.broadcast %cst : f32 to vector<2x32xf32>
      %c0_54 = arith.constant 0 : index
      %c0_55 = arith.constant 0 : index
      %87 = vector.load %arg8[%c0_54, %c0_55] : memref<2x32xf32, #tpu.memory_space<vmem>>, vector<2x32xf32>
      tpu.vector_store %arg8[%c0_54, %c0_55], %86 {strides = array<i32>} : memref<2x32xf32, #tpu.memory_space<vmem>>, vector<2x32xf32>,
    } else {
    }
    %c0 = arith.constant 0 : index
    %c0_1 = arith.constant 0 : index
    %3 = vector.load %arg3[%c0, %c0_1] : memref<32x64xbf16, #tpu.memory_space<vmem>>, vector<32x64xbf16>
    %c0_2 = arith.constant 0 : index
    %c0_3 = arith.constant 0 : index
    %4 = vector.load %arg4[%c0_2, %c0_3] : memref<32x32xbf16, #tpu.memory_space<vmem>>, vector<32x32xbf16>
    %c0_4 = arith.constant 0 : index
    %c0_5 = arith.constant 0 : index
    %5 = vector.load %arg5[%c0_4, %c0_5] : memref<1x32xf32, #tpu.memory_space<vmem>>, vector<1x32xf32>
    %c16_i32 = arith.constant 16 : i32
    %6 = arith.muli %arg1, %c16_i32 : i32
    %c0_i32_6 = arith.constant 0 : i32
    %7 = arith.addi %6, %c0_i32_6 : i32
    %c12_i32 = arith.constant 12 : i32
    %8 = arith.cmpi slt, %7, %c12_i32 : i32
    %9 = arith.extui %8 : i1 to i32
    %c0_i32_7 = arith.constant 0 : i32
    %10 = arith.cmpi ne, %9, %c0_i32_7 : i32
    scf.if %10 {
      %c0_54 = arith.constant 0 : index
      %c0_55 = arith.constant 0 : index
      %86 = vector.load %arg8[%c0_54, %c0_55] : memref<2x32xf32, #tpu.memory_space<vmem>>, vector<2x32xf32>
      %87 = arith.truncf %86 : vector<2x32xf32> to vector<2x32xbf16>
      %cst = arith.constant dense<0.000000e+00> : vector<2x64xf32>
      %88 = tpu.matmul %87, %3, %cst {dimension_numbers = #tpu.dot_dimension_numbers<[1], [0], [0], [1], [0, 0, 1, 1], [], []>} : vector<2x32xbf16>, vector<32x64xbf16>, vector<2x64xf32> -> vector<2x64xf32>
      %cst_56 = arith.constant dense<0.000000e+00> : vector<2x32xf32>
      %89 = tpu.matmul %87, %4, %cst_56 {dimension_numbers = #tpu.dot_dimension_numbers<[1], [0], [0], [1], [0, 0, 1, 1], [], []>} : vector<2x32xbf16>, vector<32x32xbf16>, vector<2x32xf32> -> vector<2x32xf32>
      %c0_57 = arith.constant 0 : index
      %c0_58 = arith.constant 0 : index
      %c0_59 = arith.constant 0 : index
      %90 = vector.load %arg2[%c0_57, %c0_58, %c0_59] : memref<2x16x96xbf16, #tpu.memory_space<vmem>>, vector<2x1x32xbf16>
      %91 = vector.shape_cast %90 : vector<2x1x32xbf16> to vector<2x32xbf16>
      %92 = arith.extf %91 : vector<2x32xbf16> to vector<2x32xf32>
      %c0_60 = arith.constant 0 : index
      %c0_61 = arith.constant 0 : index
      %c32 = arith.constant 32 : index
      %93 = vector.load %arg2[%c0_60, %c0_61, %c32] : memref<2x16x96xbf16, #tpu.memory_space<vmem>>, vector<2x1x32xbf16>
      %94 = vector.shape_cast %93 : vector<2x1x32xbf16> to vector<2x32xbf16>
      %95 = arith.extf %94 : vector<2x32xbf16> to vector<2x32xf32>
      %c0_62 = arith.constant 0 : index
      %c0_63 = arith.constant 0 : index
      %c64 = arith.constant 64 : index
      %96 = vector.load %arg2[%c0_62, %c0_63, %c64] : memref<2x16x96xbf16, #tpu.memory_space<vmem>>, vector<2x1x32xbf16>
      %97 = vector.shape_cast %96 : vector<2x1x32xbf16> to vector<2x32xbf16>
      %98 = arith.extf %97 : vector<2x32xbf16> to vector<2x32xf32>
      %99 = vector.extract_strided_slice %88 {offsets = [0, 0], sizes = [2, 32], strides = [1, 1]} : vector<2x64xf32> to vector<2x32xf32>
      %100 = arith.addf %92, %99 : vector<2x32xf32>
      %101 = arith.negf %100 : vector<2x32xf32>
      %102 = math.exp %101 : vector<2x32xf32>
      %cst_64 = arith.constant 1.000000e+00 : f32
      %103 = vector.broadcast %cst_64 : f32 to vector<2x32xf32>
      %104 = arith.addf %103, %102 : vector<2x32xf32>
      %105 = arith.divf %103, %104 : vector<2x32xf32>
      %106 = vector.extract_strided_slice %88 {offsets = [0, 32], sizes = [2, 32], strides = [1, 1]} : vector<2x64xf32> to vector<2x32xf32>
      %107 = arith.addf %95, %106 : vector<2x32xf32>
      %108 = arith.negf %107 : vector<2x32xf32>
      %109 = math.exp %108 : vector<2x32xf32>
      %cst_65 = arith.constant 1.000000e+00 : f32
      %110 = vector.broadcast %cst_65 : f32 to vector<2x32xf32>
      %111 = arith.addf %110, %109 : vector<2x32xf32>
      %112 = arith.divf %110, %111 : vector<2x32xf32>
      %113 = vector.broadcast %5 : vector<1x32xf32> to vector<2x32xf32>
      %114 = arith.addf %89, %113 : vector<2x32xf32>
      %115 = arith.mulf %105, %114 : vector<2x32xf32>
      %116 = arith.addf %98, %115 : vector<2x32xf32>
      %117 = math.tanh %116 : vector<2x32xf32>
      %cst_66 = arith.constant 1.000000e+00 : f32
      %118 = vector.broadcast %cst_66 : f32 to vector<2x32xf32>
      %119 = arith.subf %118, %112 : vector<2x32xf32>
      %120 = arith.mulf %119, %117 : vector<2x32xf32>
      %121 = arith.mulf %112, %86 : vector<2x32xf32>
      %122 = arith.addf %120, %121 : vector<2x32xf32>
      %c0_67 = arith.constant 0 : index
      %c0_68 = arith.constant 0 : index
      %c0_69 = arith.constant 0 : index
      %123 = vector.load %arg6[%c0_67, %c0_68, %c0_69] : memref<2x16x32xf32, #tpu.memory_space<vmem>>, vector<2x1x32xf32>
      %124 = vector.shape_cast %123 : vector<2x1x32xf32> to vector<2x32xf32>
      %125 = arith.addf %122, %124 : vector<2x32xf32>
      %c0_70 = arith.constant 0 : index
      %c0_71 = arith.constant 0 : index
      %c0_72 = arith.constant 0 : index
      %126 = vector.load %arg7[%c0_70, %c0_71, %c0_72] : memref<2x16x32xf32, #tpu.memory_space<vmem>>, vector<2x1x32xf32>
      %127 = vector.shape_cast %126 : vector<2x1x32xf32> to vector<2x32xf32>
      %128 = vector.shape_cast %125 : vector<2x32xf32> to vector<2x1x32xf32>
      tpu.vector_store %arg7[%c0_70, %c0_71, %c0_72], %128 {strides = array<i32>} : memref<2x16x32xf32, #tpu.memory_space<vmem>>, vector<2x1x32xf32>,
      %c0_73 = arith.constant 0 : index
      %c0_74 = arith.constant 0 : index
      %129 = vector.load %arg8[%c0_73, %c0_74] : memref<2x32xf32, #tpu.memory_space<vmem>>, vector<2x32xf32>
      tpu.vector_store %arg8[%c0_73, %c0_74], %122 {strides = array<i32>} : memref<2x32xf32, #tpu.memory_space<vmem>>, vector<2x32xf32>,
    } else {
    }
    %c16_i32_8 = arith.constant 16 : i32
    %11 = arith.muli %arg1, %c16_i32_8 : i32
    %c1_i32 = arith.constant 1 : i32
    %12 = arith.addi %11, %c1_i32 : i32
    %c12_i32_9 = arith.constant 12 : i32
    %13 = arith.cmpi slt, %12, %c12_i32_9 : i32
    %14 = arith.extui %13 : i1 to i32
    %c0_i32_10 = arith.constant 0 : i32
    %15 = arith.cmpi ne, %14, %c0_i32_10 : i32
    scf.if %15 {
      %c0_54 = arith.constant 0 : index
      %c0_55 = arith.constant 0 : index
      %86 = vector.load %arg8[%c0_54, %c0_55] : memref<2x32xf32, #tpu.memory_space<vmem>>, vector<2x32xf32>
      %87 = arith.truncf %86 : vector<2x32xf32> to vector<2x32xbf16>
      %cst = arith.constant dense<0.000000e+00> : vector<2x64xf32>
      %88 = tpu.matmul %87, %3, %cst {dimension_numbers = #tpu.dot_dimension_numbers<[1], [0], [0], [1], [0, 0, 1, 1], [], []>} : vector<2x32xbf16>, vector<32x64xbf16>, vector<2x64xf32> -> vector<2x64xf32>
      %cst_56 = arith.constant dense<0.000000e+00> : vector<2x32xf32>
      %89 = tpu.matmul %87, %4, %cst_56 {dimension_numbers = #tpu.dot_dimension_numbers<[1], [0], [0], [1], [0, 0, 1, 1], [], []>} : vector<2x32xbf16>, vector<32x32xbf16>, vector<2x32xf32> -> vector<2x32xf32>
      %c0_57 = arith.constant 0 : index
      %c1 = arith.constant 1 : index
      %c0_58 = arith.constant 0 : index
      %90 = vector.load %arg2[%c0_57, %c1, %c0_58] : memref<2x16x96xbf16, #tpu.memory_space<vmem>>, vector<2x1x32xbf16>
      %91 = vector.shape_cast %90 : vector<2x1x32xbf16> to vector<2x32xbf16>
      %92 = arith.extf %91 : vector<2x32xbf16> to vector<2x32xf32>
      %c0_59 = arith.constant 0 : index
      %c1_60 = arith.constant 1 : index
      %c32 = arith.constant 32 : index
      %93 = vector.load %arg2[%c0_59, %c1_60, %c32] : memref<2x16x96xbf16, #tpu.memory_space<vmem>>, vector<2x1x32xbf16>
      %94 = vector.shape_cast %93 : vector<2x1x32xbf16> to vector<2x32xbf16>
      %95 = arith.extf %94 : vector<2x32xbf16> to vector<2x32xf32>
      %c0_61 = arith.constant 0 : index
      %c1_62 = arith.constant 1 : index
      %c64 = arith.constant 64 : index
      %96 = vector.load %arg2[%c0_61, %c1_62, %c64] : memref<2x16x96xbf16, #tpu.memory_space<vmem>>, vector<2x1x32xbf16>
      %97 = vector.shape_cast %96 : vector<2x1x32xbf16> to vector<2x32xbf16>
      %98 = arith.extf %97 : vector<2x32xbf16> to vector<2x32xf32>
      %99 = vector.extract_strided_slice %88 {offsets = [0, 0], sizes = [2, 32], strides = [1, 1]} : vector<2x64xf32> to vector<2x32xf32>
      %100 = arith.addf %92, %99 : vector<2x32xf32>
      %101 = arith.negf %100 : vector<2x32xf32>
      %102 = math.exp %101 : vector<2x32xf32>
      %cst_63 = arith.constant 1.000000e+00 : f32
      %103 = vector.broadcast %cst_63 : f32 to vector<2x32xf32>
      %104 = arith.addf %103, %102 : vector<2x32xf32>
      %105 = arith.divf %103, %104 : vector<2x32xf32>
      %106 = vector.extract_strided_slice %88 {offsets = [0, 32], sizes = [2, 32], strides = [1, 1]} : vector<2x64xf32> to vector<2x32xf32>
      %107 = arith.addf %95, %106 : vector<2x32xf32>
      %108 = arith.negf %107 : vector<2x32xf32>
      %109 = math.exp %108 : vector<2x32xf32>
      %cst_64 = arith.constant 1.000000e+00 : f32
      %110 = vector.broadcast %cst_64 : f32 to vector<2x32xf32>
      %111 = arith.addf %110, %109 : vector<2x32xf32>
      %112 = arith.divf %110, %111 : vector<2x32xf32>
      %113 = vector.broadcast %5 : vector<1x32xf32> to vector<2x32xf32>
      %114 = arith.addf %89, %113 : vector<2x32xf32>
      %115 = arith.mulf %105, %114 : vector<2x32xf32>
      %116 = arith.addf %98, %115 : vector<2x32xf32>
      %117 = math.tanh %116 : vector<2x32xf32>
      %cst_65 = arith.constant 1.000000e+00 : f32
      %118 = vector.broadcast %cst_65 : f32 to vector<2x32xf32>
      %119 = arith.subf %118, %112 : vector<2x32xf32>
      %120 = arith.mulf %119, %117 : vector<2x32xf32>
      %121 = arith.mulf %112, %86 : vector<2x32xf32>
      %122 = arith.addf %120, %121 : vector<2x32xf32>
      %c0_66 = arith.constant 0 : index
      %c1_67 = arith.constant 1 : index
      %c0_68 = arith.constant 0 : index
      %123 = vector.load %arg6[%c0_66, %c1_67, %c0_68] : memref<2x16x32xf32, #tpu.memory_space<vmem>>, vector<2x1x32xf32>
      %124 = vector.shape_cast %123 : vector<2x1x32xf32> to vector<2x32xf32>
      %125 = arith.addf %122, %124 : vector<2x32xf32>
      %c0_69 = arith.constant 0 : index
      %c1_70 = arith.constant 1 : index
      %c0_71 = arith.constant 0 : index
      %126 = vector.load %arg7[%c0_69, %c1_70, %c0_71] : memref<2x16x32xf32, #tpu.memory_space<vmem>>, vector<2x1x32xf32>
      %127 = vector.shape_cast %126 : vector<2x1x32xf32> to vector<2x32xf32>
      %128 = vector.shape_cast %125 : vector<2x32xf32> to vector<2x1x32xf32>
      tpu.vector_store %arg7[%c0_69, %c1_70, %c0_71], %128 {strides = array<i32>} : memref<2x16x32xf32, #tpu.memory_space<vmem>>, vector<2x1x32xf32>,
      %c0_72 = arith.constant 0 : index
      %c0_73 = arith.constant 0 : index
      %129 = vector.load %arg8[%c0_72, %c0_73] : memref<2x32xf32, #tpu.memory_space<vmem>>, vector<2x32xf32>
      tpu.vector_store %arg8[%c0_72, %c0_73], %122 {strides = array<i32>} : memref<2x32xf32, #tpu.memory_space<vmem>>, vector<2x32xf32>,
    } else {
    }
    %c16_i32_11 = arith.constant 16 : i32
    %16 = arith.muli %arg1, %c16_i32_11 : i32
    %c2_i32 = arith.constant 2 : i32
    %17 = arith.addi %16, %c2_i32 : i32
    %c12_i32_12 = arith.constant 12 : i32
    %18 = arith.cmpi slt, %17, %c12_i32_12 : i32
    %19 = arith.extui %18 : i1 to i32
    %c0_i32_13 = arith.constant 0 : i32
    %20 = arith.cmpi ne, %19, %c0_i32_13 : i32
    scf.if %20 {
      %c0_54 = arith.constant 0 : index
      %c0_55 = arith.constant 0 : index
      %86 = vector.load %arg8[%c0_54, %c0_55] : memref<2x32xf32, #tpu.memory_space<vmem>>, vector<2x32xf32>
      %87 = arith.truncf %86 : vector<2x32xf32> to vector<2x32xbf16>
      %cst = arith.constant dense<0.000000e+00> : vector<2x64xf32>
      %88 = tpu.matmul %87, %3, %cst {dimension_numbers = #tpu.dot_dimension_numbers<[1], [0], [0], [1], [0, 0, 1, 1], [], []>} : vector<2x32xbf16>, vector<32x64xbf16>, vector<2x64xf32> -> vector<2x64xf32>
      %cst_56 = arith.constant dense<0.000000e+00> : vector<2x32xf32>
      %89 = tpu.matmul %87, %4, %cst_56 {dimension_numbers = #tpu.dot_dimension_numbers<[1], [0], [0], [1], [0, 0, 1, 1], [], []>} : vector<2x32xbf16>, vector<32x32xbf16>, vector<2x32xf32> -> vector<2x32xf32>
      %c0_57 = arith.constant 0 : index
      %c2 = arith.constant 2 : index
      %c0_58 = arith.constant 0 : index
      %90 = vector.load %arg2[%c0_57, %c2, %c0_58] : memref<2x16x96xbf16, #tpu.memory_space<vmem>>, vector<2x1x32xbf16>
      %91 = vector.shape_cast %90 : vector<2x1x32xbf16> to vector<2x32xbf16>
      %92 = arith.extf %91 : vector<2x32xbf16> to vector<2x32xf32>
      %c0_59 = arith.constant 0 : index
      %c2_60 = arith.constant 2 : index
      %c32 = arith.constant 32 : index
      %93 = vector.load %arg2[%c0_59, %c2_60, %c32] : memref<2x16x96xbf16, #tpu.memory_space<vmem>>, vector<2x1x32xbf16>
      %94 = vector.shape_cast %93 : vector<2x1x32xbf16> to vector<2x32xbf16>
      %95 = arith.extf %94 : vector<2x32xbf16> to vector<2x32xf32>
      %c0_61 = arith.constant 0 : index
      %c2_62 = arith.constant 2 : index
      %c64 = arith.constant 64 : index
      %96 = vector.load %arg2[%c0_61, %c2_62, %c64] : memref<2x16x96xbf16, #tpu.memory_space<vmem>>, vector<2x1x32xbf16>
      %97 = vector.shape_cast %96 : vector<2x1x32xbf16> to vector<2x32xbf16>
      %98 = arith.extf %97 : vector<2x32xbf16> to vector<2x32xf32>
      %99 = vector.extract_strided_slice %88 {offsets = [0, 0], sizes = [2, 32], strides = [1, 1]} : vector<2x64xf32> to vector<2x32xf32>
      %100 = arith.addf %92, %99 : vector<2x32xf32>
      %101 = arith.negf %100 : vector<2x32xf32>
      %102 = math.exp %101 : vector<2x32xf32>
      %cst_63 = arith.constant 1.000000e+00 : f32
      %103 = vector.broadcast %cst_63 : f32 to vector<2x32xf32>
      %104 = arith.addf %103, %102 : vector<2x32xf32>
      %105 = arith.divf %103, %104 : vector<2x32xf32>
      %106 = vector.extract_strided_slice %88 {offsets = [0, 32], sizes = [2, 32], strides = [1, 1]} : vector<2x64xf32> to vector<2x32xf32>
      %107 = arith.addf %95, %106 : vector<2x32xf32>
      %108 = arith.negf %107 : vector<2x32xf32>
      %109 = math.exp %108 : vector<2x32xf32>
      %cst_64 = arith.constant 1.000000e+00 : f32
      %110 = vector.broadcast %cst_64 : f32 to vector<2x32xf32>
      %111 = arith.addf %110, %109 : vector<2x32xf32>
      %112 = arith.divf %110, %111 : vector<2x32xf32>
      %113 = vector.broadcast %5 : vector<1x32xf32> to vector<2x32xf32>
      %114 = arith.addf %89, %113 : vector<2x32xf32>
      %115 = arith.mulf %105, %114 : vector<2x32xf32>
      %116 = arith.addf %98, %115 : vector<2x32xf32>
      %117 = math.tanh %116 : vector<2x32xf32>
      %cst_65 = arith.constant 1.000000e+00 : f32
      %118 = vector.broadcast %cst_65 : f32 to vector<2x32xf32>
      %119 = arith.subf %118, %112 : vector<2x32xf32>
      %120 = arith.mulf %119, %117 : vector<2x32xf32>
      %121 = arith.mulf %112, %86 : vector<2x32xf32>
      %122 = arith.addf %120, %121 : vector<2x32xf32>
      %c0_66 = arith.constant 0 : index
      %c2_67 = arith.constant 2 : index
      %c0_68 = arith.constant 0 : index
      %123 = vector.load %arg6[%c0_66, %c2_67, %c0_68] : memref<2x16x32xf32, #tpu.memory_space<vmem>>, vector<2x1x32xf32>
      %124 = vector.shape_cast %123 : vector<2x1x32xf32> to vector<2x32xf32>
      %125 = arith.addf %122, %124 : vector<2x32xf32>
      %c0_69 = arith.constant 0 : index
      %c2_70 = arith.constant 2 : index
      %c0_71 = arith.constant 0 : index
      %126 = vector.load %arg7[%c0_69, %c2_70, %c0_71] : memref<2x16x32xf32, #tpu.memory_space<vmem>>, vector<2x1x32xf32>
      %127 = vector.shape_cast %126 : vector<2x1x32xf32> to vector<2x32xf32>
      %128 = vector.shape_cast %125 : vector<2x32xf32> to vector<2x1x32xf32>
      tpu.vector_store %arg7[%c0_69, %c2_70, %c0_71], %128 {strides = array<i32>} : memref<2x16x32xf32, #tpu.memory_space<vmem>>, vector<2x1x32xf32>,
      %c0_72 = arith.constant 0 : index
      %c0_73 = arith.constant 0 : index
      %129 = vector.load %arg8[%c0_72, %c0_73] : memref<2x32xf32, #tpu.memory_space<vmem>>, vector<2x32xf32>
      tpu.vector_store %arg8[%c0_72, %c0_73], %122 {strides = array<i32>} : memref<2x32xf32, #tpu.memory_space<vmem>>, vector<2x32xf32>,
    } else {
    }
    %c16_i32_14 = arith.constant 16 : i32
    %21 = arith.muli %arg1, %c16_i32_14 : i32
    %c3_i32 = arith.constant 3 : i32
    %22 = arith.addi %21, %c3_i32 : i32
    %c12_i32_15 = arith.constant 12 : i32
    %23 = arith.cmpi slt, %22, %c12_i32_15 : i32
    %24 = arith.extui %23 : i1 to i32
    %c0_i32_16 = arith.constant 0 : i32
    %25 = arith.cmpi ne, %24, %c0_i32_16 : i32
    scf.if %25 {
      %c0_54 = arith.constant 0 : index
      %c0_55 = arith.constant 0 : index
      %86 = vector.load %arg8[%c0_54, %c0_55] : memref<2x32xf32, #tpu.memory_space<vmem>>, vector<2x32xf32>
      %87 = arith.truncf %86 : vector<2x32xf32> to vector<2x32xbf16>
      %cst = arith.constant dense<0.000000e+00> : vector<2x64xf32>
      %88 = tpu.matmul %87, %3, %cst {dimension_numbers = #tpu.dot_dimension_numbers<[1], [0], [0], [1], [0, 0, 1, 1], [], []>} : vector<2x32xbf16>, vector<32x64xbf16>, vector<2x64xf32> -> vector<2x64xf32>
      %cst_56 = arith.constant dense<0.000000e+00> : vector<2x32xf32>
      %89 = tpu.matmul %87, %4, %cst_56 {dimension_numbers = #tpu.dot_dimension_numbers<[1], [0], [0], [1], [0, 0, 1, 1], [], []>} : vector<2x32xbf16>, vector<32x32xbf16>, vector<2x32xf32> -> vector<2x32xf32>
      %c0_57 = arith.constant 0 : index
      %c3 = arith.constant 3 : index
      %c0_58 = arith.constant 0 : index
      %90 = vector.load %arg2[%c0_57, %c3, %c0_58] : memref<2x16x96xbf16, #tpu.memory_space<vmem>>, vector<2x1x32xbf16>
      %91 = vector.shape_cast %90 : vector<2x1x32xbf16> to vector<2x32xbf16>
      %92 = arith.extf %91 : vector<2x32xbf16> to vector<2x32xf32>
      %c0_59 = arith.constant 0 : index
      %c3_60 = arith.constant 3 : index
      %c32 = arith.constant 32 : index
      %93 = vector.load %arg2[%c0_59, %c3_60, %c32] : memref<2x16x96xbf16, #tpu.memory_space<vmem>>, vector<2x1x32xbf16>
      %94 = vector.shape_cast %93 : vector<2x1x32xbf16> to vector<2x32xbf16>
      %95 = arith.extf %94 : vector<2x32xbf16> to vector<2x32xf32>
      %c0_61 = arith.constant 0 : index
      %c3_62 = arith.constant 3 : index
      %c64 = arith.constant 64 : index
      %96 = vector.load %arg2[%c0_61, %c3_62, %c64] : memref<2x16x96xbf16, #tpu.memory_space<vmem>>, vector<2x1x32xbf16>
      %97 = vector.shape_cast %96 : vector<2x1x32xbf16> to vector<2x32xbf16>
      %98 = arith.extf %97 : vector<2x32xbf16> to vector<2x32xf32>
      %99 = vector.extract_strided_slice %88 {offsets = [0, 0], sizes = [2, 32], strides = [1, 1]} : vector<2x64xf32> to vector<2x32xf32>
      %100 = arith.addf %92, %99 : vector<2x32xf32>
      %101 = arith.negf %100 : vector<2x32xf32>
      %102 = math.exp %101 : vector<2x32xf32>
      %cst_63 = arith.constant 1.000000e+00 : f32
      %103 = vector.broadcast %cst_63 : f32 to vector<2x32xf32>
      %104 = arith.addf %103, %102 : vector<2x32xf32>
      %105 = arith.divf %103, %104 : vector<2x32xf32>
      %106 = vector.extract_strided_slice %88 {offsets = [0, 32], sizes = [2, 32], strides = [1, 1]} : vector<2x64xf32> to vector<2x32xf32>
      %107 = arith.addf %95, %106 : vector<2x32xf32>
      %108 = arith.negf %107 : vector<2x32xf32>
      %109 = math.exp %108 : vector<2x32xf32>
      %cst_64 = arith.constant 1.000000e+00 : f32
      %110 = vector.broadcast %cst_64 : f32 to vector<2x32xf32>
      %111 = arith.addf %110, %109 : vector<2x32xf32>
      %112 = arith.divf %110, %111 : vector<2x32xf32>
      %113 = vector.broadcast %5 : vector<1x32xf32> to vector<2x32xf32>
      %114 = arith.addf %89, %113 : vector<2x32xf32>
      %115 = arith.mulf %105, %114 : vector<2x32xf32>
      %116 = arith.addf %98, %115 : vector<2x32xf32>
      %117 = math.tanh %116 : vector<2x32xf32>
      %cst_65 = arith.constant 1.000000e+00 : f32
      %118 = vector.broadcast %cst_65 : f32 to vector<2x32xf32>
      %119 = arith.subf %118, %112 : vector<2x32xf32>
      %120 = arith.mulf %119, %117 : vector<2x32xf32>
      %121 = arith.mulf %112, %86 : vector<2x32xf32>
      %122 = arith.addf %120, %121 : vector<2x32xf32>
      %c0_66 = arith.constant 0 : index
      %c3_67 = arith.constant 3 : index
      %c0_68 = arith.constant 0 : index
      %123 = vector.load %arg6[%c0_66, %c3_67, %c0_68] : memref<2x16x32xf32, #tpu.memory_space<vmem>>, vector<2x1x32xf32>
      %124 = vector.shape_cast %123 : vector<2x1x32xf32> to vector<2x32xf32>
      %125 = arith.addf %122, %124 : vector<2x32xf32>
      %c0_69 = arith.constant 0 : index
      %c3_70 = arith.constant 3 : index
      %c0_71 = arith.constant 0 : index
      %126 = vector.load %arg7[%c0_69, %c3_70, %c0_71] : memref<2x16x32xf32, #tpu.memory_space<vmem>>, vector<2x1x32xf32>
      %127 = vector.shape_cast %126 : vector<2x1x32xf32> to vector<2x32xf32>
      %128 = vector.shape_cast %125 : vector<2x32xf32> to vector<2x1x32xf32>
      tpu.vector_store %arg7[%c0_69, %c3_70, %c0_71], %128 {strides = array<i32>} : memref<2x16x32xf32, #tpu.memory_space<vmem>>, vector<2x1x32xf32>,
      %c0_72 = arith.constant 0 : index
      %c0_73 = arith.constant 0 : index
      %129 = vector.load %arg8[%c0_72, %c0_73] : memref<2x32xf32, #tpu.memory_space<vmem>>, vector<2x32xf32>
      tpu.vector_store %arg8[%c0_72, %c0_73], %122 {strides = array<i32>} : memref<2x32xf32, #tpu.memory_space<vmem>>, vector<2x32xf32>,
    } else {
    }
    %c16_i32_17 = arith.constant 16 : i32
    %26 = arith.muli %arg1, %c16_i32_17 : i32
    %c4_i32 = arith.constant 4 : i32
    %27 = arith.addi %26, %c4_i32 : i32
    %c12_i32_18 = arith.constant 12 : i32
    %28 = arith.cmpi slt, %27, %c12_i32_18 : i32
    %29 = arith.extui %28 : i1 to i32
    %c0_i32_19 = arith.constant 0 : i32
    %30 = arith.cmpi ne, %29, %c0_i32_19 : i32
    scf.if %30 {
      %c0_54 = arith.constant 0 : index
      %c0_55 = arith.constant 0 : index
      %86 = vector.load %arg8[%c0_54, %c0_55] : memref<2x32xf32, #tpu.memory_space<vmem>>, vector<2x32xf32>
      %87 = arith.truncf %86 : vector<2x32xf32> to vector<2x32xbf16>
      %cst = arith.constant dense<0.000000e+00> : vector<2x64xf32>
      %88 = tpu.matmul %87, %3, %cst {dimension_numbers = #tpu.dot_dimension_numbers<[1], [0], [0], [1], [0, 0, 1, 1], [], []>} : vector<2x32xbf16>, vector<32x64xbf16>, vector<2x64xf32> -> vector<2x64xf32>
      %cst_56 = arith.constant dense<0.000000e+00> : vector<2x32xf32>
      %89 = tpu.matmul %87, %4, %cst_56 {dimension_numbers = #tpu.dot_dimension_numbers<[1], [0], [0], [1], [0, 0, 1, 1], [], []>} : vector<2x32xbf16>, vector<32x32xbf16>, vector<2x32xf32> -> vector<2x32xf32>
      %c0_57 = arith.constant 0 : index
      %c4 = arith.constant 4 : index
      %c0_58 = arith.constant 0 : index
      %90 = vector.load %arg2[%c0_57, %c4, %c0_58] : memref<2x16x96xbf16, #tpu.memory_space<vmem>>, vector<2x1x32xbf16>
      %91 = vector.shape_cast %90 : vector<2x1x32xbf16> to vector<2x32xbf16>
      %92 = arith.extf %91 : vector<2x32xbf16> to vector<2x32xf32>
      %c0_59 = arith.constant 0 : index
      %c4_60 = arith.constant 4 : index
      %c32 = arith.constant 32 : index
      %93 = vector.load %arg2[%c0_59, %c4_60, %c32] : memref<2x16x96xbf16, #tpu.memory_space<vmem>>, vector<2x1x32xbf16>
      %94 = vector.shape_cast %93 : vector<2x1x32xbf16> to vector<2x32xbf16>
      %95 = arith.extf %94 : vector<2x32xbf16> to vector<2x32xf32>
      %c0_61 = arith.constant 0 : index
      %c4_62 = arith.constant 4 : index
      %c64 = arith.constant 64 : index
      %96 = vector.load %arg2[%c0_61, %c4_62, %c64] : memref<2x16x96xbf16, #tpu.memory_space<vmem>>, vector<2x1x32xbf16>
      %97 = vector.shape_cast %96 : vector<2x1x32xbf16> to vector<2x32xbf16>
      %98 = arith.extf %97 : vector<2x32xbf16> to vector<2x32xf32>
      %99 = vector.extract_strided_slice %88 {offsets = [0, 0], sizes = [2, 32], strides = [1, 1]} : vector<2x64xf32> to vector<2x32xf32>
      %100 = arith.addf %92, %99 : vector<2x32xf32>
      %101 = arith.negf %100 : vector<2x32xf32>
      %102 = math.exp %101 : vector<2x32xf32>
      %cst_63 = arith.constant 1.000000e+00 : f32
      %103 = vector.broadcast %cst_63 : f32 to vector<2x32xf32>
      %104 = arith.addf %103, %102 : vector<2x32xf32>
      %105 = arith.divf %103, %104 : vector<2x32xf32>
      %106 = vector.extract_strided_slice %88 {offsets = [0, 32], sizes = [2, 32], strides = [1, 1]} : vector<2x64xf32> to vector<2x32xf32>
      %107 = arith.addf %95, %106 : vector<2x32xf32>
      %108 = arith.negf %107 : vector<2x32xf32>
      %109 = math.exp %108 : vector<2x32xf32>
      %cst_64 = arith.constant 1.000000e+00 : f32
      %110 = vector.broadcast %cst_64 : f32 to vector<2x32xf32>
      %111 = arith.addf %110, %109 : vector<2x32xf32>
      %112 = arith.divf %110, %111 : vector<2x32xf32>
      %113 = vector.broadcast %5 : vector<1x32xf32> to vector<2x32xf32>
      %114 = arith.addf %89, %113 : vector<2x32xf32>
      %115 = arith.mulf %105, %114 : vector<2x32xf32>
      %116 = arith.addf %98, %115 : vector<2x32xf32>
      %117 = math.tanh %116 : vector<2x32xf32>
      %cst_65 = arith.constant 1.000000e+00 : f32
      %118 = vector.broadcast %cst_65 : f32 to vector<2x32xf32>
      %119 = arith.subf %118, %112 : vector<2x32xf32>
      %120 = arith.mulf %119, %117 : vector<2x32xf32>
      %121 = arith.mulf %112, %86 : vector<2x32xf32>
      %122 = arith.addf %120, %121 : vector<2x32xf32>
      %c0_66 = arith.constant 0 : index
      %c4_67 = arith.constant 4 : index
      %c0_68 = arith.constant 0 : index
      %123 = vector.load %arg6[%c0_66, %c4_67, %c0_68] : memref<2x16x32xf32, #tpu.memory_space<vmem>>, vector<2x1x32xf32>
      %124 = vector.shape_cast %123 : vector<2x1x32xf32> to vector<2x32xf32>
      %125 = arith.addf %122, %124 : vector<2x32xf32>
      %c0_69 = arith.constant 0 : index
      %c4_70 = arith.constant 4 : index
      %c0_71 = arith.constant 0 : index
      %126 = vector.load %arg7[%c0_69, %c4_70, %c0_71] : memref<2x16x32xf32, #tpu.memory_space<vmem>>, vector<2x1x32xf32>
      %127 = vector.shape_cast %126 : vector<2x1x32xf32> to vector<2x32xf32>
      %128 = vector.shape_cast %125 : vector<2x32xf32> to vector<2x1x32xf32>
      tpu.vector_store %arg7[%c0_69, %c4_70, %c0_71], %128 {strides = array<i32>} : memref<2x16x32xf32, #tpu.memory_space<vmem>>, vector<2x1x32xf32>,
      %c0_72 = arith.constant 0 : index
      %c0_73 = arith.constant 0 : index
      %129 = vector.load %arg8[%c0_72, %c0_73] : memref<2x32xf32, #tpu.memory_space<vmem>>, vector<2x32xf32>
      tpu.vector_store %arg8[%c0_72, %c0_73], %122 {strides = array<i32>} : memref<2x32xf32, #tpu.memory_space<vmem>>, vector<2x32xf32>,
    } else {
    }
    %c16_i32_20 = arith.constant 16 : i32
    %31 = arith.muli %arg1, %c16_i32_20 : i32
    %c5_i32 = arith.constant 5 : i32
    %32 = arith.addi %31, %c5_i32 : i32
    %c12_i32_21 = arith.constant 12 : i32
    %33 = arith.cmpi slt, %32, %c12_i32_21 : i32
    %34 = arith.extui %33 : i1 to i32
    %c0_i32_22 = arith.constant 0 : i32
    %35 = arith.cmpi ne, %34, %c0_i32_22 : i32
    scf.if %35 {
      %c0_54 = arith.constant 0 : index
      %c0_55 = arith.constant 0 : index
      %86 = vector.load %arg8[%c0_54, %c0_55] : memref<2x32xf32, #tpu.memory_space<vmem>>, vector<2x32xf32>
      %87 = arith.truncf %86 : vector<2x32xf32> to vector<2x32xbf16>
      %cst = arith.constant dense<0.000000e+00> : vector<2x64xf32>
      %88 = tpu.matmul %87, %3, %cst {dimension_numbers = #tpu.dot_dimension_numbers<[1], [0], [0], [1], [0, 0, 1, 1], [], []>} : vector<2x32xbf16>, vector<32x64xbf16>, vector<2x64xf32> -> vector<2x64xf32>
      %cst_56 = arith.constant dense<0.000000e+00> : vector<2x32xf32>
      %89 = tpu.matmul %87, %4, %cst_56 {dimension_numbers = #tpu.dot_dimension_numbers<[1], [0], [0], [1], [0, 0, 1, 1], [], []>} : vector<2x32xbf16>, vector<32x32xbf16>, vector<2x32xf32> -> vector<2x32xf32>
      %c0_57 = arith.constant 0 : index
      %c5 = arith.constant 5 : index
      %c0_58 = arith.constant 0 : index
      %90 = vector.load %arg2[%c0_57, %c5, %c0_58] : memref<2x16x96xbf16, #tpu.memory_space<vmem>>, vector<2x1x32xbf16>
      %91 = vector.shape_cast %90 : vector<2x1x32xbf16> to vector<2x32xbf16>
      %92 = arith.extf %91 : vector<2x32xbf16> to vector<2x32xf32>
      %c0_59 = arith.constant 0 : index
      %c5_60 = arith.constant 5 : index
      %c32 = arith.constant 32 : index
      %93 = vector.load %arg2[%c0_59, %c5_60, %c32] : memref<2x16x96xbf16, #tpu.memory_space<vmem>>, vector<2x1x32xbf16>
      %94 = vector.shape_cast %93 : vector<2x1x32xbf16> to vector<2x32xbf16>
      %95 = arith.extf %94 : vector<2x32xbf16> to vector<2x32xf32>
      %c0_61 = arith.constant 0 : index
      %c5_62 = arith.constant 5 : index
      %c64 = arith.constant 64 : index
      %96 = vector.load %arg2[%c0_61, %c5_62, %c64] : memref<2x16x96xbf16, #tpu.memory_space<vmem>>, vector<2x1x32xbf16>
      %97 = vector.shape_cast %96 : vector<2x1x32xbf16> to vector<2x32xbf16>
      %98 = arith.extf %97 : vector<2x32xbf16> to vector<2x32xf32>
      %99 = vector.extract_strided_slice %88 {offsets = [0, 0], sizes = [2, 32], strides = [1, 1]} : vector<2x64xf32> to vector<2x32xf32>
      %100 = arith.addf %92, %99 : vector<2x32xf32>
      %101 = arith.negf %100 : vector<2x32xf32>
      %102 = math.exp %101 : vector<2x32xf32>
      %cst_63 = arith.constant 1.000000e+00 : f32
      %103 = vector.broadcast %cst_63 : f32 to vector<2x32xf32>
      %104 = arith.addf %103, %102 : vector<2x32xf32>
      %105 = arith.divf %103, %104 : vector<2x32xf32>
      %106 = vector.extract_strided_slice %88 {offsets = [0, 32], sizes = [2, 32], strides = [1, 1]} : vector<2x64xf32> to vector<2x32xf32>
      %107 = arith.addf %95, %106 : vector<2x32xf32>
      %108 = arith.negf %107 : vector<2x32xf32>
      %109 = math.exp %108 : vector<2x32xf32>
      %cst_64 = arith.constant 1.000000e+00 : f32
      %110 = vector.broadcast %cst_64 : f32 to vector<2x32xf32>
      %111 = arith.addf %110, %109 : vector<2x32xf32>
      %112 = arith.divf %110, %111 : vector<2x32xf32>
      %113 = vector.broadcast %5 : vector<1x32xf32> to vector<2x32xf32>
      %114 = arith.addf %89, %113 : vector<2x32xf32>
      %115 = arith.mulf %105, %114 : vector<2x32xf32>
      %116 = arith.addf %98, %115 : vector<2x32xf32>
      %117 = math.tanh %116 : vector<2x32xf32>
      %cst_65 = arith.constant 1.000000e+00 : f32
      %118 = vector.broadcast %cst_65 : f32 to vector<2x32xf32>
      %119 = arith.subf %118, %112 : vector<2x32xf32>
      %120 = arith.mulf %119, %117 : vector<2x32xf32>
      %121 = arith.mulf %112, %86 : vector<2x32xf32>
      %122 = arith.addf %120, %121 : vector<2x32xf32>
      %c0_66 = arith.constant 0 : index
      %c5_67 = arith.constant 5 : index
      %c0_68 = arith.constant 0 : index
      %123 = vector.load %arg6[%c0_66, %c5_67, %c0_68] : memref<2x16x32xf32, #tpu.memory_space<vmem>>, vector<2x1x32xf32>
      %124 = vector.shape_cast %123 : vector<2x1x32xf32> to vector<2x32xf32>
      %125 = arith.addf %122, %124 : vector<2x32xf32>
      %c0_69 = arith.constant 0 : index
      %c5_70 = arith.constant 5 : index
      %c0_71 = arith.constant 0 : index
      %126 = vector.load %arg7[%c0_69, %c5_70, %c0_71] : memref<2x16x32xf32, #tpu.memory_space<vmem>>, vector<2x1x32xf32>
      %127 = vector.shape_cast %126 : vector<2x1x32xf32> to vector<2x32xf32>
      %128 = vector.shape_cast %125 : vector<2x32xf32> to vector<2x1x32xf32>
      tpu.vector_store %arg7[%c0_69, %c5_70, %c0_71], %128 {strides = array<i32>} : memref<2x16x32xf32, #tpu.memory_space<vmem>>, vector<2x1x32xf32>,
      %c0_72 = arith.constant 0 : index
      %c0_73 = arith.constant 0 : index
      %129 = vector.load %arg8[%c0_72, %c0_73] : memref<2x32xf32, #tpu.memory_space<vmem>>, vector<2x32xf32>
      tpu.vector_store %arg8[%c0_72, %c0_73], %122 {strides = array<i32>} : memref<2x32xf32, #tpu.memory_space<vmem>>, vector<2x32xf32>,
    } else {
    }
    %c16_i32_23 = arith.constant 16 : i32
    %36 = arith.muli %arg1, %c16_i32_23 : i32
    %c6_i32 = arith.constant 6 : i32
    %37 = arith.addi %36, %c6_i32 : i32
    %c12_i32_24 = arith.constant 12 : i32
    %38 = arith.cmpi slt, %37, %c12_i32_24 : i32
    %39 = arith.extui %38 : i1 to i32
    %c0_i32_25 = arith.constant 0 : i32
    %40 = arith.cmpi ne, %39, %c0_i32_25 : i32
    scf.if %40 {
      %c0_54 = arith.constant 0 : index
      %c0_55 = arith.constant 0 : index
      %86 = vector.load %arg8[%c0_54, %c0_55] : memref<2x32xf32, #tpu.memory_space<vmem>>, vector<2x32xf32>
      %87 = arith.truncf %86 : vector<2x32xf32> to vector<2x32xbf16>
      %cst = arith.constant dense<0.000000e+00> : vector<2x64xf32>
      %88 = tpu.matmul %87, %3, %cst {dimension_numbers = #tpu.dot_dimension_numbers<[1], [0], [0], [1], [0, 0, 1, 1], [], []>} : vector<2x32xbf16>, vector<32x64xbf16>, vector<2x64xf32> -> vector<2x64xf32>
      %cst_56 = arith.constant dense<0.000000e+00> : vector<2x32xf32>
      %89 = tpu.matmul %87, %4, %cst_56 {dimension_numbers = #tpu.dot_dimension_numbers<[1], [0], [0], [1], [0, 0, 1, 1], [], []>} : vector<2x32xbf16>, vector<32x32xbf16>, vector<2x32xf32> -> vector<2x32xf32>
      %c0_57 = arith.constant 0 : index
      %c6 = arith.constant 6 : index
      %c0_58 = arith.constant 0 : index
      %90 = vector.load %arg2[%c0_57, %c6, %c0_58] : memref<2x16x96xbf16, #tpu.memory_space<vmem>>, vector<2x1x32xbf16>
      %91 = vector.shape_cast %90 : vector<2x1x32xbf16> to vector<2x32xbf16>
      %92 = arith.extf %91 : vector<2x32xbf16> to vector<2x32xf32>
      %c0_59 = arith.constant 0 : index
      %c6_60 = arith.constant 6 : index
      %c32 = arith.constant 32 : index
      %93 = vector.load %arg2[%c0_59, %c6_60, %c32] : memref<2x16x96xbf16, #tpu.memory_space<vmem>>, vector<2x1x32xbf16>
      %94 = vector.shape_cast %93 : vector<2x1x32xbf16> to vector<2x32xbf16>
      %95 = arith.extf %94 : vector<2x32xbf16> to vector<2x32xf32>
      %c0_61 = arith.constant 0 : index
      %c6_62 = arith.constant 6 : index
      %c64 = arith.constant 64 : index
      %96 = vector.load %arg2[%c0_61, %c6_62, %c64] : memref<2x16x96xbf16, #tpu.memory_space<vmem>>, vector<2x1x32xbf16>
      %97 = vector.shape_cast %96 : vector<2x1x32xbf16> to vector<2x32xbf16>
      %98 = arith.extf %97 : vector<2x32xbf16> to vector<2x32xf32>
      %99 = vector.extract_strided_slice %88 {offsets = [0, 0], sizes = [2, 32], strides = [1, 1]} : vector<2x64xf32> to vector<2x32xf32>
      %100 = arith.addf %92, %99 : vector<2x32xf32>
      %101 = arith.negf %100 : vector<2x32xf32>
      %102 = math.exp %101 : vector<2x32xf32>
      %cst_63 = arith.constant 1.000000e+00 : f32
      %103 = vector.broadcast %cst_63 : f32 to vector<2x32xf32>
      %104 = arith.addf %103, %102 : vector<2x32xf32>
      %105 = arith.divf %103, %104 : vector<2x32xf32>
      %106 = vector.extract_strided_slice %88 {offsets = [0, 32], sizes = [2, 32], strides = [1, 1]} : vector<2x64xf32> to vector<2x32xf32>
      %107 = arith.addf %95, %106 : vector<2x32xf32>
      %108 = arith.negf %107 : vector<2x32xf32>
      %109 = math.exp %108 : vector<2x32xf32>
      %cst_64 = arith.constant 1.000000e+00 : f32
      %110 = vector.broadcast %cst_64 : f32 to vector<2x32xf32>
      %111 = arith.addf %110, %109 : vector<2x32xf32>
      %112 = arith.divf %110, %111 : vector<2x32xf32>
      %113 = vector.broadcast %5 : vector<1x32xf32> to vector<2x32xf32>
      %114 = arith.addf %89, %113 : vector<2x32xf32>
      %115 = arith.mulf %105, %114 : vector<2x32xf32>
      %116 = arith.addf %98, %115 : vector<2x32xf32>
      %117 = math.tanh %116 : vector<2x32xf32>
      %cst_65 = arith.constant 1.000000e+00 : f32
      %118 = vector.broadcast %cst_65 : f32 to vector<2x32xf32>
      %119 = arith.subf %118, %112 : vector<2x32xf32>
      %120 = arith.mulf %119, %117 : vector<2x32xf32>
      %121 = arith.mulf %112, %86 : vector<2x32xf32>
      %122 = arith.addf %120, %121 : vector<2x32xf32>
      %c0_66 = arith.constant 0 : index
      %c6_67 = arith.constant 6 : index
      %c0_68 = arith.constant 0 : index
      %123 = vector.load %arg6[%c0_66, %c6_67, %c0_68] : memref<2x16x32xf32, #tpu.memory_space<vmem>>, vector<2x1x32xf32>
      %124 = vector.shape_cast %123 : vector<2x1x32xf32> to vector<2x32xf32>
      %125 = arith.addf %122, %124 : vector<2x32xf32>
      %c0_69 = arith.constant 0 : index
      %c6_70 = arith.constant 6 : index
      %c0_71 = arith.constant 0 : index
      %126 = vector.load %arg7[%c0_69, %c6_70, %c0_71] : memref<2x16x32xf32, #tpu.memory_space<vmem>>, vector<2x1x32xf32>
      %127 = vector.shape_cast %126 : vector<2x1x32xf32> to vector<2x32xf32>
      %128 = vector.shape_cast %125 : vector<2x32xf32> to vector<2x1x32xf32>
      tpu.vector_store %arg7[%c0_69, %c6_70, %c0_71], %128 {strides = array<i32>} : memref<2x16x32xf32, #tpu.memory_space<vmem>>, vector<2x1x32xf32>,
      %c0_72 = arith.constant 0 : index
      %c0_73 = arith.constant 0 : index
      %129 = vector.load %arg8[%c0_72, %c0_73] : memref<2x32xf32, #tpu.memory_space<vmem>>, vector<2x32xf32>
      tpu.vector_store %arg8[%c0_72, %c0_73], %122 {strides = array<i32>} : memref<2x32xf32, #tpu.memory_space<vmem>>, vector<2x32xf32>,
    } else {
    }
    %c16_i32_26 = arith.constant 16 : i32
    %41 = arith.muli %arg1, %c16_i32_26 : i32
    %c7_i32 = arith.constant 7 : i32
    %42 = arith.addi %41, %c7_i32 : i32
    %c12_i32_27 = arith.constant 12 : i32
    %43 = arith.cmpi slt, %42, %c12_i32_27 : i32
    %44 = arith.extui %43 : i1 to i32
    %c0_i32_28 = arith.constant 0 : i32
    %45 = arith.cmpi ne, %44, %c0_i32_28 : i32
    scf.if %45 {
      %c0_54 = arith.constant 0 : index
      %c0_55 = arith.constant 0 : index
      %86 = vector.load %arg8[%c0_54, %c0_55] : memref<2x32xf32, #tpu.memory_space<vmem>>, vector<2x32xf32>
      %87 = arith.truncf %86 : vector<2x32xf32> to vector<2x32xbf16>
      %cst = arith.constant dense<0.000000e+00> : vector<2x64xf32>
      %88 = tpu.matmul %87, %3, %cst {dimension_numbers = #tpu.dot_dimension_numbers<[1], [0], [0], [1], [0, 0, 1, 1], [], []>} : vector<2x32xbf16>, vector<32x64xbf16>, vector<2x64xf32> -> vector<2x64xf32>
      %cst_56 = arith.constant dense<0.000000e+00> : vector<2x32xf32>
      %89 = tpu.matmul %87, %4, %cst_56 {dimension_numbers = #tpu.dot_dimension_numbers<[1], [0], [0], [1], [0, 0, 1, 1], [], []>} : vector<2x32xbf16>, vector<32x32xbf16>, vector<2x32xf32> -> vector<2x32xf32>
      %c0_57 = arith.constant 0 : index
      %c7 = arith.constant 7 : index
      %c0_58 = arith.constant 0 : index
      %90 = vector.load %arg2[%c0_57, %c7, %c0_58] : memref<2x16x96xbf16, #tpu.memory_space<vmem>>, vector<2x1x32xbf16>
      %91 = vector.shape_cast %90 : vector<2x1x32xbf16> to vector<2x32xbf16>
      %92 = arith.extf %91 : vector<2x32xbf16> to vector<2x32xf32>
      %c0_59 = arith.constant 0 : index
      %c7_60 = arith.constant 7 : index
      %c32 = arith.constant 32 : index
      %93 = vector.load %arg2[%c0_59, %c7_60, %c32] : memref<2x16x96xbf16, #tpu.memory_space<vmem>>, vector<2x1x32xbf16>
      %94 = vector.shape_cast %93 : vector<2x1x32xbf16> to vector<2x32xbf16>
      %95 = arith.extf %94 : vector<2x32xbf16> to vector<2x32xf32>
      %c0_61 = arith.constant 0 : index
      %c7_62 = arith.constant 7 : index
      %c64 = arith.constant 64 : index
      %96 = vector.load %arg2[%c0_61, %c7_62, %c64] : memref<2x16x96xbf16, #tpu.memory_space<vmem>>, vector<2x1x32xbf16>
      %97 = vector.shape_cast %96 : vector<2x1x32xbf16> to vector<2x32xbf16>
      %98 = arith.extf %97 : vector<2x32xbf16> to vector<2x32xf32>
      %99 = vector.extract_strided_slice %88 {offsets = [0, 0], sizes = [2, 32], strides = [1, 1]} : vector<2x64xf32> to vector<2x32xf32>
      %100 = arith.addf %92, %99 : vector<2x32xf32>
      %101 = arith.negf %100 : vector<2x32xf32>
      %102 = math.exp %101 : vector<2x32xf32>
      %cst_63 = arith.constant 1.000000e+00 : f32
      %103 = vector.broadcast %cst_63 : f32 to vector<2x32xf32>
      %104 = arith.addf %103, %102 : vector<2x32xf32>
      %105 = arith.divf %103, %104 : vector<2x32xf32>
      %106 = vector.extract_strided_slice %88 {offsets = [0, 32], sizes = [2, 32], strides = [1, 1]} : vector<2x64xf32> to vector<2x32xf32>
      %107 = arith.addf %95, %106 : vector<2x32xf32>
      %108 = arith.negf %107 : vector<2x32xf32>
      %109 = math.exp %108 : vector<2x32xf32>
      %cst_64 = arith.constant 1.000000e+00 : f32
      %110 = vector.broadcast %cst_64 : f32 to vector<2x32xf32>
      %111 = arith.addf %110, %109 : vector<2x32xf32>
      %112 = arith.divf %110, %111 : vector<2x32xf32>
      %113 = vector.broadcast %5 : vector<1x32xf32> to vector<2x32xf32>
      %114 = arith.addf %89, %113 : vector<2x32xf32>
      %115 = arith.mulf %105, %114 : vector<2x32xf32>
      %116 = arith.addf %98, %115 : vector<2x32xf32>
      %117 = math.tanh %116 : vector<2x32xf32>
      %cst_65 = arith.constant 1.000000e+00 : f32
      %118 = vector.broadcast %cst_65 : f32 to vector<2x32xf32>
      %119 = arith.subf %118, %112 : vector<2x32xf32>
      %120 = arith.mulf %119, %117 : vector<2x32xf32>
      %121 = arith.mulf %112, %86 : vector<2x32xf32>
      %122 = arith.addf %120, %121 : vector<2x32xf32>
      %c0_66 = arith.constant 0 : index
      %c7_67 = arith.constant 7 : index
      %c0_68 = arith.constant 0 : index
      %123 = vector.load %arg6[%c0_66, %c7_67, %c0_68] : memref<2x16x32xf32, #tpu.memory_space<vmem>>, vector<2x1x32xf32>
      %124 = vector.shape_cast %123 : vector<2x1x32xf32> to vector<2x32xf32>
      %125 = arith.addf %122, %124 : vector<2x32xf32>
      %c0_69 = arith.constant 0 : index
      %c7_70 = arith.constant 7 : index
      %c0_71 = arith.constant 0 : index
      %126 = vector.load %arg7[%c0_69, %c7_70, %c0_71] : memref<2x16x32xf32, #tpu.memory_space<vmem>>, vector<2x1x32xf32>
      %127 = vector.shape_cast %126 : vector<2x1x32xf32> to vector<2x32xf32>
      %128 = vector.shape_cast %125 : vector<2x32xf32> to vector<2x1x32xf32>
      tpu.vector_store %arg7[%c0_69, %c7_70, %c0_71], %128 {strides = array<i32>} : memref<2x16x32xf32, #tpu.memory_space<vmem>>, vector<2x1x32xf32>,
      %c0_72 = arith.constant 0 : index
      %c0_73 = arith.constant 0 : index
      %129 = vector.load %arg8[%c0_72, %c0_73] : memref<2x32xf32, #tpu.memory_space<vmem>>, vector<2x32xf32>
      tpu.vector_store %arg8[%c0_72, %c0_73], %122 {strides = array<i32>} : memref<2x32xf32, #tpu.memory_space<vmem>>, vector<2x32xf32>,
    } else {
    }
    %c16_i32_29 = arith.constant 16 : i32
    %46 = arith.muli %arg1, %c16_i32_29 : i32
    %c8_i32 = arith.constant 8 : i32
    %47 = arith.addi %46, %c8_i32 : i32
    %c12_i32_30 = arith.constant 12 : i32
    %48 = arith.cmpi slt, %47, %c12_i32_30 : i32
    %49 = arith.extui %48 : i1 to i32
    %c0_i32_31 = arith.constant 0 : i32
    %50 = arith.cmpi ne, %49, %c0_i32_31 : i32
    scf.if %50 {
      %c0_54 = arith.constant 0 : index
      %c0_55 = arith.constant 0 : index
      %86 = vector.load %arg8[%c0_54, %c0_55] : memref<2x32xf32, #tpu.memory_space<vmem>>, vector<2x32xf32>
      %87 = arith.truncf %86 : vector<2x32xf32> to vector<2x32xbf16>
      %cst = arith.constant dense<0.000000e+00> : vector<2x64xf32>
      %88 = tpu.matmul %87, %3, %cst {dimension_numbers = #tpu.dot_dimension_numbers<[1], [0], [0], [1], [0, 0, 1, 1], [], []>} : vector<2x32xbf16>, vector<32x64xbf16>, vector<2x64xf32> -> vector<2x64xf32>
      %cst_56 = arith.constant dense<0.000000e+00> : vector<2x32xf32>
      %89 = tpu.matmul %87, %4, %cst_56 {dimension_numbers = #tpu.dot_dimension_numbers<[1], [0], [0], [1], [0, 0, 1, 1], [], []>} : vector<2x32xbf16>, vector<32x32xbf16>, vector<2x32xf32> -> vector<2x32xf32>
      %c0_57 = arith.constant 0 : index
      %c8 = arith.constant 8 : index
      %c0_58 = arith.constant 0 : index
      %90 = vector.load %arg2[%c0_57, %c8, %c0_58] : memref<2x16x96xbf16, #tpu.memory_space<vmem>>, vector<2x1x32xbf16>
      %91 = vector.shape_cast %90 : vector<2x1x32xbf16> to vector<2x32xbf16>
      %92 = arith.extf %91 : vector<2x32xbf16> to vector<2x32xf32>
      %c0_59 = arith.constant 0 : index
      %c8_60 = arith.constant 8 : index
      %c32 = arith.constant 32 : index
      %93 = vector.load %arg2[%c0_59, %c8_60, %c32] : memref<2x16x96xbf16, #tpu.memory_space<vmem>>, vector<2x1x32xbf16>
      %94 = vector.shape_cast %93 : vector<2x1x32xbf16> to vector<2x32xbf16>
      %95 = arith.extf %94 : vector<2x32xbf16> to vector<2x32xf32>
      %c0_61 = arith.constant 0 : index
      %c8_62 = arith.constant 8 : index
      %c64 = arith.constant 64 : index
      %96 = vector.load %arg2[%c0_61, %c8_62, %c64] : memref<2x16x96xbf16, #tpu.memory_space<vmem>>, vector<2x1x32xbf16>
      %97 = vector.shape_cast %96 : vector<2x1x32xbf16> to vector<2x32xbf16>
      %98 = arith.extf %97 : vector<2x32xbf16> to vector<2x32xf32>
      %99 = vector.extract_strided_slice %88 {offsets = [0, 0], sizes = [2, 32], strides = [1, 1]} : vector<2x64xf32> to vector<2x32xf32>
      %100 = arith.addf %92, %99 : vector<2x32xf32>
      %101 = arith.negf %100 : vector<2x32xf32>
      %102 = math.exp %101 : vector<2x32xf32>
      %cst_63 = arith.constant 1.000000e+00 : f32
      %103 = vector.broadcast %cst_63 : f32 to vector<2x32xf32>
      %104 = arith.addf %103, %102 : vector<2x32xf32>
      %105 = arith.divf %103, %104 : vector<2x32xf32>
      %106 = vector.extract_strided_slice %88 {offsets = [0, 32], sizes = [2, 32], strides = [1, 1]} : vector<2x64xf32> to vector<2x32xf32>
      %107 = arith.addf %95, %106 : vector<2x32xf32>
      %108 = arith.negf %107 : vector<2x32xf32>
      %109 = math.exp %108 : vector<2x32xf32>
      %cst_64 = arith.constant 1.000000e+00 : f32
      %110 = vector.broadcast %cst_64 : f32 to vector<2x32xf32>
      %111 = arith.addf %110, %109 : vector<2x32xf32>
      %112 = arith.divf %110, %111 : vector<2x32xf32>
      %113 = vector.broadcast %5 : vector<1x32xf32> to vector<2x32xf32>
      %114 = arith.addf %89, %113 : vector<2x32xf32>
      %115 = arith.mulf %105, %114 : vector<2x32xf32>
      %116 = arith.addf %98, %115 : vector<2x32xf32>
      %117 = math.tanh %116 : vector<2x32xf32>
      %cst_65 = arith.constant 1.000000e+00 : f32
      %118 = vector.broadcast %cst_65 : f32 to vector<2x32xf32>
      %119 = arith.subf %118, %112 : vector<2x32xf32>
      %120 = arith.mulf %119, %117 : vector<2x32xf32>
      %121 = arith.mulf %112, %86 : vector<2x32xf32>
      %122 = arith.addf %120, %121 : vector<2x32xf32>
      %c0_66 = arith.constant 0 : index
      %c8_67 = arith.constant 8 : index
      %c0_68 = arith.constant 0 : index
      %123 = vector.load %arg6[%c0_66, %c8_67, %c0_68] : memref<2x16x32xf32, #tpu.memory_space<vmem>>, vector<2x1x32xf32>
      %124 = vector.shape_cast %123 : vector<2x1x32xf32> to vector<2x32xf32>
      %125 = arith.addf %122, %124 : vector<2x32xf32>
      %c0_69 = arith.constant 0 : index
      %c8_70 = arith.constant 8 : index
      %c0_71 = arith.constant 0 : index
      %126 = vector.load %arg7[%c0_69, %c8_70, %c0_71] : memref<2x16x32xf32, #tpu.memory_space<vmem>>, vector<2x1x32xf32>
      %127 = vector.shape_cast %126 : vector<2x1x32xf32> to vector<2x32xf32>
      %128 = vector.shape_cast %125 : vector<2x32xf32> to vector<2x1x32xf32>
      tpu.vector_store %arg7[%c0_69, %c8_70, %c0_71], %128 {strides = array<i32>} : memref<2x16x32xf32, #tpu.memory_space<vmem>>, vector<2x1x32xf32>,
      %c0_72 = arith.constant 0 : index
      %c0_73 = arith.constant 0 : index
      %129 = vector.load %arg8[%c0_72, %c0_73] : memref<2x32xf32, #tpu.memory_space<vmem>>, vector<2x32xf32>
      tpu.vector_store %arg8[%c0_72, %c0_73], %122 {strides = array<i32>} : memref<2x32xf32, #tpu.memory_space<vmem>>, vector<2x32xf32>,
    } else {
    }
    %c16_i32_32 = arith.constant 16 : i32
    %51 = arith.muli %arg1, %c16_i32_32 : i32
    %c9_i32 = arith.constant 9 : i32
    %52 = arith.addi %51, %c9_i32 : i32
    %c12_i32_33 = arith.constant 12 : i32
    %53 = arith.cmpi slt, %52, %c12_i32_33 : i32
    %54 = arith.extui %53 : i1 to i32
    %c0_i32_34 = arith.constant 0 : i32
    %55 = arith.cmpi ne, %54, %c0_i32_34 : i32
    scf.if %55 {
      %c0_54 = arith.constant 0 : index
      %c0_55 = arith.constant 0 : index
      %86 = vector.load %arg8[%c0_54, %c0_55] : memref<2x32xf32, #tpu.memory_space<vmem>>, vector<2x32xf32>
      %87 = arith.truncf %86 : vector<2x32xf32> to vector<2x32xbf16>
      %cst = arith.constant dense<0.000000e+00> : vector<2x64xf32>
      %88 = tpu.matmul %87, %3, %cst {dimension_numbers = #tpu.dot_dimension_numbers<[1], [0], [0], [1], [0, 0, 1, 1], [], []>} : vector<2x32xbf16>, vector<32x64xbf16>, vector<2x64xf32> -> vector<2x64xf32>
      %cst_56 = arith.constant dense<0.000000e+00> : vector<2x32xf32>
      %89 = tpu.matmul %87, %4, %cst_56 {dimension_numbers = #tpu.dot_dimension_numbers<[1], [0], [0], [1], [0, 0, 1, 1], [], []>} : vector<2x32xbf16>, vector<32x32xbf16>, vector<2x32xf32> -> vector<2x32xf32>
      %c0_57 = arith.constant 0 : index
      %c9 = arith.constant 9 : index
      %c0_58 = arith.constant 0 : index
      %90 = vector.load %arg2[%c0_57, %c9, %c0_58] : memref<2x16x96xbf16, #tpu.memory_space<vmem>>, vector<2x1x32xbf16>
      %91 = vector.shape_cast %90 : vector<2x1x32xbf16> to vector<2x32xbf16>
      %92 = arith.extf %91 : vector<2x32xbf16> to vector<2x32xf32>
      %c0_59 = arith.constant 0 : index
      %c9_60 = arith.constant 9 : index
      %c32 = arith.constant 32 : index
      %93 = vector.load %arg2[%c0_59, %c9_60, %c32] : memref<2x16x96xbf16, #tpu.memory_space<vmem>>, vector<2x1x32xbf16>
      %94 = vector.shape_cast %93 : vector<2x1x32xbf16> to vector<2x32xbf16>
      %95 = arith.extf %94 : vector<2x32xbf16> to vector<2x32xf32>
      %c0_61 = arith.constant 0 : index
      %c9_62 = arith.constant 9 : index
      %c64 = arith.constant 64 : index
      %96 = vector.load %arg2[%c0_61, %c9_62, %c64] : memref<2x16x96xbf16, #tpu.memory_space<vmem>>, vector<2x1x32xbf16>
      %97 = vector.shape_cast %96 : vector<2x1x32xbf16> to vector<2x32xbf16>
      %98 = arith.extf %97 : vector<2x32xbf16> to vector<2x32xf32>
      %99 = vector.extract_strided_slice %88 {offsets = [0, 0], sizes = [2, 32], strides = [1, 1]} : vector<2x64xf32> to vector<2x32xf32>
      %100 = arith.addf %92, %99 : vector<2x32xf32>
      %101 = arith.negf %100 : vector<2x32xf32>
      %102 = math.exp %101 : vector<2x32xf32>
      %cst_63 = arith.constant 1.000000e+00 : f32
      %103 = vector.broadcast %cst_63 : f32 to vector<2x32xf32>
      %104 = arith.addf %103, %102 : vector<2x32xf32>
      %105 = arith.divf %103, %104 : vector<2x32xf32>
      %106 = vector.extract_strided_slice %88 {offsets = [0, 32], sizes = [2, 32], strides = [1, 1]} : vector<2x64xf32> to vector<2x32xf32>
      %107 = arith.addf %95, %106 : vector<2x32xf32>
      %108 = arith.negf %107 : vector<2x32xf32>
      %109 = math.exp %108 : vector<2x32xf32>
      %cst_64 = arith.constant 1.000000e+00 : f32
      %110 = vector.broadcast %cst_64 : f32 to vector<2x32xf32>
      %111 = arith.addf %110, %109 : vector<2x32xf32>
      %112 = arith.divf %110, %111 : vector<2x32xf32>
      %113 = vector.broadcast %5 : vector<1x32xf32> to vector<2x32xf32>
      %114 = arith.addf %89, %113 : vector<2x32xf32>
      %115 = arith.mulf %105, %114 : vector<2x32xf32>
      %116 = arith.addf %98, %115 : vector<2x32xf32>
      %117 = math.tanh %116 : vector<2x32xf32>
      %cst_65 = arith.constant 1.000000e+00 : f32
      %118 = vector.broadcast %cst_65 : f32 to vector<2x32xf32>
      %119 = arith.subf %118, %112 : vector<2x32xf32>
      %120 = arith.mulf %119, %117 : vector<2x32xf32>
      %121 = arith.mulf %112, %86 : vector<2x32xf32>
      %122 = arith.addf %120, %121 : vector<2x32xf32>
      %c0_66 = arith.constant 0 : index
      %c9_67 = arith.constant 9 : index
      %c0_68 = arith.constant 0 : index
      %123 = vector.load %arg6[%c0_66, %c9_67, %c0_68] : memref<2x16x32xf32, #tpu.memory_space<vmem>>, vector<2x1x32xf32>
      %124 = vector.shape_cast %123 : vector<2x1x32xf32> to vector<2x32xf32>
      %125 = arith.addf %122, %124 : vector<2x32xf32>
      %c0_69 = arith.constant 0 : index
      %c9_70 = arith.constant 9 : index
      %c0_71 = arith.constant 0 : index
      %126 = vector.load %arg7[%c0_69, %c9_70, %c0_71] : memref<2x16x32xf32, #tpu.memory_space<vmem>>, vector<2x1x32xf32>
      %127 = vector.shape_cast %126 : vector<2x1x32xf32> to vector<2x32xf32>
      %128 = vector.shape_cast %125 : vector<2x32xf32> to vector<2x1x32xf32>
      tpu.vector_store %arg7[%c0_69, %c9_70, %c0_71], %128 {strides = array<i32>} : memref<2x16x32xf32, #tpu.memory_space<vmem>>, vector<2x1x32xf32>,
      %c0_72 = arith.constant 0 : index
      %c0_73 = arith.constant 0 : index
      %129 = vector.load %arg8[%c0_72, %c0_73] : memref<2x32xf32, #tpu.memory_space<vmem>>, vector<2x32xf32>
      tpu.vector_store %arg8[%c0_72, %c0_73], %122 {strides = array<i32>} : memref<2x32xf32, #tpu.memory_space<vmem>>, vector<2x32xf32>,
    } else {
    }
    %c16_i32_35 = arith.constant 16 : i32
    %56 = arith.muli %arg1, %c16_i32_35 : i32
    %c10_i32 = arith.constant 10 : i32
    %57 = arith.addi %56, %c10_i32 : i32
    %c12_i32_36 = arith.constant 12 : i32
    %58 = arith.cmpi slt, %57, %c12_i32_36 : i32
    %59 = arith.extui %58 : i1 to i32
    %c0_i32_37 = arith.constant 0 : i32
    %60 = arith.cmpi ne, %59, %c0_i32_37 : i32
    scf.if %60 {
      %c0_54 = arith.constant 0 : index
      %c0_55 = arith.constant 0 : index
      %86 = vector.load %arg8[%c0_54, %c0_55] : memref<2x32xf32, #tpu.memory_space<vmem>>, vector<2x32xf32>
      %87 = arith.truncf %86 : vector<2x32xf32> to vector<2x32xbf16>
      %cst = arith.constant dense<0.000000e+00> : vector<2x64xf32>
      %88 = tpu.matmul %87, %3, %cst {dimension_numbers = #tpu.dot_dimension_numbers<[1], [0], [0], [1], [0, 0, 1, 1], [], []>} : vector<2x32xbf16>, vector<32x64xbf16>, vector<2x64xf32> -> vector<2x64xf32>
      %cst_56 = arith.constant dense<0.000000e+00> : vector<2x32xf32>
      %89 = tpu.matmul %87, %4, %cst_56 {dimension_numbers = #tpu.dot_dimension_numbers<[1], [0], [0], [1], [0, 0, 1, 1], [], []>} : vector<2x32xbf16>, vector<32x32xbf16>, vector<2x32xf32> -> vector<2x32xf32>
      %c0_57 = arith.constant 0 : index
      %c10 = arith.constant 10 : index
      %c0_58 = arith.constant 0 : index
      %90 = vector.load %arg2[%c0_57, %c10, %c0_58] : memref<2x16x96xbf16, #tpu.memory_space<vmem>>, vector<2x1x32xbf16>
      %91 = vector.shape_cast %90 : vector<2x1x32xbf16> to vector<2x32xbf16>
      %92 = arith.extf %91 : vector<2x32xbf16> to vector<2x32xf32>
      %c0_59 = arith.constant 0 : index
      %c10_60 = arith.constant 10 : index
      %c32 = arith.constant 32 : index
      %93 = vector.load %arg2[%c0_59, %c10_60, %c32] : memref<2x16x96xbf16, #tpu.memory_space<vmem>>, vector<2x1x32xbf16>
      %94 = vector.shape_cast %93 : vector<2x1x32xbf16> to vector<2x32xbf16>
      %95 = arith.extf %94 : vector<2x32xbf16> to vector<2x32xf32>
      %c0_61 = arith.constant 0 : index
      %c10_62 = arith.constant 10 : index
      %c64 = arith.constant 64 : index
      %96 = vector.load %arg2[%c0_61, %c10_62, %c64] : memref<2x16x96xbf16, #tpu.memory_space<vmem>>, vector<2x1x32xbf16>
      %97 = vector.shape_cast %96 : vector<2x1x32xbf16> to vector<2x32xbf16>
      %98 = arith.extf %97 : vector<2x32xbf16> to vector<2x32xf32>
      %99 = vector.extract_strided_slice %88 {offsets = [0, 0], sizes = [2, 32], strides = [1, 1]} : vector<2x64xf32> to vector<2x32xf32>
      %100 = arith.addf %92, %99 : vector<2x32xf32>
      %101 = arith.negf %100 : vector<2x32xf32>
      %102 = math.exp %101 : vector<2x32xf32>
      %cst_63 = arith.constant 1.000000e+00 : f32
      %103 = vector.broadcast %cst_63 : f32 to vector<2x32xf32>
      %104 = arith.addf %103, %102 : vector<2x32xf32>
      %105 = arith.divf %103, %104 : vector<2x32xf32>
      %106 = vector.extract_strided_slice %88 {offsets = [0, 32], sizes = [2, 32], strides = [1, 1]} : vector<2x64xf32> to vector<2x32xf32>
      %107 = arith.addf %95, %106 : vector<2x32xf32>
      %108 = arith.negf %107 : vector<2x32xf32>
      %109 = math.exp %108 : vector<2x32xf32>
      %cst_64 = arith.constant 1.000000e+00 : f32
      %110 = vector.broadcast %cst_64 : f32 to vector<2x32xf32>
      %111 = arith.addf %110, %109 : vector<2x32xf32>
      %112 = arith.divf %110, %111 : vector<2x32xf32>
      %113 = vector.broadcast %5 : vector<1x32xf32> to vector<2x32xf32>
      %114 = arith.addf %89, %113 : vector<2x32xf32>
      %115 = arith.mulf %105, %114 : vector<2x32xf32>
      %116 = arith.addf %98, %115 : vector<2x32xf32>
      %117 = math.tanh %116 : vector<2x32xf32>
      %cst_65 = arith.constant 1.000000e+00 : f32
      %118 = vector.broadcast %cst_65 : f32 to vector<2x32xf32>
      %119 = arith.subf %118, %112 : vector<2x32xf32>
      %120 = arith.mulf %119, %117 : vector<2x32xf32>
      %121 = arith.mulf %112, %86 : vector<2x32xf32>
      %122 = arith.addf %120, %121 : vector<2x32xf32>
      %c0_66 = arith.constant 0 : index
      %c10_67 = arith.constant 10 : index
      %c0_68 = arith.constant 0 : index
      %123 = vector.load %arg6[%c0_66, %c10_67, %c0_68] : memref<2x16x32xf32, #tpu.memory_space<vmem>>, vector<2x1x32xf32>
      %124 = vector.shape_cast %123 : vector<2x1x32xf32> to vector<2x32xf32>
      %125 = arith.addf %122, %124 : vector<2x32xf32>
      %c0_69 = arith.constant 0 : index
      %c10_70 = arith.constant 10 : index
      %c0_71 = arith.constant 0 : index
      %126 = vector.load %arg7[%c0_69, %c10_70, %c0_71] : memref<2x16x32xf32, #tpu.memory_space<vmem>>, vector<2x1x32xf32>
      %127 = vector.shape_cast %126 : vector<2x1x32xf32> to vector<2x32xf32>
      %128 = vector.shape_cast %125 : vector<2x32xf32> to vector<2x1x32xf32>
      tpu.vector_store %arg7[%c0_69, %c10_70, %c0_71], %128 {strides = array<i32>} : memref<2x16x32xf32, #tpu.memory_space<vmem>>, vector<2x1x32xf32>,
      %c0_72 = arith.constant 0 : index
      %c0_73 = arith.constant 0 : index
      %129 = vector.load %arg8[%c0_72, %c0_73] : memref<2x32xf32, #tpu.memory_space<vmem>>, vector<2x32xf32>
      tpu.vector_store %arg8[%c0_72, %c0_73], %122 {strides = array<i32>} : memref<2x32xf32, #tpu.memory_space<vmem>>, vector<2x32xf32>,
    } else {
    }
    %c16_i32_38 = arith.constant 16 : i32
    %61 = arith.muli %arg1, %c16_i32_38 : i32
    %c11_i32 = arith.constant 11 : i32
    %62 = arith.addi %61, %c11_i32 : i32
    %c12_i32_39 = arith.constant 12 : i32
    %63 = arith.cmpi slt, %62, %c12_i32_39 : i32
    %64 = arith.extui %63 : i1 to i32
    %c0_i32_40 = arith.constant 0 : i32
    %65 = arith.cmpi ne, %64, %c0_i32_40 : i32
    scf.if %65 {
      %c0_54 = arith.constant 0 : index
      %c0_55 = arith.constant 0 : index
      %86 = vector.load %arg8[%c0_54, %c0_55] : memref<2x32xf32, #tpu.memory_space<vmem>>, vector<2x32xf32>
      %87 = arith.truncf %86 : vector<2x32xf32> to vector<2x32xbf16>
      %cst = arith.constant dense<0.000000e+00> : vector<2x64xf32>
      %88 = tpu.matmul %87, %3, %cst {dimension_numbers = #tpu.dot_dimension_numbers<[1], [0], [0], [1], [0, 0, 1, 1], [], []>} : vector<2x32xbf16>, vector<32x64xbf16>, vector<2x64xf32> -> vector<2x64xf32>
      %cst_56 = arith.constant dense<0.000000e+00> : vector<2x32xf32>
      %89 = tpu.matmul %87, %4, %cst_56 {dimension_numbers = #tpu.dot_dimension_numbers<[1], [0], [0], [1], [0, 0, 1, 1], [], []>} : vector<2x32xbf16>, vector<32x32xbf16>, vector<2x32xf32> -> vector<2x32xf32>
      %c0_57 = arith.constant 0 : index
      %c11 = arith.constant 11 : index
      %c0_58 = arith.constant 0 : index
      %90 = vector.load %arg2[%c0_57, %c11, %c0_58] : memref<2x16x96xbf16, #tpu.memory_space<vmem>>, vector<2x1x32xbf16>
      %91 = vector.shape_cast %90 : vector<2x1x32xbf16> to vector<2x32xbf16>
      %92 = arith.extf %91 : vector<2x32xbf16> to vector<2x32xf32>
      %c0_59 = arith.constant 0 : index
      %c11_60 = arith.constant 11 : index
      %c32 = arith.constant 32 : index
      %93 = vector.load %arg2[%c0_59, %c11_60, %c32] : memref<2x16x96xbf16, #tpu.memory_space<vmem>>, vector<2x1x32xbf16>
      %94 = vector.shape_cast %93 : vector<2x1x32xbf16> to vector<2x32xbf16>
      %95 = arith.extf %94 : vector<2x32xbf16> to vector<2x32xf32>
      %c0_61 = arith.constant 0 : index
      %c11_62 = arith.constant 11 : index
      %c64 = arith.constant 64 : index
      %96 = vector.load %arg2[%c0_61, %c11_62, %c64] : memref<2x16x96xbf16, #tpu.memory_space<vmem>>, vector<2x1x32xbf16>
      %97 = vector.shape_cast %96 : vector<2x1x32xbf16> to vector<2x32xbf16>
      %98 = arith.extf %97 : vector<2x32xbf16> to vector<2x32xf32>
      %99 = vector.extract_strided_slice %88 {offsets = [0, 0], sizes = [2, 32], strides = [1, 1]} : vector<2x64xf32> to vector<2x32xf32>
      %100 = arith.addf %92, %99 : vector<2x32xf32>
      %101 = arith.negf %100 : vector<2x32xf32>
      %102 = math.exp %101 : vector<2x32xf32>
      %cst_63 = arith.constant 1.000000e+00 : f32
      %103 = vector.broadcast %cst_63 : f32 to vector<2x32xf32>
      %104 = arith.addf %103, %102 : vector<2x32xf32>
      %105 = arith.divf %103, %104 : vector<2x32xf32>
      %106 = vector.extract_strided_slice %88 {offsets = [0, 32], sizes = [2, 32], strides = [1, 1]} : vector<2x64xf32> to vector<2x32xf32>
      %107 = arith.addf %95, %106 : vector<2x32xf32>
      %108 = arith.negf %107 : vector<2x32xf32>
      %109 = math.exp %108 : vector<2x32xf32>
      %cst_64 = arith.constant 1.000000e+00 : f32
      %110 = vector.broadcast %cst_64 : f32 to vector<2x32xf32>
      %111 = arith.addf %110, %109 : vector<2x32xf32>
      %112 = arith.divf %110, %111 : vector<2x32xf32>
      %113 = vector.broadcast %5 : vector<1x32xf32> to vector<2x32xf32>
      %114 = arith.addf %89, %113 : vector<2x32xf32>
      %115 = arith.mulf %105, %114 : vector<2x32xf32>
      %116 = arith.addf %98, %115 : vector<2x32xf32>
      %117 = math.tanh %116 : vector<2x32xf32>
      %cst_65 = arith.constant 1.000000e+00 : f32
      %118 = vector.broadcast %cst_65 : f32 to vector<2x32xf32>
      %119 = arith.subf %118, %112 : vector<2x32xf32>
      %120 = arith.mulf %119, %117 : vector<2x32xf32>
      %121 = arith.mulf %112, %86 : vector<2x32xf32>
      %122 = arith.addf %120, %121 : vector<2x32xf32>
      %c0_66 = arith.constant 0 : index
      %c11_67 = arith.constant 11 : index
      %c0_68 = arith.constant 0 : index
      %123 = vector.load %arg6[%c0_66, %c11_67, %c0_68] : memref<2x16x32xf32, #tpu.memory_space<vmem>>, vector<2x1x32xf32>
      %124 = vector.shape_cast %123 : vector<2x1x32xf32> to vector<2x32xf32>
      %125 = arith.addf %122, %124 : vector<2x32xf32>
      %c0_69 = arith.constant 0 : index
      %c11_70 = arith.constant 11 : index
      %c0_71 = arith.constant 0 : index
      %126 = vector.load %arg7[%c0_69, %c11_70, %c0_71] : memref<2x16x32xf32, #tpu.memory_space<vmem>>, vector<2x1x32xf32>
      %127 = vector.shape_cast %126 : vector<2x1x32xf32> to vector<2x32xf32>
      %128 = vector.shape_cast %125 : vector<2x32xf32> to vector<2x1x32xf32>
      tpu.vector_store %arg7[%c0_69, %c11_70, %c0_71], %128 {strides = array<i32>} : memref<2x16x32xf32, #tpu.memory_space<vmem>>, vector<2x1x32xf32>,
      %c0_72 = arith.constant 0 : index
      %c0_73 = arith.constant 0 : index
      %129 = vector.load %arg8[%c0_72, %c0_73] : memref<2x32xf32, #tpu.memory_space<vmem>>, vector<2x32xf32>
      tpu.vector_store %arg8[%c0_72, %c0_73], %122 {strides = array<i32>} : memref<2x32xf32, #tpu.memory_space<vmem>>, vector<2x32xf32>,
    } else {
    }
    %c16_i32_41 = arith.constant 16 : i32
    %66 = arith.muli %arg1, %c16_i32_41 : i32
    %c12_i32_42 = arith.constant 12 : i32
    %67 = arith.addi %66, %c12_i32_42 : i32
    %c12_i32_43 = arith.constant 12 : i32
    %68 = arith.cmpi slt, %67, %c12_i32_43 : i32
    %69 = arith.extui %68 : i1 to i32
    %c0_i32_44 = arith.constant 0 : i32
    %70 = arith.cmpi ne, %69, %c0_i32_44 : i32
    scf.if %70 {
      %c0_54 = arith.constant 0 : index
      %c0_55 = arith.constant 0 : index
      %86 = vector.load %arg8[%c0_54, %c0_55] : memref<2x32xf32, #tpu.memory_space<vmem>>, vector<2x32xf32>
      %87 = arith.truncf %86 : vector<2x32xf32> to vector<2x32xbf16>
      %cst = arith.constant dense<0.000000e+00> : vector<2x64xf32>
      %88 = tpu.matmul %87, %3, %cst {dimension_numbers = #tpu.dot_dimension_numbers<[1], [0], [0], [1], [0, 0, 1, 1], [], []>} : vector<2x32xbf16>, vector<32x64xbf16>, vector<2x64xf32> -> vector<2x64xf32>
      %cst_56 = arith.constant dense<0.000000e+00> : vector<2x32xf32>
      %89 = tpu.matmul %87, %4, %cst_56 {dimension_numbers = #tpu.dot_dimension_numbers<[1], [0], [0], [1], [0, 0, 1, 1], [], []>} : vector<2x32xbf16>, vector<32x32xbf16>, vector<2x32xf32> -> vector<2x32xf32>
      %c0_57 = arith.constant 0 : index
      %c12 = arith.constant 12 : index
      %c0_58 = arith.constant 0 : index
      %90 = vector.load %arg2[%c0_57, %c12, %c0_58] : memref<2x16x96xbf16, #tpu.memory_space<vmem>>, vector<2x1x32xbf16>
      %91 = vector.shape_cast %90 : vector<2x1x32xbf16> to vector<2x32xbf16>
      %92 = arith.extf %91 : vector<2x32xbf16> to vector<2x32xf32>
      %c0_59 = arith.constant 0 : index
      %c12_60 = arith.constant 12 : index
      %c32 = arith.constant 32 : index
      %93 = vector.load %arg2[%c0_59, %c12_60, %c32] : memref<2x16x96xbf16, #tpu.memory_space<vmem>>, vector<2x1x32xbf16>
      %94 = vector.shape_cast %93 : vector<2x1x32xbf16> to vector<2x32xbf16>
      %95 = arith.extf %94 : vector<2x32xbf16> to vector<2x32xf32>
      %c0_61 = arith.constant 0 : index
      %c12_62 = arith.constant 12 : index
      %c64 = arith.constant 64 : index
      %96 = vector.load %arg2[%c0_61, %c12_62, %c64] : memref<2x16x96xbf16, #tpu.memory_space<vmem>>, vector<2x1x32xbf16>
      %97 = vector.shape_cast %96 : vector<2x1x32xbf16> to vector<2x32xbf16>
      %98 = arith.extf %97 : vector<2x32xbf16> to vector<2x32xf32>
      %99 = vector.extract_strided_slice %88 {offsets = [0, 0], sizes = [2, 32], strides = [1, 1]} : vector<2x64xf32> to vector<2x32xf32>
      %100 = arith.addf %92, %99 : vector<2x32xf32>
      %101 = arith.negf %100 : vector<2x32xf32>
      %102 = math.exp %101 : vector<2x32xf32>
      %cst_63 = arith.constant 1.000000e+00 : f32
      %103 = vector.broadcast %cst_63 : f32 to vector<2x32xf32>
      %104 = arith.addf %103, %102 : vector<2x32xf32>
      %105 = arith.divf %103, %104 : vector<2x32xf32>
      %106 = vector.extract_strided_slice %88 {offsets = [0, 32], sizes = [2, 32], strides = [1, 1]} : vector<2x64xf32> to vector<2x32xf32>
      %107 = arith.addf %95, %106 : vector<2x32xf32>
      %108 = arith.negf %107 : vector<2x32xf32>
      %109 = math.exp %108 : vector<2x32xf32>
      %cst_64 = arith.constant 1.000000e+00 : f32
      %110 = vector.broadcast %cst_64 : f32 to vector<2x32xf32>
      %111 = arith.addf %110, %109 : vector<2x32xf32>
      %112 = arith.divf %110, %111 : vector<2x32xf32>
      %113 = vector.broadcast %5 : vector<1x32xf32> to vector<2x32xf32>
      %114 = arith.addf %89, %113 : vector<2x32xf32>
      %115 = arith.mulf %105, %114 : vector<2x32xf32>
      %116 = arith.addf %98, %115 : vector<2x32xf32>
      %117 = math.tanh %116 : vector<2x32xf32>
      %cst_65 = arith.constant 1.000000e+00 : f32
      %118 = vector.broadcast %cst_65 : f32 to vector<2x32xf32>
      %119 = arith.subf %118, %112 : vector<2x32xf32>
      %120 = arith.mulf %119, %117 : vector<2x32xf32>
      %121 = arith.mulf %112, %86 : vector<2x32xf32>
      %122 = arith.addf %120, %121 : vector<2x32xf32>
      %c0_66 = arith.constant 0 : index
      %c12_67 = arith.constant 12 : index
      %c0_68 = arith.constant 0 : index
      %123 = vector.load %arg6[%c0_66, %c12_67, %c0_68] : memref<2x16x32xf32, #tpu.memory_space<vmem>>, vector<2x1x32xf32>
      %124 = vector.shape_cast %123 : vector<2x1x32xf32> to vector<2x32xf32>
      %125 = arith.addf %122, %124 : vector<2x32xf32>
      %c0_69 = arith.constant 0 : index
      %c12_70 = arith.constant 12 : index
      %c0_71 = arith.constant 0 : index
      %126 = vector.load %arg7[%c0_69, %c12_70, %c0_71] : memref<2x16x32xf32, #tpu.memory_space<vmem>>, vector<2x1x32xf32>
      %127 = vector.shape_cast %126 : vector<2x1x32xf32> to vector<2x32xf32>
      %128 = vector.shape_cast %125 : vector<2x32xf32> to vector<2x1x32xf32>
      tpu.vector_store %arg7[%c0_69, %c12_70, %c0_71], %128 {strides = array<i32>} : memref<2x16x32xf32, #tpu.memory_space<vmem>>, vector<2x1x32xf32>,
      %c0_72 = arith.constant 0 : index
      %c0_73 = arith.constant 0 : index
      %129 = vector.load %arg8[%c0_72, %c0_73] : memref<2x32xf32, #tpu.memory_space<vmem>>, vector<2x32xf32>
      tpu.vector_store %arg8[%c0_72, %c0_73], %122 {strides = array<i32>} : memref<2x32xf32, #tpu.memory_space<vmem>>, vector<2x32xf32>,
    } else {
    }
    %c16_i32_45 = arith.constant 16 : i32
    %71 = arith.muli %arg1, %c16_i32_45 : i32
    %c13_i32 = arith.constant 13 : i32
    %72 = arith.addi %71, %c13_i32 : i32
    %c12_i32_46 = arith.constant 12 : i32
    %73 = arith.cmpi slt, %72, %c12_i32_46 : i32
    %74 = arith.extui %73 : i1 to i32
    %c0_i32_47 = arith.constant 0 : i32
    %75 = arith.cmpi ne, %74, %c0_i32_47 : i32
    scf.if %75 {
      %c0_54 = arith.constant 0 : index
      %c0_55 = arith.constant 0 : index
      %86 = vector.load %arg8[%c0_54, %c0_55] : memref<2x32xf32, #tpu.memory_space<vmem>>, vector<2x32xf32>
      %87 = arith.truncf %86 : vector<2x32xf32> to vector<2x32xbf16>
      %cst = arith.constant dense<0.000000e+00> : vector<2x64xf32>
      %88 = tpu.matmul %87, %3, %cst {dimension_numbers = #tpu.dot_dimension_numbers<[1], [0], [0], [1], [0, 0, 1, 1], [], []>} : vector<2x32xbf16>, vector<32x64xbf16>, vector<2x64xf32> -> vector<2x64xf32>
      %cst_56 = arith.constant dense<0.000000e+00> : vector<2x32xf32>
      %89 = tpu.matmul %87, %4, %cst_56 {dimension_numbers = #tpu.dot_dimension_numbers<[1], [0], [0], [1], [0, 0, 1, 1], [], []>} : vector<2x32xbf16>, vector<32x32xbf16>, vector<2x32xf32> -> vector<2x32xf32>
      %c0_57 = arith.constant 0 : index
      %c13 = arith.constant 13 : index
      %c0_58 = arith.constant 0 : index
      %90 = vector.load %arg2[%c0_57, %c13, %c0_58] : memref<2x16x96xbf16, #tpu.memory_space<vmem>>, vector<2x1x32xbf16>
      %91 = vector.shape_cast %90 : vector<2x1x32xbf16> to vector<2x32xbf16>
      %92 = arith.extf %91 : vector<2x32xbf16> to vector<2x32xf32>
      %c0_59 = arith.constant 0 : index
      %c13_60 = arith.constant 13 : index
      %c32 = arith.constant 32 : index
      %93 = vector.load %arg2[%c0_59, %c13_60, %c32] : memref<2x16x96xbf16, #tpu.memory_space<vmem>>, vector<2x1x32xbf16>
      %94 = vector.shape_cast %93 : vector<2x1x32xbf16> to vector<2x32xbf16>
      %95 = arith.extf %94 : vector<2x32xbf16> to vector<2x32xf32>
      %c0_61 = arith.constant 0 : index
      %c13_62 = arith.constant 13 : index
      %c64 = arith.constant 64 : index
      %96 = vector.load %arg2[%c0_61, %c13_62, %c64] : memref<2x16x96xbf16, #tpu.memory_space<vmem>>, vector<2x1x32xbf16>
      %97 = vector.shape_cast %96 : vector<2x1x32xbf16> to vector<2x32xbf16>
      %98 = arith.extf %97 : vector<2x32xbf16> to vector<2x32xf32>
      %99 = vector.extract_strided_slice %88 {offsets = [0, 0], sizes = [2, 32], strides = [1, 1]} : vector<2x64xf32> to vector<2x32xf32>
      %100 = arith.addf %92, %99 : vector<2x32xf32>
      %101 = arith.negf %100 : vector<2x32xf32>
      %102 = math.exp %101 : vector<2x32xf32>
      %cst_63 = arith.constant 1.000000e+00 : f32
      %103 = vector.broadcast %cst_63 : f32 to vector<2x32xf32>
      %104 = arith.addf %103, %102 : vector<2x32xf32>
      %105 = arith.divf %103, %104 : vector<2x32xf32>
      %106 = vector.extract_strided_slice %88 {offsets = [0, 32], sizes = [2, 32], strides = [1, 1]} : vector<2x64xf32> to vector<2x32xf32>
      %107 = arith.addf %95, %106 : vector<2x32xf32>
      %108 = arith.negf %107 : vector<2x32xf32>
      %109 = math.exp %108 : vector<2x32xf32>
      %cst_64 = arith.constant 1.000000e+00 : f32
      %110 = vector.broadcast %cst_64 : f32 to vector<2x32xf32>
      %111 = arith.addf %110, %109 : vector<2x32xf32>
      %112 = arith.divf %110, %111 : vector<2x32xf32>
      %113 = vector.broadcast %5 : vector<1x32xf32> to vector<2x32xf32>
      %114 = arith.addf %89, %113 : vector<2x32xf32>
      %115 = arith.mulf %105, %114 : vector<2x32xf32>
      %116 = arith.addf %98, %115 : vector<2x32xf32>
      %117 = math.tanh %116 : vector<2x32xf32>
      %cst_65 = arith.constant 1.000000e+00 : f32
      %118 = vector.broadcast %cst_65 : f32 to vector<2x32xf32>
      %119 = arith.subf %118, %112 : vector<2x32xf32>
      %120 = arith.mulf %119, %117 : vector<2x32xf32>
      %121 = arith.mulf %112, %86 : vector<2x32xf32>
      %122 = arith.addf %120, %121 : vector<2x32xf32>
      %c0_66 = arith.constant 0 : index
      %c13_67 = arith.constant 13 : index
      %c0_68 = arith.constant 0 : index
      %123 = vector.load %arg6[%c0_66, %c13_67, %c0_68] : memref<2x16x32xf32, #tpu.memory_space<vmem>>, vector<2x1x32xf32>
      %124 = vector.shape_cast %123 : vector<2x1x32xf32> to vector<2x32xf32>
      %125 = arith.addf %122, %124 : vector<2x32xf32>
      %c0_69 = arith.constant 0 : index
      %c13_70 = arith.constant 13 : index
      %c0_71 = arith.constant 0 : index
      %126 = vector.load %arg7[%c0_69, %c13_70, %c0_71] : memref<2x16x32xf32, #tpu.memory_space<vmem>>, vector<2x1x32xf32>
      %127 = vector.shape_cast %126 : vector<2x1x32xf32> to vector<2x32xf32>
      %128 = vector.shape_cast %125 : vector<2x32xf32> to vector<2x1x32xf32>
      tpu.vector_store %arg7[%c0_69, %c13_70, %c0_71], %128 {strides = array<i32>} : memref<2x16x32xf32, #tpu.memory_space<vmem>>, vector<2x1x32xf32>,
      %c0_72 = arith.constant 0 : index
      %c0_73 = arith.constant 0 : index
      %129 = vector.load %arg8[%c0_72, %c0_73] : memref<2x32xf32, #tpu.memory_space<vmem>>, vector<2x32xf32>
      tpu.vector_store %arg8[%c0_72, %c0_73], %122 {strides = array<i32>} : memref<2x32xf32, #tpu.memory_space<vmem>>, vector<2x32xf32>,
    } else {
    }
    %c16_i32_48 = arith.constant 16 : i32
    %76 = arith.muli %arg1, %c16_i32_48 : i32
    %c14_i32 = arith.constant 14 : i32
    %77 = arith.addi %76, %c14_i32 : i32
    %c12_i32_49 = arith.constant 12 : i32
    %78 = arith.cmpi slt, %77, %c12_i32_49 : i32
    %79 = arith.extui %78 : i1 to i32
    %c0_i32_50 = arith.constant 0 : i32
    %80 = arith.cmpi ne, %79, %c0_i32_50 : i32
    scf.if %80 {
      %c0_54 = arith.constant 0 : index
      %c0_55 = arith.constant 0 : index
      %86 = vector.load %arg8[%c0_54, %c0_55] : memref<2x32xf32, #tpu.memory_space<vmem>>, vector<2x32xf32>
      %87 = arith.truncf %86 : vector<2x32xf32> to vector<2x32xbf16>
      %cst = arith.constant dense<0.000000e+00> : vector<2x64xf32>
      %88 = tpu.matmul %87, %3, %cst {dimension_numbers = #tpu.dot_dimension_numbers<[1], [0], [0], [1], [0, 0, 1, 1], [], []>} : vector<2x32xbf16>, vector<32x64xbf16>, vector<2x64xf32> -> vector<2x64xf32>
      %cst_56 = arith.constant dense<0.000000e+00> : vector<2x32xf32>
      %89 = tpu.matmul %87, %4, %cst_56 {dimension_numbers = #tpu.dot_dimension_numbers<[1], [0], [0], [1], [0, 0, 1, 1], [], []>} : vector<2x32xbf16>, vector<32x32xbf16>, vector<2x32xf32> -> vector<2x32xf32>
      %c0_57 = arith.constant 0 : index
      %c14 = arith.constant 14 : index
      %c0_58 = arith.constant 0 : index
      %90 = vector.load %arg2[%c0_57, %c14, %c0_58] : memref<2x16x96xbf16, #tpu.memory_space<vmem>>, vector<2x1x32xbf16>
      %91 = vector.shape_cast %90 : vector<2x1x32xbf16> to vector<2x32xbf16>
      %92 = arith.extf %91 : vector<2x32xbf16> to vector<2x32xf32>
      %c0_59 = arith.constant 0 : index
      %c14_60 = arith.constant 14 : index
      %c32 = arith.constant 32 : index
      %93 = vector.load %arg2[%c0_59, %c14_60, %c32] : memref<2x16x96xbf16, #tpu.memory_space<vmem>>, vector<2x1x32xbf16>
      %94 = vector.shape_cast %93 : vector<2x1x32xbf16> to vector<2x32xbf16>
      %95 = arith.extf %94 : vector<2x32xbf16> to vector<2x32xf32>
      %c0_61 = arith.constant 0 : index
      %c14_62 = arith.constant 14 : index
      %c64 = arith.constant 64 : index
      %96 = vector.load %arg2[%c0_61, %c14_62, %c64] : memref<2x16x96xbf16, #tpu.memory_space<vmem>>, vector<2x1x32xbf16>
      %97 = vector.shape_cast %96 : vector<2x1x32xbf16> to vector<2x32xbf16>
      %98 = arith.extf %97 : vector<2x32xbf16> to vector<2x32xf32>
      %99 = vector.extract_strided_slice %88 {offsets = [0, 0], sizes = [2, 32], strides = [1, 1]} : vector<2x64xf32> to vector<2x32xf32>
      %100 = arith.addf %92, %99 : vector<2x32xf32>
      %101 = arith.negf %100 : vector<2x32xf32>
      %102 = math.exp %101 : vector<2x32xf32>
      %cst_63 = arith.constant 1.000000e+00 : f32
      %103 = vector.broadcast %cst_63 : f32 to vector<2x32xf32>
      %104 = arith.addf %103, %102 : vector<2x32xf32>
      %105 = arith.divf %103, %104 : vector<2x32xf32>
      %106 = vector.extract_strided_slice %88 {offsets = [0, 32], sizes = [2, 32], strides = [1, 1]} : vector<2x64xf32> to vector<2x32xf32>
      %107 = arith.addf %95, %106 : vector<2x32xf32>
      %108 = arith.negf %107 : vector<2x32xf32>
      %109 = math.exp %108 : vector<2x32xf32>
      %cst_64 = arith.constant 1.000000e+00 : f32
      %110 = vector.broadcast %cst_64 : f32 to vector<2x32xf32>
      %111 = arith.addf %110, %109 : vector<2x32xf32>
      %112 = arith.divf %110, %111 : vector<2x32xf32>
      %113 = vector.broadcast %5 : vector<1x32xf32> to vector<2x32xf32>
      %114 = arith.addf %89, %113 : vector<2x32xf32>
      %115 = arith.mulf %105, %114 : vector<2x32xf32>
      %116 = arith.addf %98, %115 : vector<2x32xf32>
      %117 = math.tanh %116 : vector<2x32xf32>
      %cst_65 = arith.constant 1.000000e+00 : f32
      %118 = vector.broadcast %cst_65 : f32 to vector<2x32xf32>
      %119 = arith.subf %118, %112 : vector<2x32xf32>
      %120 = arith.mulf %119, %117 : vector<2x32xf32>
      %121 = arith.mulf %112, %86 : vector<2x32xf32>
      %122 = arith.addf %120, %121 : vector<2x32xf32>
      %c0_66 = arith.constant 0 : index
      %c14_67 = arith.constant 14 : index
      %c0_68 = arith.constant 0 : index
      %123 = vector.load %arg6[%c0_66, %c14_67, %c0_68] : memref<2x16x32xf32, #tpu.memory_space<vmem>>, vector<2x1x32xf32>
      %124 = vector.shape_cast %123 : vector<2x1x32xf32> to vector<2x32xf32>
      %125 = arith.addf %122, %124 : vector<2x32xf32>
      %c0_69 = arith.constant 0 : index
      %c14_70 = arith.constant 14 : index
      %c0_71 = arith.constant 0 : index
      %126 = vector.load %arg7[%c0_69, %c14_70, %c0_71] : memref<2x16x32xf32, #tpu.memory_space<vmem>>, vector<2x1x32xf32>
      %127 = vector.shape_cast %126 : vector<2x1x32xf32> to vector<2x32xf32>
      %128 = vector.shape_cast %125 : vector<2x32xf32> to vector<2x1x32xf32>
      tpu.vector_store %arg7[%c0_69, %c14_70, %c0_71], %128 {strides = array<i32>} : memref<2x16x32xf32, #tpu.memory_space<vmem>>, vector<2x1x32xf32>,
      %c0_72 = arith.constant 0 : index
      %c0_73 = arith.constant 0 : index
      %129 = vector.load %arg8[%c0_72, %c0_73] : memref<2x32xf32, #tpu.memory_space<vmem>>, vector<2x32xf32>
      tpu.vector_store %arg8[%c0_72, %c0_73], %122 {strides = array<i32>} : memref<2x32xf32, #tpu.memory_space<vmem>>, vector<2x32xf32>,
    } else {
    }
    %c16_i32_51 = arith.constant 16 : i32
    %81 = arith.muli %arg1, %c16_i32_51 : i32
    %c15_i32 = arith.constant 15 : i32
    %82 = arith.addi %81, %c15_i32 : i32
    %c12_i32_52 = arith.constant 12 : i32
    %83 = arith.cmpi slt, %82, %c12_i32_52 : i32
    %84 = arith.extui %83 : i1 to i32
    %c0_i32_53 = arith.constant 0 : i32
    %85 = arith.cmpi ne, %84, %c0_i32_53 : i32
    scf.if %85 {
      %c0_54 = arith.constant 0 : index
      %c0_55 = arith.constant 0 : index
      %86 = vector.load %arg8[%c0_54, %c0_55] : memref<2x32xf32, #tpu.memory_space<vmem>>, vector<2x32xf32>
      %87 = arith.truncf %86 : vector<2x32xf32> to vector<2x32xbf16>
      %cst = arith.constant dense<0.000000e+00> : vector<2x64xf32>
      %88 = tpu.matmul %87, %3, %cst {dimension_numbers = #tpu.dot_dimension_numbers<[1], [0], [0], [1], [0, 0, 1, 1], [], []>} : vector<2x32xbf16>, vector<32x64xbf16>, vector<2x64xf32> -> vector<2x64xf32>
      %cst_56 = arith.constant dense<0.000000e+00> : vector<2x32xf32>
      %89 = tpu.matmul %87, %4, %cst_56 {dimension_numbers = #tpu.dot_dimension_numbers<[1], [0], [0], [1], [0, 0, 1, 1], [], []>} : vector<2x32xbf16>, vector<32x32xbf16>, vector<2x32xf32> -> vector<2x32xf32>
      %c0_57 = arith.constant 0 : index
      %c15 = arith.constant 15 : index
      %c0_58 = arith.constant 0 : index
      %90 = vector.load %arg2[%c0_57, %c15, %c0_58] : memref<2x16x96xbf16, #tpu.memory_space<vmem>>, vector<2x1x32xbf16>
      %91 = vector.shape_cast %90 : vector<2x1x32xbf16> to vector<2x32xbf16>
      %92 = arith.extf %91 : vector<2x32xbf16> to vector<2x32xf32>
      %c0_59 = arith.constant 0 : index
      %c15_60 = arith.constant 15 : index
      %c32 = arith.constant 32 : index
      %93 = vector.load %arg2[%c0_59, %c15_60, %c32] : memref<2x16x96xbf16, #tpu.memory_space<vmem>>, vector<2x1x32xbf16>
      %94 = vector.shape_cast %93 : vector<2x1x32xbf16> to vector<2x32xbf16>
      %95 = arith.extf %94 : vector<2x32xbf16> to vector<2x32xf32>
      %c0_61 = arith.constant 0 : index
      %c15_62 = arith.constant 15 : index
      %c64 = arith.constant 64 : index
      %96 = vector.load %arg2[%c0_61, %c15_62, %c64] : memref<2x16x96xbf16, #tpu.memory_space<vmem>>, vector<2x1x32xbf16>
      %97 = vector.shape_cast %96 : vector<2x1x32xbf16> to vector<2x32xbf16>
      %98 = arith.extf %97 : vector<2x32xbf16> to vector<2x32xf32>
      %99 = vector.extract_strided_slice %88 {offsets = [0, 0], sizes = [2, 32], strides = [1, 1]} : vector<2x64xf32> to vector<2x32xf32>
      %100 = arith.addf %92, %99 : vector<2x32xf32>
      %101 = arith.negf %100 : vector<2x32xf32>
      %102 = math.exp %101 : vector<2x32xf32>
      %cst_63 = arith.constant 1.000000e+00 : f32
      %103 = vector.broadcast %cst_63 : f32 to vector<2x32xf32>
      %104 = arith.addf %103, %102 : vector<2x32xf32>
      %105 = arith.divf %103, %104 : vector<2x32xf32>
      %106 = vector.extract_strided_slice %88 {offsets = [0, 32], sizes = [2, 32], strides = [1, 1]} : vector<2x64xf32> to vector<2x32xf32>
      %107 = arith.addf %95, %106 : vector<2x32xf32>
      %108 = arith.negf %107 : vector<2x32xf32>
      %109 = math.exp %108 : vector<2x32xf32>
      %cst_64 = arith.constant 1.000000e+00 : f32
      %110 = vector.broadcast %cst_64 : f32 to vector<2x32xf32>
      %111 = arith.addf %110, %109 : vector<2x32xf32>
      %112 = arith.divf %110, %111 : vector<2x32xf32>
      %113 = vector.broadcast %5 : vector<1x32xf32> to vector<2x32xf32>
      %114 = arith.addf %89, %113 : vector<2x32xf32>
      %115 = arith.mulf %105, %114 : vector<2x32xf32>
      %116 = arith.addf %98, %115 : vector<2x32xf32>
      %117 = math.tanh %116 : vector<2x32xf32>
      %cst_65 = arith.constant 1.000000e+00 : f32
      %118 = vector.broadcast %cst_65 : f32 to vector<2x32xf32>
      %119 = arith.subf %118, %112 : vector<2x32xf32>
      %120 = arith.mulf %119, %117 : vector<2x32xf32>
      %121 = arith.mulf %112, %86 : vector<2x32xf32>
      %122 = arith.addf %120, %121 : vector<2x32xf32>
      %c0_66 = arith.constant 0 : index
      %c15_67 = arith.constant 15 : index
      %c0_68 = arith.constant 0 : index
      %123 = vector.load %arg6[%c0_66, %c15_67, %c0_68] : memref<2x16x32xf32, #tpu.memory_space<vmem>>, vector<2x1x32xf32>
      %124 = vector.shape_cast %123 : vector<2x1x32xf32> to vector<2x32xf32>
      %125 = arith.addf %122, %124 : vector<2x32xf32>
      %c0_69 = arith.constant 0 : index
      %c15_70 = arith.constant 15 : index
      %c0_71 = arith.constant 0 : index
      %126 = vector.load %arg7[%c0_69, %c15_70, %c0_71] : memref<2x16x32xf32, #tpu.memory_space<vmem>>, vector<2x1x32xf32>
      %127 = vector.shape_cast %126 : vector<2x1x32xf32> to vector<2x32xf32>
      %128 = vector.shape_cast %125 : vector<2x32xf32> to vector<2x1x32xf32>
      tpu.vector_store %arg7[%c0_69, %c15_70, %c0_71], %128 {strides = array<i32>} : memref<2x16x32xf32, #tpu.memory_space<vmem>>, vector<2x1x32xf32>,
      %c0_72 = arith.constant 0 : index
      %c0_73 = arith.constant 0 : index
      %129 = vector.load %arg8[%c0_72, %c0_73] : memref<2x32xf32, #tpu.memory_space<vmem>>, vector<2x32xf32>
      tpu.vector_store %arg8[%c0_72, %c0_73], %122 {strides = array<i32>} : memref<2x32xf32, #tpu.memory_space<vmem>>, vector<2x32xf32>,
    } else {
    }
    return
  }
  func.func @transform_0(%arg0: i32, %arg1: i32) -> (i32, i32, i32) {
    %c0_i32 = arith.constant 0 : i32
    %c0_i32_0 = arith.constant 0 : i32
    return %arg0, %arg1, %c0_i32 : i32, i32, i32
  }
  func.func @transform_1(%arg0: i32, %arg1: i32) -> (i32, i32) {
    %c0_i32 = arith.constant 0 : i32
    %c0_i32_0 = arith.constant 0 : i32
    %c0_i32_1 = arith.constant 0 : i32
    return %c0_i32, %c0_i32_0 : i32, i32
  }
  func.func @transform_2(%arg0: i32, %arg1: i32) -> (i32, i32) {
    %c0_i32 = arith.constant 0 : i32
    %c0_i32_0 = arith.constant 0 : i32
    %c0_i32_1 = arith.constant 0 : i32
    return %c0_i32, %c0_i32_0 : i32, i32
  }
  func.func @transform_3(%arg0: i32, %arg1: i32) -> (i32, i32) {
    %c0_i32 = arith.constant 0 : i32
    %c0_i32_0 = arith.constant 0 : i32
    %c0_i32_1 = arith.constant 0 : i32
    return %c0_i32, %c0_i32_0 : i32, i32
  }
  func.func @transform_4(%arg0: i32, %arg1: i32) -> (i32, i32, i32) {
    %c0_i32 = arith.constant 0 : i32
    %c0_i32_0 = arith.constant 0 : i32
    return %arg0, %arg1, %c0_i32 : i32, i32, i32
  }
  func.func @transform_5(%arg0: i32, %arg1: i32) -> (i32, i32, i32) {
    %c0_i32 = arith.constant 0 : i32
    %c0_i32_0 = arith.constant 0 : i32
    return %arg0, %arg1, %c0_i32 : i32, i32, i32
  }
}

</mosaic_0001>

<bundles_post_ra>
// kernel: temporal_encoder_pallas.1
= control target key start
LH: loop header
LB: loop body
LE: loop exit
PB: predicated region body
PF: predicated region fallthrough
CT: control target
= control target key end

     0   :  { %s4133_s18 = smov 0   ;;  %s4135_s19 = smov 0   ;;  %s4849_s0 = inlined_call_operand.vmem [shape: bf16[4,16,96], index: 0, kind: input, shape index: {}]   ;;  %s4850_s1 = inlined_call_operand.vmem [shape: bf16[32,64], index: 1, kind: input, shape index: {}]   ;;  %s4851_s2 = inlined_call_operand.vmem [shape: bf16[32,32], index: 2, kind: input, shape index: {}]   ;;  %s4852_s3 = inlined_call_operand.vmem [shape: f32[1,32], index: 3, kind: input, shape index: {}]   ;;  %s4853_s4 = inlined_call_operand.vmem [shape: f32[4,16,32], index: 4, kind: input, shape index: {}]   ;;  %s4854_s5 = inlined_call_operand.vmem [shape: f32[4,16,32], index: 5, kind: output, shape index: {}]  }
   0x1   :  { %s4137_s20 = smov 0  }
   0x2 LB: > { %s27_s21 = sadd.s32 1, %s4093_s19  ;;  %p3501_p0 = scmp.ge.s32.totalorder %s4097_s20, 1  ;;  %s4097_s20 = sphi %s4137_s20, %s15_s20   ;;  %s4093_s19 = sphi %s4135_s19, %s4863_s19   ;;  %s4089_s18 = sphi %s4133_s18, %s4862_s18  }
   0x3   : > { %p29_p1 = scmp.ge.s32.totalorder %s27_s21, 2  ;;  %p229_p2 = scmp.lt.s32.totalorder %s4097_s20, 3 }
   0x5   : > { %s4865_s21 = smov (%p29_p1, %s27_s21), 0  ;;  %p230_p3 = pnand %p3501_p0, %p229_p2 }
   0x6   : > { %s3502_s30 = sshll.u32 (!%p230_p3), %s4089_s18, 1  ;;  %s4100_s12 = smov (!%p230_p3), 64  }
   0x7   : > { %233 = sbr.rel (%p230_p3) target bundleno = 6377 (0x18e9), region = 40  ;;  %p279_p4 = scmp.lt.s32.totalorder (!%p230_p3), %s3502_s30, 3 }
   0x8   : > { %s4101_s13 = smov (!%p230_p3), 96   ;;  %s4102_s14 = smov (!%p230_p3), 32  }
   0xc   : > { %v3867_v0 = vld [vmem:[%s4850_s1 + $0x8] sm:$0xff]  ;;  %vm318_vm0 = vcmask 254976   ;;  %v4099_v2 = vmov 0.0   ;;  %v3851_v3 = vld [vmem:[%s4850_s1] sm:$0xff]  ;;  %vm348_vm1 = vcmask 261120   ;;  %s4867_s30 = smov (!%p279_p4, %s3502_s30), 3 }
   0xd   : > { %v3899_v1 = vld [vmem:[%s4851_s2 + $0x8] sm:$0xff]  ;;  %319 = vst.msk [vmem:[#allocation2] sm:$0x3] %vm318_vm0, %v4099_v2  ;;  %358 = vmatpush.bf16.msra.mxu0 %v3867_v0  ;;  %v3883_v4 = vld [vmem:[%s4851_s2] sm:$0xff]  ;;  %s3833_s6 = sshll.u32 %s4867_s30, 3  ;;  %vm509_vm10 = vcmask 1041409  }
   0xe   : > { %434 = vmatpush.bf16.msra.mxu1 %v3899_v1  ;;  %s4176_s9 = scalar_lea.vmem %s4849_s0, %s3833_s6  ;;  %v4186_v26 = vld [vmem:[%s4852_s3] ss:$0 sm:$0xff]  ;;  %s3834_s8 = sshll.u32 %s4867_s30, 4 }
   0xf   : > { %v4179_v7 = vld [vmem:[%s4176_s9] sm:$0x1]  ;;  %v366_v8 = vld [vmem:[%s4176_s9 + $0x8] sm:$0x1]  ;;  %s4619_s15 = scalar_lea.vmem %s4853_s4, %s3834_s8  ;;  %s4674_s29 = scalar_lea.vmem %s4854_s5, %s3834_s8 }
  0x10   : > { %v367_v9 = vunpack.c.l.bf16 %v4179_v7  ;;  %v368_v10 = vunpack.c.l.bf16 %v366_v8  ;;  %v3898_v7 = vld [vmem:[%s4851_s2 + $0x8] sm:$0xff]  ;;  %v3850_v8 = vld [vmem:[%s4850_s1] sm:$0xff] }
  0x11   : > { %359 = vmatpush.bf16.msra.mxu0 %v3851_v3  ;;  %621 = vmatpush.bf16.msra.mxu3 %v3898_v7 }
  0x12   : > { %435 = vmatpush.bf16.msra.mxu1 %v3883_v4 }
  0x14   : > { %v4164_v5 = vld [vmem:[#allocation2] sm:$0x3] }
  0x15   : > { %v335_v6 = vpack.c.bf16 %v4164_v5, %v4164_v5  ;;  %v472_v54 = vrot.slane %v4164_v5, 1 }
  0x17   : > { %3519 = vmatmul.msk.bf16.vlgmr.msra.gmra.mxu0 %vm348_vm1, %v335_v6  ;;  %3530 = vmatmul.msk.bf16.vlgmr.msra.gmra.mxu1 %vm348_vm1, %v335_v6  ;;  %v3866_v6 = vld [vmem:[%s4850_s1 + $0x8] sm:$0xff] }
  0x18   : > { %545 = vmatpush.bf16.msra.mxu2 %v3866_v6 }
  0x1c   : > { %546 = vmatpush.bf16.msra.mxu2 %v3850_v8 }
  0x94   : > { %v361_v11 = vpop.f32.mrf.mxu0  ;;  %v437_v12 = vpop.f32.mrf.mxu1 }
  0x95   : > { %v370_v13 = vrot.slane %v361_v11, 1  ;;  %v373_v14 = vadd.f32 %v367_v9, %v361_v11  ;;  %v438_v30 = vadd.f32 %v4186_v26, %v437_v12 }
  0x97   : > { %v374_v15 = vadd.f32 %v370_v13, %v368_v10  ;;  %v3520_v16 = vmul.f32 -1.442695, %v373_v14  ;;  %v442_v36 = vrot.slane %v438_v30, 1  ;;  %v4225_v13 = vld [vmem:[%s4176_s9 + $0x8] sm:$0x1] }
  0x98   : > { %v552_v14 = vld [vmem:[%s4176_s9] sm:$0x1] }
  0x99   : > { %3929 = vpow2.f32 %v3520_v16  ;;  %v3521_v17 = vmul.f32 -1.442695, %v374_v15  ;;  %v555_v15 = vunpack.c.l.bf16 %v4225_v13  ;;  %v554_v16 = vunpack.c.l.bf16 %v552_v14 }
  0x9b   : > { %3931 = vpow2.f32 %v3521_v17 }
  0x9c   : > { %v363_v18 = vpop.f32.mrf.mxu0  ;;  %v439_v19 = vpop.f32.mrf.mxu1 }
  0x9f   : > { %v3930_v20 = vpop.eup %3929 }
  0xa0   : > { %v381_v21 = vadd.f32 1.0, %v3930_v20 }
  0xa1   : > { %v3932_v22 = vpop.eup %3931 }
  0xa2   : > { %v382_v23 = vadd.f32 1.0, %v3932_v22  ;;  %3933 = vrcp.f32 %v381_v21  ;;  %v394_v41 = vand.u32 2147483648, %v381_v21  ;;  %vm388_vm7 = vweird.f32 %v381_v21 }
  0xa3   : > { %v392_v43 = vand.u32 2147483647, %v381_v21 }
  0xa4   : > { %3935 = vrcp.f32 %v382_v23  ;;  %v409_v32 = vand.u32 2147483648, %v382_v23  ;;  %v407_v35 = vand.u32 2147483647, %v382_v23  ;;  %vm403_vm3 = vweird.f32 %v382_v23 }
  0xa5   : > { %v395_v46 = vor.u32 1.1754944e-38, %v394_v41  ;;  %vm393_vm9 = vcmp.eq.f32.partialorder %v392_v43, 8.507059e+37 }
  0xa6   : > { %v410_v38 = vor.u32 1.1754944e-38, %v409_v32  ;;  %vm408_vm6 = vcmp.eq.f32.partialorder %v407_v35, 8.507059e+37 }
  0xa8   : > { %v3934_v24 = vpop.eup %3933 }
  0xa9   : > { %v384_v25 = vmul.f32 %v3934_v24, %v381_v21  ;;  %vm389_vm5 = vweird.f32 %v3934_v24 }
  0xaa   : > { %v3936_v27 = vpop.eup %3935  ;;  %vm390_vm8 = vmor %vm388_vm7, %vm389_vm5  ;;  %vm698_vm5 = vcmask 1042434  }
  0xab   : > { %v385_v28 = vsub.f32 1.0, %v384_v25  ;;  %v399_v29 = vmul.f32 %v3936_v27, %v382_v23  ;;  %vm404_vm2 = vweird.f32 %v3936_v27 }
  0xac   : > { %vm405_vm4 = vmor %vm403_vm3, %vm404_vm2 }
  0xad   : > { %v400_v31 = vsub.f32 1.0, %v399_v29  ;;  %v386_v33 = vmul.f32 %v3934_v24, %v385_v28 }
  0xaf   : > { %v401_v34 = vmul.f32 %v3936_v27, %v400_v31  ;;  %v387_v39 = vadd.f32 %v3934_v24, %v386_v33 }
  0xb1   : > { %v402_v37 = vadd.f32 %v3936_v27, %v401_v34  ;;  %v391_v45 = vsel %vm390_vm8, %v3934_v24, %v387_v39 }
  0xb2   : > { %v396_v47 = vsel %vm393_vm9, %v395_v46, %v391_v45 }
  0xb3   : > { %v406_v40 = vsel %vm405_vm4, %v3936_v27, %v402_v37  ;;  %v445_v48 = vmul.f32 %v438_v30, %v396_v47  ;;  %v459_v61 = vsub.f32 1.0, %v396_v47 }
  0xb4   : > { %v411_v42 = vsel %vm408_vm6, %v410_v38, %v406_v40  ;;  %vm703_vm6 = vcmask 256001  }
  0xb5   : > { %v446_v44 = vmul.f32 %v442_v36, %v411_v42  ;;  %v460_v59 = vsub.f32 1.0, %v411_v42 }
  0xb7   : > { %451 = vrot.lane.b32.xlu0 %v446_v44, %s4100_s12 }
  0xbf   : > { %449 = vrot.lane.b32.xlu0 %v445_v48, %s4100_s12 }
 0x129   : > { %v452_v49 = vpop.permute.xlu0 %451 }
 0x12a   : > { %v456_v50 = vadd.f32 %v452_v49, %v368_v10 }
 0x12c   : > { %3937 = vtanh.f32 %v456_v50 }
 0x131   : > { %v450_v51 = vpop.permute.xlu0 %449 }
 0x132   : > { %v3938_v52 = vpop.eup %3937  ;;  %v455_v53 = vadd.f32 %v450_v51, %v367_v9  ;;  %v3882_v9 = vld [vmem:[%s4851_s2] sm:$0xff] }
 0x133   : > { %465 = vrot.lane.b32.xlu1 %v3938_v52, %s4101_s13  ;;  %622 = vmatpush.bf16.msra.mxu3 %v3882_v9 }
 0x134   : > { %3939 = vtanh.f32 %v455_v53 }
 0x13a   : > { %v3940_v55 = vpop.eup %3939 }
 0x13b   : > { %475 = vrot.lane.b32.xlu1 %v472_v54, %s4102_s14  ;;  %463 = vrot.lane.b32.xlu2 %v3940_v55, %s4101_s13 }
 0x143   : > { %473 = vrot.lane.b32.xlu2 %v4164_v5, %s4102_s14 }
 0x195   : > { %v464_v56 = vpop.permute.xlu2 %463 }
 0x196   : > { %v469_v1 = vmul.f32 %v464_v56, %v459_v61 }
 0x19d   : > { %v474_v58 = vpop.permute.xlu2 %473 }
 0x19e   : > { %v479_v62 = vmul.f32 %v474_v58, %v396_v47 }
 0x1a0   : > { %v4199_v3 = vadd.f32 %v479_v62, %v469_v1  ;;  %v3865_v62 = vld [vmem:[%s4850_s1 + $0x8] sm:$0xff] }
 0x1a1   : > { %734 = vmatpush.bf16.msrb.mxu0 %v3865_v62 }
 0x1a5   : > { %v466_v57 = vpop.permute.xlu1 %465 }
 0x1a6   : > { %v470_v63 = vmul.f32 %v466_v57, %v460_v59 }
 0x1ad   : > { %v476_v60 = vpop.permute.xlu1 %475 }
 0x1ae   : > { %v480_v0 = vmul.f32 %v476_v60, %v411_v42 }
 0x1b0   : > { %v4197_v2 = vadd.f32 %v480_v0, %v470_v63 }
 0x1b2   : > { %v508_v4 = vrot.slane %v4197_v2, 7 }
 0x1b4   : > { %v510_v5 = vsel %vm509_vm10, %v508_v4, %v4199_v3 }
 0x1b5   : > { %511 = vrot.lane.b32.xlu0 %v510_v5, %s4101_s13 }
 0x227   : > { %v512_v10 = vpop.permute.xlu0 %511 }
 0x228   : > { %515 = vst.msk [vmem:[#allocation2] sm:$0x3] %vm318_vm0, %v512_v10 }
 0x22f   : > { %v4218_v11 = vld [vmem:[#allocation2] sm:$0x3] }
 0x230   : > { %v522_v12 = vpack.c.bf16 %v4218_v11, %v4218_v11  ;;  %v659_v61 = vrot.slane %v4218_v11, 7 }
 0x232   : > { %3539 = vmatmul.msk.bf16.vlgmr.msra.gmra.mxu2 %vm348_vm1, %v522_v12  ;;  %3550 = vmatmul.msk.bf16.vlgmr.msra.gmra.mxu3 %vm348_vm1, %v522_v12 }
 0x2b5   : > { %v548_v17 = vpop.f32.mrf.mxu2  ;;  %v624_v18 = vpop.f32.mrf.mxu3 }
 0x2b6   : > { %v557_v19 = vrot.slane %v548_v17, 7  ;;  %v561_v20 = vadd.f32 %v555_v15, %v548_v17  ;;  %v625_v40 = vadd.f32 %v4186_v26, %v624_v18  ;;  %v3881_v17 = vld [vmem:[%s4851_s2] sm:$0xff] }
 0x2b8   : > { %v560_v21 = vadd.f32 %v557_v19, %v554_v16  ;;  %v3541_v22 = vmul.f32 -1.442695, %v561_v20  ;;  %v629_v50 = vrot.slane %v625_v40, 7 }
 0x2ba   : > { %v3540_v23 = vmul.f32 -1.442695, %v560_v21  ;;  %3941 = vpow2.f32 %v3541_v22  ;;  %v4266_v21 = vld [vmem:[%s4176_s9] sm:$0x2]  ;;  %v742_v22 = vld [vmem:[%s4176_s9 + $0x8] sm:$0x2] }
 0x2bc   : > { %3943 = vpow2.f32 %v3540_v23  ;;  %v743_v23 = vunpack.c.l.bf16 %v4266_v21 }
 0x2bd   : > { %v550_v24 = vpop.f32.mrf.mxu2  ;;  %v626_v25 = vpop.f32.mrf.mxu3 }
 0x2be   : > { %v744_v24 = vunpack.c.l.bf16 %v742_v22 }
 0x2c0   : > { %v3942_v27 = vpop.eup %3941 }
 0x2c1   : > { %v569_v28 = vadd.f32 1.0, %v3942_v27 }
 0x2c2   : > { %v3944_v29 = vpop.eup %3943 }
 0x2c3   : > { %v568_v30 = vadd.f32 1.0, %v3944_v29  ;;  %3945 = vrcp.f32 %v569_v28  ;;  %v596_v36 = vand.u32 2147483648, %v569_v28  ;;  %v594_v38 = vand.u32 2147483647, %v569_v28 }
 0x2c4   : > { %vm590_vm12 = vweird.f32 %v569_v28 }
 0x2c5   : > { %3947 = vrcp.f32 %v568_v30  ;;  %v581_v41 = vand.u32 2147483648, %v568_v30  ;;  %v579_v44 = vand.u32 2147483647, %v568_v30  ;;  %v597_v45 = vor.u32 1.1754944e-38, %v596_v36 }
 0x2c6   : > { %vm595_vm15 = vcmp.eq.f32.partialorder %v594_v38, 8.507059e+37  ;;  %vm575_vm2 = vweird.f32 %v568_v30 }
 0x2c7   : > { %v582_v49 = vor.u32 1.1754944e-38, %v581_v41  ;;  %vm580_vm4 = vcmp.eq.f32.partialorder %v579_v44, 8.507059e+37 }
 0x2c9   : > { %v3946_v31 = vpop.eup %3945 }
 0x2ca   : > { %v586_v32 = vmul.f32 %v3946_v31, %v569_v28  ;;  %vm591_vm11 = vweird.f32 %v3946_v31 }
 0x2cb   : > { %v3948_v33 = vpop.eup %3947  ;;  %vm592_vm14 = vmor %vm590_vm12, %vm591_vm11 }
 0x2cc   : > { %v587_v34 = vsub.f32 1.0, %v586_v32  ;;  %v571_v35 = vmul.f32 %v3948_v33, %v568_v30  ;;  %vm576_vm13 = vweird.f32 %v3948_v33 }
 0x2cd   : > { %vm577_vm3 = vmor %vm575_vm2, %vm576_vm13  ;;  %vm890_vm2 = vcmask 1043459  }
 0x2ce   : > { %v588_v37 = vmul.f32 %v3946_v31, %v587_v34  ;;  %v572_v39 = vsub.f32 1.0, %v571_v35 }
 0x2d0   : > { %v589_v42 = vadd.f32 %v3946_v31, %v588_v37  ;;  %v573_v43 = vmul.f32 %v3948_v33, %v572_v39 }
 0x2d2   : > { %v593_v46 = vsel %vm592_vm14, %v3946_v31, %v589_v42  ;;  %v574_v47 = vadd.f32 %v3948_v33, %v573_v43 }
 0x2d3   : > { %v598_v48 = vsel %vm595_vm15, %v597_v45, %v593_v46 }
 0x2d4   : > { %v633_v51 = vmul.f32 %v625_v40, %v598_v48  ;;  %v578_v52 = vsel %vm577_vm3, %v3948_v33, %v574_v47  ;;  %v647_v0 = vsub.f32 1.0, %v598_v48  ;;  %vm895_vm3 = vcmask 257026  }
 0x2d5   : > { %v583_v53 = vsel %vm580_vm4, %v582_v49, %v578_v52 }
 0x2d6   : > { %638 = vrot.lane.b32.xlu1 %v633_v51, %s4100_s12  ;;  %v632_v54 = vmul.f32 %v629_v50, %v583_v53  ;;  %v646_v7 = vsub.f32 1.0, %v583_v53 }
 0x2d8   : > { %636 = vrot.lane.b32.xlu2 %v632_v54, %s4100_s12 }
 0x2de   : > { %662 = vrot.lane.b32.xlu1 %v4218_v11, %s4102_s14 }
 0x332   : > { %v637_v55 = vpop.permute.xlu2 %636 }
 0x333   : > { %v642_v56 = vadd.f32 %v637_v55, %v554_v16  ;;  %v3849_v16 = vld [vmem:[%s4850_s1] sm:$0xff] }
 0x334   : > { %735 = vmatpush.bf16.msrb.mxu0 %v3849_v16 }
 0x335   : > { %3949 = vtanh.f32 %v642_v56 }
 0x33b   : > { %v3950_v57 = vpop.eup %3949 }
 0x33c   : > { %650 = vrot.lane.b32.xlu2 %v3950_v57, %s4101_s13 }
 0x348   : > { %v639_v58 = vpop.permute.xlu1 %638 }
 0x349   : > { %v643_v59 = vadd.f32 %v639_v58, %v555_v15  ;;  %v3897_v15 = vld [vmem:[%s4851_s2 + $0x8] sm:$0xff] }
 0x34a   : > { %811 = vmatpush.bf16.msrb.mxu1 %v3897_v15 }
 0x34b   : > { %3951 = vtanh.f32 %v643_v59 }
 0x34e   : > { %812 = vmatpush.bf16.msrb.mxu1 %v3881_v17 }
 0x350   : > { %v663_v1 = vpop.permute.xlu1 %662 }
 0x351   : > { %v3952_v60 = vpop.eup %3951  ;;  %v667_v5 = vmul.f32 %v663_v1, %v598_v48 }
 0x352   : > { %652 = vrot.lane.b32.xlu0 %v3952_v60, %s4101_s13 }
 0x35a   : > { %660 = vrot.lane.b32.xlu0 %v659_v61, %s4102_s14 }
 0x396   : > { %v651_v6 = vpop.permute.xlu2 %650 }
 0x397   : > { %v656_v10 = vmul.f32 %v651_v6, %v646_v7 }
 0x3c4   : > { %v653_v63 = vpop.permute.xlu0 %652 }
 0x3c5   : > { %v657_v4 = vmul.f32 %v653_v63, %v647_v0 }
 0x3c7   : > { %v4241_v8 = vadd.f32 %v667_v5, %v657_v4 }
 0x3c9   : > { %v697_v11 = vrot.slane %v4241_v8, 7 }
 0x3cc   : > { %v661_v9 = vpop.permute.xlu0 %660 }
 0x3cd   : > { %v666_v12 = vmul.f32 %v661_v9, %v583_v53 }
 0x3cf   : > { %v4244_v13 = vadd.f32 %v666_v12, %v656_v10 }
 0x3d1   : > { %v699_v14 = vsel %vm698_vm5, %v697_v11, %v4244_v13  ;;  %v3864_v11 = vld [vmem:[%s4850_s1 + $0x8] sm:$0xff] }
 0x3d2   : > { %700 = vrot.lane.b32.xlu1 %v699_v14, %s4101_s13  ;;  %926 = vmatpush.bf16.msrb.mxu2 %v3864_v11 }
 0x444   : > { %v701_v18 = vpop.permute.xlu1 %700 }
 0x445   : > { %704 = vst.msk [vmem:[#allocation2 - $0x1] sm:$0x6] %vm703_vm6, %v701_v18 }
 0x44c   : > { %v4259_v19 = vld [vmem:[#allocation2] sm:$0x3] }
 0x44d   : > { %v711_v20 = vpack.c.bf16 %v4259_v19, %v4259_v19  ;;  %v851_v1 = vrot.slane %v4259_v19, 7  ;;  %v850_v7 = vrot.slane %v4259_v19, 6 }
 0x44f   : > { %3559 = vmatmul.msk.bf16.vlgmr.msrb.gmra.mxu0 %vm348_vm1, %v711_v20  ;;  %3570 = vmatmul.msk.bf16.vlgmr.msrb.gmra.mxu1 %vm348_vm1, %v711_v20 }
 0x4cc   : > { %v737_v25 = vpop.f32.mrf.mxu0  ;;  %v814_v27 = vpop.f32.mrf.mxu1 }
 0x4cd   : > { %v746_v28 = vrot.slane %v737_v25, 6  ;;  %v747_v29 = vrot.slane %v737_v25, 7  ;;  %v815_v45 = vadd.f32 %v4186_v26, %v814_v27 }
 0x4cf   : > { %v750_v30 = vadd.f32 %v746_v28, %v743_v23  ;;  %v751_v31 = vadd.f32 %v747_v29, %v744_v24  ;;  %v819_v56 = vrot.slane %v815_v45, 6  ;;  %v820_v59 = vrot.slane %v815_v45, 7  ;;  %v3896_v29 = vld [vmem:[%s4851_s2 + $0x8] sm:$0xff] }
 0x4d0   : > { %1003 = vmatpush.bf16.msrb.mxu3 %v3896_v29  ;;  %v3863_v29 = vld [vmem:[%s4850_s1 + $0x8] sm:$0xff] }
 0x4d1   : > { %v3560_v32 = vmul.f32 -1.442695, %v750_v30  ;;  %v3561_v33 = vmul.f32 -1.442695, %v751_v31  ;;  %v3848_v30 = vld [vmem:[%s4850_s1] sm:$0xff]  ;;  %1118 = vmatpush.bf16.msra.mxu0 %v3863_v29 }
 0x4d2   : > { %v3880_v31 = vld [vmem:[%s4851_s2] sm:$0xff]  ;;  %927 = vmatpush.bf16.msrb.mxu2 %v3848_v30 }
 0x4d3   : > { %3953 = vpow2.f32 %v3560_v32 }
 0x4d4   : > { %3955 = vpow2.f32 %v3561_v33  ;;  %v739_v34 = vpop.f32.mrf.mxu0  ;;  %v816_v35 = vpop.f32.mrf.mxu1  ;;  %1004 = vmatpush.bf16.msrb.mxu3 %v3880_v31 }
 0x4d5   : > { %v933_v35 = vld [vmem:[%s4176_s9] sm:$0x2] }
 0x4d9   : > { %v3954_v36 = vpop.eup %3953 }
 0x4da   : > { %v3956_v37 = vpop.eup %3955  ;;  %v758_v38 = vadd.f32 1.0, %v3954_v36  ;;  %v934_v36 = vld [vmem:[%s4176_s9 + $0x8] sm:$0x2] }
 0x4db   : > { %v759_v39 = vadd.f32 1.0, %v3956_v37  ;;  %v935_v37 = vunpack.c.l.bf16 %v933_v35 }
 0x4dc   : > { %3957 = vrcp.f32 %v758_v38  ;;  %v771_v47 = vand.u32 2147483648, %v758_v38  ;;  %v769_v50 = vand.u32 2147483647, %v758_v38  ;;  %vm765_vm9 = vweird.f32 %v758_v38 }
 0x4dd   : > { %3959 = vrcp.f32 %v759_v39  ;;  %v786_v48 = vand.u32 2147483648, %v759_v39  ;;  %v784_v52 = vand.u32 2147483647, %v759_v39  ;;  %vm780_vm11 = vweird.f32 %v759_v39 }
 0x4de   : > { %v772_v55 = vor.u32 1.1754944e-38, %v771_v47  ;;  %vm770_vm14 = vcmp.eq.f32.partialorder %v769_v50, 8.507059e+37 }
 0x4df   : > { %v787_v57 = vor.u32 1.1754944e-38, %v786_v48  ;;  %vm785_vm15 = vcmp.eq.f32.partialorder %v784_v52, 8.507059e+37 }
 0x4e2   : > { %v3958_v40 = vpop.eup %3957 }
 0x4e3   : > { %v3960_v41 = vpop.eup %3959  ;;  %v761_v42 = vmul.f32 %v3958_v40, %v758_v38  ;;  %vm766_vm7 = vweird.f32 %v3958_v40  ;;  %v936_v38 = vunpack.c.l.bf16 %v934_v36 }
 0x4e4   : > { %v776_v43 = vmul.f32 %v3960_v41, %v759_v39  ;;  %vm781_vm8 = vweird.f32 %v3960_v41  ;;  %vm767_vm12 = vmor %vm765_vm9, %vm766_vm7 }
 0x4e5   : > { %v762_v44 = vsub.f32 1.0, %v761_v42  ;;  %vm782_vm13 = vmor %vm780_vm11, %vm781_vm8 }
 0x4e6   : > { %v777_v46 = vsub.f32 1.0, %v776_v43 }
 0x4e7   : > { %v763_v49 = vmul.f32 %v3958_v40, %v762_v44 }
 0x4e8   : > { %v778_v51 = vmul.f32 %v3960_v41, %v777_v46 }
 0x4e9   : > { %v764_v53 = vadd.f32 %v3958_v40, %v763_v49 }
 0x4ea   : > { %v779_v54 = vadd.f32 %v3960_v41, %v778_v51 }
 0x4eb   : > { %v768_v58 = vsel %vm767_vm12, %v3958_v40, %v764_v53 }
 0x4ec   : > { %v783_v60 = vsel %vm782_vm13, %v3960_v41, %v779_v54  ;;  %v773_v61 = vsel %vm770_vm14, %v772_v55, %v768_v58 }
 0x4ed   : > { %v788_v62 = vsel %vm785_vm15, %v787_v57, %v783_v60  ;;  %v823_v63 = vmul.f32 %v819_v56, %v773_v61  ;;  %v837_v22 = vsub.f32 1.0, %v773_v61  ;;  %vm4857_vm15 = vcmask 1044484  }
 0x4ee   : > { %v824_v0 = vmul.f32 %v820_v59, %v788_v62  ;;  %v838_v15 = vsub.f32 1.0, %v788_v62 }
 0x4ef   : > { %827 = vrot.lane.b32.xlu0 %v823_v63, %s4100_s12 }
 0x4f0   : > { %829 = vrot.lane.b32.xlu2 %v824_v0, %s4100_s12 }
 0x4f8   : > { %854 = vrot.lane.b32.xlu2 %v851_v1, %s4102_s14 }
 0x54a   : > { %v830_v4 = vpop.permute.xlu2 %829 }
 0x54b   : > { %v834_v5 = vadd.f32 %v830_v4, %v744_v24 }
 0x54d   : > { %3961 = vtanh.f32 %v834_v5 }
 0x552   : > { %v855_v16 = vpop.permute.xlu2 %854 }
 0x553   : > { %v3962_v6 = vpop.eup %3961  ;;  %v859_v18 = vmul.f32 %v855_v16, %v788_v62 }
 0x554   : > { %843 = vrot.lane.b32.xlu1 %v3962_v6, %s4101_s13 }
 0x55c   : > { %852 = vrot.lane.b32.xlu1 %v850_v7, %s4102_s14 }
 0x561   : > { %v828_v9 = vpop.permute.xlu0 %827 }
 0x562   : > { %v833_v10 = vadd.f32 %v828_v9, %v743_v23 }
 0x564   : > { %3963 = vtanh.f32 %v833_v10 }
 0x56a   : > { %v3964_v12 = vpop.eup %3963 }
 0x56b   : > { %841 = vrot.lane.b32.xlu0 %v3964_v12, %s4101_s13 }
 0x5c6   : > { %v844_v14 = vpop.permute.xlu1 %843 }
 0x5c7   : > { %v848_v17 = vmul.f32 %v844_v14, %v838_v15 }
 0x5c9   : > { %v4286_v20 = vadd.f32 %v859_v18, %v848_v17 }
 0x5cb   : > { %v889_v25 = vrot.slane %v4286_v20, 7 }
 0x5ce   : > { %v853_v19 = vpop.permute.xlu1 %852 }
 0x5cf   : > { %v858_v23 = vmul.f32 %v853_v19, %v773_v61 }
 0x5dd   : > { %v842_v21 = vpop.permute.xlu0 %841 }
 0x5de   : > { %v847_v24 = vmul.f32 %v842_v21, %v837_v22 }
 0x5e0   : > { %v4289_v27 = vadd.f32 %v858_v23, %v847_v24 }
 0x5e2   : > { %v891_v28 = vsel %vm890_vm2, %v889_v25, %v4289_v27 }
 0x5e3   : > { %892 = vrot.lane.b32.xlu2 %v891_v28, %s4101_s13 }
 0x63d   : > { %v893_v32 = vpop.permute.xlu2 %892 }
 0x63e   : > { %896 = vst.msk [vmem:[#allocation2 - $0x2] sm:$0xc] %vm895_vm3, %v893_v32 }
 0x645   : > { %v4304_v33 = vld [vmem:[#allocation2] sm:$0x3] }
 0x646   : > { %v903_v34 = vpack.c.bf16 %v4304_v33, %v4304_v33  ;;  %v1043_v18 = vrot.slane %v4304_v33, 6  ;;  %v1042_v28 = vrot.slane %v4304_v33, 5 }
 0x648   : > { %3579 = vmatmul.msk.bf16.vlgmr.msrb.gmra.mxu2 %vm348_vm1, %v903_v34  ;;  %3590 = vmatmul.msk.bf16.vlgmr.msrb.gmra.mxu3 %vm348_vm1, %v903_v34 }
 0x6cb   : > { %v929_v39 = vpop.f32.mrf.mxu2  ;;  %v1006_v40 = vpop.f32.mrf.mxu3 }
 0x6cc   : > { %v938_v41 = vrot.slane %v929_v39, 5  ;;  %v939_v42 = vrot.slane %v929_v39, 6  ;;  %v1007_v58 = vadd.f32 %v4186_v26, %v1006_v40 }
 0x6ce   : > { %v942_v43 = vadd.f32 %v938_v41, %v935_v37  ;;  %v943_v44 = vadd.f32 %v939_v42, %v936_v38  ;;  %v1011_v7 = vrot.slane %v1007_v58, 5  ;;  %v1012_v12 = vrot.slane %v1007_v58, 6 }
 0x6d0   : > { %v3580_v45 = vmul.f32 -1.442695, %v942_v43  ;;  %v3581_v46 = vmul.f32 -1.442695, %v943_v44  ;;  %v3895_v44 = vld [vmem:[%s4851_s2 + $0x8] sm:$0xff] }
 0x6d1   : > { %1195 = vmatpush.bf16.msra.mxu1 %v3895_v44 }
 0x6d2   : > { %3965 = vpow2.f32 %v3580_v45  ;;  %v3847_v45 = vld [vmem:[%s4850_s1] sm:$0xff] }
 0x6d3   : > { %3967 = vpow2.f32 %v3581_v46  ;;  %v931_v47 = vpop.f32.mrf.mxu2  ;;  %v1008_v48 = vpop.f32.mrf.mxu3  ;;  %v3879_v46 = vld [vmem:[%s4851_s2] sm:$0xff]  ;;  %1119 = vmatpush.bf16.msra.mxu0 %v3847_v45 }
 0x6d5   : > { %1196 = vmatpush.bf16.msra.mxu1 %v3879_v46  ;;  %v3862_v46 = vld [vmem:[%s4850_s1 + $0x8] sm:$0xff] }
 0x6d6   : > { %1310 = vmatpush.bf16.msra.mxu2 %v3862_v46 }
 0x6d8   : > { %v3966_v49 = vpop.eup %3965 }
 0x6d9   : > { %v3968_v50 = vpop.eup %3967  ;;  %v950_v51 = vadd.f32 1.0, %v3966_v49 }
 0x6da   : > { %v951_v52 = vadd.f32 1.0, %v3968_v50  ;;  %v1125_v50 = vld [vmem:[%s4176_s9] sm:$0x4] }
 0x6db   : > { %3969 = vrcp.f32 %v950_v51  ;;  %v963_v60 = vand.u32 2147483648, %v950_v51  ;;  %v961_v63 = vand.u32 2147483647, %v950_v51  ;;  %vm957_vm8 = vweird.f32 %v950_v51 }
 0x6dc   : > { %3971 = vrcp.f32 %v951_v52  ;;  %v978_v61 = vand.u32 2147483648, %v951_v52  ;;  %v976_v1 = vand.u32 2147483647, %v951_v52  ;;  %vm972_vm9 = vweird.f32 %v951_v52 }
 0x6dd   : > { %v964_v6 = vor.u32 1.1754944e-38, %v963_v60  ;;  %vm962_vm13 = vcmp.eq.f32.partialorder %v961_v63, 8.507059e+37 }
 0x6de   : > { %v979_v9 = vor.u32 1.1754944e-38, %v978_v61  ;;  %vm977_vm14 = vcmp.eq.f32.partialorder %v976_v1, 8.507059e+37 }
 0x6e1   : > { %v3970_v53 = vpop.eup %3969 }
 0x6e2   : > { %v3972_v54 = vpop.eup %3971  ;;  %v953_v55 = vmul.f32 %v3970_v53, %v950_v51  ;;  %vm958_vm4 = vweird.f32 %v3970_v53  ;;  %v4350_v51 = vld [vmem:[%s4176_s9 + $0x8] sm:$0x4] }
 0x6e3   : > { %v968_v56 = vmul.f32 %v3972_v54, %v951_v52  ;;  %vm973_vm7 = vweird.f32 %v3972_v54  ;;  %vm959_vm11 = vmor %vm957_vm8, %vm958_vm4  ;;  %vm4855_vm4 = vcmask 258051   ;;  %v1127_v52 = vunpack.c.l.bf16 %v1125_v50 }
 0x6e4   : > { %v954_v57 = vsub.f32 1.0, %v953_v55  ;;  %vm974_vm12 = vmor %vm972_vm9, %vm973_vm7 }
 0x6e5   : > { %v969_v59 = vsub.f32 1.0, %v968_v56 }
 0x6e6   : > { %v955_v62 = vmul.f32 %v3970_v53, %v954_v57 }
 0x6e7   : > { %v970_v0 = vmul.f32 %v3972_v54, %v969_v59 }
 0x6e8   : > { %v956_v4 = vadd.f32 %v3970_v53, %v955_v62 }
 0x6e9   : > { %v971_v5 = vadd.f32 %v3972_v54, %v970_v0 }
 0x6ea   : > { %v960_v10 = vsel %vm959_vm11, %v3970_v53, %v956_v4  ;;  %v1128_v53 = vunpack.c.l.bf16 %v4350_v51 }
 0x6eb   : > { %v975_v11 = vsel %vm974_vm12, %v3972_v54, %v971_v5  ;;  %v965_v14 = vsel %vm962_vm13, %v964_v6, %v960_v10 }
 0x6ec   : > { %v980_v15 = vsel %vm977_vm14, %v979_v9, %v975_v11  ;;  %v1015_v16 = vmul.f32 %v1011_v7, %v965_v14 }
 0x6ed   : > { %v1016_v17 = vmul.f32 %v1012_v12, %v980_v15  ;;  %v1030_v31 = vsub.f32 1.0, %v980_v15 }
 0x6ee   : > { %1019 = vrot.lane.b32.xlu1 %v1015_v16, %s4100_s12 }
 0x6ef   : > { %1021 = vrot.lane.b32.xlu0 %v1016_v17, %s4100_s12 }
 0x6f7   : > { %1046 = vrot.lane.b32.xlu0 %v1043_v18, %s4102_s14 }
 0x760   : > { %v1020_v19 = vpop.permute.xlu1 %1019 }
 0x761   : > { %v1022_v22 = vpop.permute.xlu0 %1021  ;;  %v1025_v21 = vadd.f32 %v1020_v19, %v935_v37 }
 0x762   : > { %v1026_v23 = vadd.f32 %v1022_v22, %v936_v38  ;;  %v1029_v38 = vsub.f32 1.0, %v965_v14 }
 0x763   : > { %3973 = vtanh.f32 %v1025_v21 }
 0x764   : > { %3975 = vtanh.f32 %v1026_v23 }
 0x769   : > { %v3974_v24 = vpop.eup %3973  ;;  %v1047_v32 = vpop.permute.xlu0 %1046 }
 0x76a   : > { %v3976_v25 = vpop.eup %3975  ;;  %1033 = vrot.lane.b32.xlu1 %v3974_v24, %s4101_s13  ;;  %v1051_v35 = vmul.f32 %v1047_v32, %v980_v15 }
 0x76b   : > { %1035 = vrot.lane.b32.xlu2 %v3976_v25, %s4101_s13 }
 0x773   : > { %1044 = vrot.lane.b32.xlu2 %v1042_v28, %s4102_s14 }
 0x7c5   : > { %v1036_v30 = vpop.permute.xlu2 %1035 }
 0x7c6   : > { %v1040_v34 = vmul.f32 %v1036_v30, %v1030_v31 }
 0x7c8   : > { %v4324_v37 = vadd.f32 %v1051_v35, %v1040_v34 }
 0x7ca   : > { %v1081_v33 = vrot.slane %v4324_v37, 7 }
 0x7cd   : > { %v1045_v36 = vpop.permute.xlu2 %1044 }
 0x7ce   : > { %v1050_v40 = vmul.f32 %v1045_v36, %v965_v14 }
 0x7dc   : > { %v1034_v39 = vpop.permute.xlu1 %1033 }
 0x7dd   : > { %v1039_v41 = vmul.f32 %v1034_v39, %v1029_v38 }
 0x7df   : > { %v4327_v42 = vadd.f32 %v1050_v40, %v1039_v41 }
 0x7e1   : > { %v1083_v43 = vsel %vm4857_vm15, %v1081_v33, %v4327_v42 }
 0x7e2   : > { %1084 = vrot.lane.b32.xlu0 %v1083_v43, %s4101_s13 }
 0x854   : > { %v1085_v47 = vpop.permute.xlu0 %1084 }
 0x855   : > { %1088 = vst.msk [vmem:[#allocation2 - $0x3] sm:$0x18] %vm4855_vm4, %v1085_v47 }
 0x85c   : > { %v4342_v48 = vld [vmem:[#allocation2] sm:$0x3] }
 0x85d   : > { %v1095_v49 = vpack.c.bf16 %v4342_v48, %v4342_v48  ;;  %v1235_v38 = vrot.slane %v4342_v48, 5  ;;  %v1234_v45 = vrot.slane %v4342_v48, 4 }
 0x85f   : > { %3599 = vmatmul.msk.bf16.vlgmr.msra.gmra.mxu0 %vm348_vm1, %v1095_v49  ;;  %3610 = vmatmul.msk.bf16.vlgmr.msra.gmra.mxu1 %vm348_vm1, %v1095_v49 }
 0x8dc   : > { %v1121_v54 = vpop.f32.mrf.mxu0  ;;  %v1198_v55 = vpop.f32.mrf.mxu1 }
 0x8dd   : > { %v1130_v56 = vrot.slane %v1121_v54, 4  ;;  %v1131_v57 = vrot.slane %v1121_v54, 5  ;;  %v1199_v11 = vadd.f32 %v4186_v26, %v1198_v55 }
 0x8df   : > { %v1134_v58 = vadd.f32 %v1130_v56, %v1127_v52  ;;  %v1135_v59 = vadd.f32 %v1131_v57, %v1128_v53  ;;  %v1203_v25 = vrot.slane %v1199_v11, 4  ;;  %v1204_v30 = vrot.slane %v1199_v11, 5 }
 0x8e1   : > { %v3600_v60 = vmul.f32 -1.442695, %v1134_v58  ;;  %v3601_v61 = vmul.f32 -1.442695, %v1135_v59 }
 0x8e3   : > { %3977 = vpow2.f32 %v3600_v60 }
 0x8e4   : > { %3979 = vpow2.f32 %v3601_v61  ;;  %v1123_v62 = vpop.f32.mrf.mxu0  ;;  %v1200_v63 = vpop.f32.mrf.mxu1  ;;  %v3846_v61 = vld [vmem:[%s4850_s1] sm:$0xff] }
 0x8e5   : > { %v3894_v62 = vld [vmem:[%s4851_s2 + $0x8] sm:$0xff]  ;;  %1311 = vmatpush.bf16.msra.mxu2 %v3846_v61  ;;  %v3878_v63 = vld [vmem:[%s4851_s2] sm:$0xff] }
 0x8e6   : > { %1387 = vmatpush.bf16.msra.mxu3 %v3894_v62 }
 0x8e9   : > { %v3978_v0 = vpop.eup %3977 }
 0x8ea   : > { %v3980_v1 = vpop.eup %3979  ;;  %v1142_v4 = vadd.f32 1.0, %v3978_v0  ;;  %1388 = vmatpush.bf16.msra.mxu3 %v3878_v63 }
 0x8eb   : > { %v1143_v5 = vadd.f32 1.0, %v3980_v1 }
 0x8ec   : > { %3981 = vrcp.f32 %v1142_v4  ;;  %v1155_v15 = vand.u32 2147483648, %v1142_v4  ;;  %v1153_v18 = vand.u32 2147483647, %v1142_v4  ;;  %vm1149_vm9 = vweird.f32 %v1142_v4 }
 0x8ed   : > { %3983 = vrcp.f32 %v1143_v5  ;;  %v1170_v16 = vand.u32 2147483648, %v1143_v5  ;;  %v1168_v22 = vand.u32 2147483647, %v1143_v5  ;;  %vm1164_vm11 = vweird.f32 %v1143_v5 }
 0x8ee   : > { %v1156_v24 = vor.u32 1.1754944e-38, %v1155_v15  ;;  %vm1154_vm14 = vcmp.eq.f32.partialorder %v1153_v18, 8.507059e+37 }
 0x8ef   : > { %v1171_v28 = vor.u32 1.1754944e-38, %v1170_v16  ;;  %vm1169_vm4 = vcmp.eq.f32.partialorder %v1168_v22, 8.507059e+37 }
 0x8f2   : > { %v3982_v6 = vpop.eup %3981 }
 0x8f3   : > { %v3984_v7 = vpop.eup %3983  ;;  %v1145_v9 = vmul.f32 %v3982_v6, %v1142_v4  ;;  %vm1150_vm7 = vweird.f32 %v3982_v6 }
 0x8f4   : > { %v1160_v10 = vmul.f32 %v3984_v7, %v1143_v5  ;;  %vm1165_vm8 = vweird.f32 %v3984_v7  ;;  %vm1151_vm12 = vmor %vm1149_vm9, %vm1150_vm7  ;;  %vm1279_vm7 = vcmask 259076   ;;  %v4388_v5 = vld [vmem:[%s4176_s9] sm:$0x4] }
 0x8f5   : > { %v1146_v12 = vsub.f32 1.0, %v1145_v9  ;;  %vm1166_vm13 = vmor %vm1164_vm11, %vm1165_vm8 }
 0x8f6   : > { %v1161_v14 = vsub.f32 1.0, %v1160_v10 }
 0x8f7   : > { %v1147_v17 = vmul.f32 %v3982_v6, %v1146_v12 }
 0x8f8   : > { %v1162_v19 = vmul.f32 %v3984_v7, %v1161_v14 }
 0x8f9   : > { %v1148_v21 = vadd.f32 %v3982_v6, %v1147_v17 }
 0x8fa   : > { %v1163_v23 = vadd.f32 %v3984_v7, %v1162_v19 }
 0x8fb   : > { %v1152_v29 = vsel %vm1151_vm12, %v3982_v6, %v1148_v21  ;;  %v1318_v6 = vld [vmem:[%s4176_s9 + $0x8] sm:$0x4] }
 0x8fc   : > { %v1167_v31 = vsel %vm1166_vm13, %v3984_v7, %v1163_v23  ;;  %v1157_v32 = vsel %vm1154_vm14, %v1156_v24, %v1152_v29  ;;  %v1319_v7 = vunpack.c.l.bf16 %v4388_v5  ;;  %v1320_v9 = vunpack.c.l.bf16 %v1318_v6 }
 0x8fd   : > { %v1172_v34 = vsel %vm1169_vm4, %v1171_v28, %v1167_v31  ;;  %v1207_v35 = vmul.f32 %v1203_v25, %v1157_v32  ;;  %vm1274_vm4 = vcmask 1045509  }
 0x8fe   : > { %v1208_v36 = vmul.f32 %v1204_v30, %v1172_v34  ;;  %v1222_v49 = vsub.f32 1.0, %v1172_v34 }
 0x8ff   : > { %1211 = vrot.lane.b32.xlu2 %v1207_v35, %s4100_s12 }
 0x900   : > { %1213 = vrot.lane.b32.xlu1 %v1208_v36, %s4100_s12 }
 0x908   : > { %1238 = vrot.lane.b32.xlu1 %v1235_v38, %s4102_s14 }
 0x959   : > { %v1212_v39 = vpop.permute.xlu2 %1211 }
 0x95a   : > { %v1217_v40 = vadd.f32 %v1212_v39, %v1127_v52 }
 0x95c   : > { %3985 = vtanh.f32 %v1217_v40 }
 0x962   : > { %v3986_v41 = vpop.eup %3985 }
 0x963   : > { %1225 = vrot.lane.b32.xlu2 %v3986_v41, %s4101_s13 }
 0x972   : > { %v1214_v33 = vpop.permute.xlu1 %1213 }
 0x973   : > { %v1218_v43 = vadd.f32 %v1214_v33, %v1128_v53  ;;  %v1221_v53 = vsub.f32 1.0, %v1157_v32 }
 0x975   : > { %3987 = vtanh.f32 %v1218_v43 }
 0x97a   : > { %v1239_v50 = vpop.permute.xlu1 %1238 }
 0x97b   : > { %v3988_v44 = vpop.eup %3987  ;;  %v1243_v52 = vmul.f32 %v1239_v50, %v1172_v34 }
 0x97c   : > { %1227 = vrot.lane.b32.xlu0 %v3988_v44, %s4101_s13 }
 0x984   : > { %1236 = vrot.lane.b32.xlu0 %v1234_v45, %s4102_s14 }
 0x9bd   : > { %v1226_v54 = vpop.permute.xlu2 %1225 }
 0x9be   : > { %v1231_v57 = vmul.f32 %v1226_v54, %v1221_v53 }
 0x9ee   : > { %v1228_v47 = vpop.permute.xlu0 %1227 }
 0x9ef   : > { %v1232_v51 = vmul.f32 %v1228_v47, %v1222_v49 }
 0x9f1   : > { %v4365_v55 = vadd.f32 %v1243_v52, %v1232_v51 }
 0x9f3   : > { %v1273_v48 = vrot.slane %v4365_v55, 7 }
 0x9f6   : > { %v1237_v56 = vpop.permute.xlu0 %1236 }
 0x9f7   : > { %v1242_v58 = vmul.f32 %v1237_v56, %v1157_v32 }
 0x9f9   : > { %v4368_v59 = vadd.f32 %v1242_v58, %v1231_v57 }
 0x9fb   : > { %v1275_v60 = vsel %vm1274_vm4, %v1273_v48, %v4368_v59 }
 0x9fc   : > { %1276 = vrot.lane.b32.xlu1 %v1275_v60, %s4101_s13 }
 0xa6e   : > { %v1277_v0 = vpop.permute.xlu1 %1276 }
 0xa6f   : > { %1280 = vst.msk [vmem:[#allocation2 - $0x4] sm:$0x30] %vm1279_vm7, %v1277_v0  ;;  %v3861_v0 = vld [vmem:[%s4850_s1 + $0x8] sm:$0xff] }
 0xa70   : > { %1502 = vmatpush.bf16.msrb.mxu0 %v3861_v0 }
 0xa76   : > { %v4381_v1 = vld [vmem:[#allocation2] sm:$0x3] }
 0xa77   : > { %v1287_v4 = vpack.c.bf16 %v4381_v1, %v4381_v1  ;;  %v1427_v56 = vrot.slane %v4381_v1, 4  ;;  %v1426_v60 = vrot.slane %v4381_v1, 3 }
 0xa79   : > { %3619 = vmatmul.msk.bf16.vlgmr.msra.gmra.mxu2 %vm348_vm1, %v1287_v4  ;;  %3630 = vmatmul.msk.bf16.vlgmr.msra.gmra.mxu3 %vm348_vm1, %v1287_v4 }
 0xafc   : > { %v1313_v10 = vpop.f32.mrf.mxu2  ;;  %v1390_v12 = vpop.f32.mrf.mxu3 }
 0xafd   : > { %v1322_v11 = vrot.slane %v1313_v10, 3  ;;  %v1323_v14 = vrot.slane %v1313_v10, 4  ;;  %v1391_v34 = vadd.f32 %v4186_v26, %v1390_v12 }
 0xaff   : > { %v1326_v15 = vadd.f32 %v1322_v11, %v1319_v7  ;;  %v1327_v16 = vadd.f32 %v1323_v14, %v1320_v9  ;;  %v1395_v46 = vrot.slane %v1391_v34, 3  ;;  %v1396_v26 = vrot.slane %v1391_v34, 4 }
 0xb01   : > { %v3620_v17 = vmul.f32 -1.442695, %v1326_v15  ;;  %v3621_v18 = vmul.f32 -1.442695, %v1327_v16 }
 0xb03   : > { %3989 = vpow2.f32 %v3620_v17 }
 0xb04   : > { %3991 = vpow2.f32 %v3621_v18  ;;  %v1315_v19 = vpop.f32.mrf.mxu2  ;;  %v1392_v22 = vpop.f32.mrf.mxu3 }
 0xb05   : > { %v3845_v19 = vld [vmem:[%s4850_s1] sm:$0xff]  ;;  %v3893_v22 = vld [vmem:[%s4851_s2 + $0x8] sm:$0xff] }
 0xb06   : > { %1503 = vmatpush.bf16.msrb.mxu0 %v3845_v19  ;;  %1579 = vmatpush.bf16.msrb.mxu1 %v3893_v22 }
 0xb09   : > { %v3990_v21 = vpop.eup %3989 }
 0xb0a   : > { %v3992_v23 = vpop.eup %3991  ;;  %v1334_v24 = vadd.f32 1.0, %v3990_v21  ;;  %v3877_v21 = vld [vmem:[%s4851_s2] sm:$0xff] }
 0xb0b   : > { %v1335_v25 = vadd.f32 1.0, %v3992_v23  ;;  %1580 = vmatpush.bf16.msrb.mxu1 %v3877_v21 }
 0xb0c   : > { %3993 = vrcp.f32 %v1334_v24  ;;  %v1347_v36 = vand.u32 2147483648, %v1334_v24  ;;  %v1345_v40 = vand.u32 2147483647, %v1334_v24  ;;  %vm1341_vm11 = vweird.f32 %v1334_v24 }
 0xb0d   : > { %3995 = vrcp.f32 %v1335_v25  ;;  %v1362_v38 = vand.u32 2147483648, %v1335_v25  ;;  %v1360_v33 = vand.u32 2147483647, %v1335_v25  ;;  %vm1356_vm12 = vweird.f32 %v1335_v25 }
 0xb0e   : > { %v1348_v45 = vor.u32 1.1754944e-38, %v1347_v36  ;;  %vm1346_vm4 = vcmp.eq.f32.partialorder %v1345_v40, 8.507059e+37 }
 0xb0f   : > { %v1363_v47 = vor.u32 1.1754944e-38, %v1362_v38  ;;  %vm1361_vm7 = vcmp.eq.f32.partialorder %v1360_v33, 8.507059e+37 }
 0xb12   : > { %v3994_v28 = vpop.eup %3993 }
 0xb13   : > { %v3996_v29 = vpop.eup %3995  ;;  %v1337_v30 = vmul.f32 %v3994_v28, %v1334_v24  ;;  %vm1342_vm8 = vweird.f32 %v3994_v28 }
 0xb14   : > { %v1352_v31 = vmul.f32 %v3996_v29, %v1335_v25  ;;  %vm1357_vm9 = vweird.f32 %v3996_v29  ;;  %vm1343_vm13 = vmor %vm1341_vm11, %vm1342_vm8  ;;  %vm1466_vm8 = vcmask 1046534  }
 0xb15   : > { %v1338_v32 = vsub.f32 1.0, %v1337_v30  ;;  %vm1358_vm14 = vmor %vm1356_vm12, %vm1357_vm9  ;;  %vm1471_vm9 = vcmask 260101  }
 0xb16   : > { %v1353_v35 = vsub.f32 1.0, %v1352_v31 }
 0xb17   : > { %v1339_v39 = vmul.f32 %v3994_v28, %v1338_v32 }
 0xb18   : > { %v1354_v41 = vmul.f32 %v3996_v29, %v1353_v35 }
 0xb19   : > { %v1340_v43 = vadd.f32 %v3994_v28, %v1339_v39 }
 0xb1a   : > { %v1355_v44 = vadd.f32 %v3996_v29, %v1354_v41 }
 0xb1b   : > { %v1344_v49 = vsel %vm1343_vm13, %v3994_v28, %v1340_v43  ;;  %v4431_v28 = vld [vmem:[%s4176_s9] sm:$0x8] }
 0xb1c   : > { %v1359_v50 = vsel %vm1358_vm14, %v3996_v29, %v1355_v44  ;;  %v1349_v51 = vsel %vm1346_vm4, %v1348_v45, %v1344_v49  ;;  %v4434_v29 = vld [vmem:[%s4176_s9 + $0x8] sm:$0x8]  ;;  %v1511_v30 = vunpack.c.l.bf16 %v4431_v28 }
 0xb1d   : > { %v1364_v52 = vsel %vm1361_vm7, %v1363_v47, %v1359_v50  ;;  %v1399_v54 = vmul.f32 %v1395_v46, %v1349_v51  ;;  %v1413_v14 = vsub.f32 1.0, %v1349_v51  ;;  %v1512_v31 = vunpack.c.l.bf16 %v4434_v29  ;;  %v3860_v29 = vld [vmem:[%s4850_s1 + $0x8] sm:$0xff] }
 0xb1e   : > { %v1400_v53 = vmul.f32 %v1396_v26, %v1364_v52  ;;  %v1414_v6 = vsub.f32 1.0, %v1364_v52  ;;  %1694 = vmatpush.bf16.msrb.mxu2 %v3860_v29 }
 0xb1f   : > { %1403 = vrot.lane.b32.xlu0 %v1399_v54, %s4100_s12  ;;  %v4441_v54 = vld [vmem:[%s4852_s3] ss:$0 sm:$0xff] }
 0xb20   : > { %1405 = vrot.lane.b32.xlu2 %v1400_v53, %s4100_s12 }
 0xb28   : > { %1430 = vrot.lane.b32.xlu2 %v1427_v56, %s4102_s14 }
 0xb7a   : > { %v1406_v57 = vpop.permute.xlu2 %1405 }
 0xb7b   : > { %v1410_v58 = vadd.f32 %v1406_v57, %v1320_v9 }
 0xb7d   : > { %3997 = vtanh.f32 %v1410_v58 }
 0xb82   : > { %v1431_v9 = vpop.permute.xlu2 %1430 }
 0xb83   : > { %v3998_v48 = vpop.eup %3997  ;;  %v1435_v1 = vmul.f32 %v1431_v9, %v1364_v52 }
 0xb84   : > { %1419 = vrot.lane.b32.xlu1 %v3998_v48, %s4101_s13 }
 0xb8c   : > { %1428 = vrot.lane.b32.xlu1 %v1426_v60, %s4102_s14 }
 0xb91   : > { %v1404_v61 = vpop.permute.xlu0 %1403 }
 0xb92   : > { %v1409_v62 = vadd.f32 %v1404_v61, %v1319_v7 }
 0xb94   : > { %3999 = vtanh.f32 %v1409_v62 }
 0xb9a   : > { %v4000_v63 = vpop.eup %3999 }
 0xb9b   : > { %1417 = vrot.lane.b32.xlu0 %v4000_v63, %s4101_s13 }
 0xbf6   : > { %v1420_v4 = vpop.permute.xlu1 %1419 }
 0xbf7   : > { %v1424_v10 = vmul.f32 %v1420_v4, %v1414_v6 }
 0xbf9   : > { %v4408_v11 = vadd.f32 %v1435_v1, %v1424_v10 }
 0xbfb   : > { %v1465_v16 = vrot.slane %v4408_v11, 7 }
 0xbfe   : > { %v1429_v12 = vpop.permute.xlu1 %1428 }
 0xbff   : > { %v1434_v7 = vmul.f32 %v1429_v12, %v1349_v51 }
 0xc0d   : > { %v1418_v5 = vpop.permute.xlu0 %1417 }
 0xc0e   : > { %v1423_v15 = vmul.f32 %v1418_v5, %v1413_v14 }
 0xc10   : > { %v4411_v17 = vadd.f32 %v1434_v7, %v1423_v15 }
 0xc12   : > { %v1467_v18 = vsel %vm1466_vm8, %v1465_v16, %v4411_v17 }
 0xc13   : > { %1468 = vrot.lane.b32.xlu2 %v1467_v18, %s4101_s13 }
 0xc6d   : > { %v1469_v23 = vpop.permute.xlu2 %1468 }
 0xc6e   : > { %1472 = vst.msk [vmem:[#allocation2 - $0x5] sm:$0x60] %vm1471_vm9, %v1469_v23 }
 0xc75   : > { %v4424_v24 = vld [vmem:[#allocation2] sm:$0x3] }
 0xc76   : > { %v1479_v25 = vpack.c.bf16 %v4424_v24, %v4424_v24  ;;  %v1619_v16 = vrot.slane %v4424_v24, 3  ;;  %v1618_v28 = vrot.slane %v4424_v24, 2 }
 0xc78   : > { %3639 = vmatmul.msk.bf16.vlgmr.msrb.gmra.mxu0 %vm348_vm1, %v1479_v25  ;;  %3650 = vmatmul.msk.bf16.vlgmr.msrb.gmra.mxu1 %vm348_vm1, %v1479_v25 }
 0xcf5   : > { %v1505_v32 = vpop.f32.mrf.mxu0  ;;  %v1582_v34 = vpop.f32.mrf.mxu1 }
 0xcf6   : > { %v1514_v35 = vrot.slane %v1505_v32, 2  ;;  %v1515_v36 = vrot.slane %v1505_v32, 3  ;;  %v1583_v53 = vadd.f32 %v4441_v54, %v1582_v34 }
 0xcf8   : > { %v1518_v38 = vadd.f32 %v1514_v35, %v1511_v30  ;;  %v1519_v39 = vadd.f32 %v1515_v36, %v1512_v31  ;;  %v1587_v6 = vrot.slane %v1583_v53, 2  ;;  %v1588_v1 = vrot.slane %v1583_v53, 3 }
 0xcfa   : > { %v3640_v40 = vmul.f32 -1.442695, %v1518_v38  ;;  %v3641_v41 = vmul.f32 -1.442695, %v1519_v39 }
 0xcfc   : > { %4001 = vpow2.f32 %v3640_v40 }
 0xcfd   : > { %4003 = vpow2.f32 %v3641_v41  ;;  %v1507_v33 = vpop.f32.mrf.mxu0  ;;  %v1584_v43 = vpop.f32.mrf.mxu1 }
 0xd02   : > { %v4002_v44 = vpop.eup %4001 }
 0xd03   : > { %v4004_v45 = vpop.eup %4003  ;;  %v1526_v46 = vadd.f32 1.0, %v4002_v44 }
 0xd04   : > { %v1527_v47 = vadd.f32 1.0, %v4004_v45  ;;  %v3844_v45 = vld [vmem:[%s4850_s1] sm:$0xff] }
 0xd05   : > { %4005 = vrcp.f32 %v1526_v46  ;;  %v1539_v57 = vand.u32 2147483648, %v1526_v46  ;;  %v1537_v60 = vand.u32 2147483647, %v1526_v46  ;;  %vm1533_vm13 = vweird.f32 %v1526_v46  ;;  %1695 = vmatpush.bf16.msrb.mxu2 %v3844_v45 }
 0xd06   : > { %4007 = vrcp.f32 %v1527_v47  ;;  %v1554_v58 = vand.u32 2147483648, %v1527_v47  ;;  %v1552_v62 = vand.u32 2147483647, %v1527_v47  ;;  %vm1548_vm14 = vweird.f32 %v1527_v47 }
 0xd07   : > { %v1540_v4 = vor.u32 1.1754944e-38, %v1539_v57  ;;  %vm1538_vm8 = vcmp.eq.f32.partialorder %v1537_v60, 8.507059e+37 }
 0xd08   : > { %v1555_v9 = vor.u32 1.1754944e-38, %v1554_v58  ;;  %vm1553_vm9 = vcmp.eq.f32.partialorder %v1552_v62, 8.507059e+37 }
 0xd0b   : > { %v4006_v49 = vpop.eup %4005 }
 0xd0c   : > { %v4008_v26 = vpop.eup %4007  ;;  %v1529_v50 = vmul.f32 %v4006_v49, %v1526_v46  ;;  %vm1534_vm11 = vweird.f32 %v4006_v49  ;;  %v3892_v46 = vld [vmem:[%s4851_s2 + $0x8] sm:$0xff] }
 0xd0d   : > { %v1544_v51 = vmul.f32 %v4008_v26, %v1527_v47  ;;  %vm1549_vm12 = vweird.f32 %v4008_v26  ;;  %vm1535_vm4 = vmor %vm1533_vm13, %vm1534_vm11  ;;  %vm1658_vm11 = vcmask 1047559   ;;  %1771 = vmatpush.bf16.msrb.mxu3 %v3892_v46  ;;  %v3876_v47 = vld [vmem:[%s4851_s2] sm:$0xff] }
 0xd0e   : > { %v1530_v52 = vsub.f32 1.0, %v1529_v50  ;;  %vm1550_vm7 = vmor %vm1548_vm14, %vm1549_vm12  ;;  %vm1663_vm12 = vcmask 261126  }
 0xd0f   : > { %v1545_v56 = vsub.f32 1.0, %v1544_v51  ;;  %v1701_v51 = vld [vmem:[%s4176_s9] sm:$0x8] }
 0xd10   : > { %v1531_v48 = vmul.f32 %v4006_v49, %v1530_v52  ;;  %v4479_v52 = vld [vmem:[%s4176_s9 + $0x8] sm:$0x8]  ;;  %v1703_v53 = vunpack.c.l.bf16 %v1701_v51 }
 0xd11   : > { %v1546_v61 = vmul.f32 %v4008_v26, %v1545_v56  ;;  %1772 = vmatpush.bf16.msrb.mxu3 %v3876_v47  ;;  %v1704_v56 = vunpack.c.l.bf16 %v4479_v52 }
 0xd12   : > { %v1532_v63 = vadd.f32 %v4006_v49, %v1531_v48 }
 0xd13   : > { %v1547_v0 = vadd.f32 %v4008_v26, %v1546_v61 }
 0xd14   : > { %v1536_v10 = vsel %vm1535_vm4, %v4006_v49, %v1532_v63 }
 0xd15   : > { %v1551_v12 = vsel %vm1550_vm7, %v4008_v26, %v1547_v0  ;;  %v1541_v14 = vsel %vm1538_vm8, %v1540_v4, %v1536_v10 }
 0xd16   : > { %v1556_v5 = vsel %vm1553_vm9, %v1555_v9, %v1551_v12  ;;  %v1591_v7 = vmul.f32 %v1587_v6, %v1541_v14  ;;  %v1605_v39 = vsub.f32 1.0, %v1541_v14 }
 0xd17   : > { %v1592_v15 = vmul.f32 %v1588_v1, %v1556_v5 }
 0xd18   : > { %1595 = vrot.lane.b32.xlu1 %v1591_v7, %s4100_s12 }
 0xd19   : > { %1597 = vrot.lane.b32.xlu0 %v1592_v15, %s4100_s12 }
 0xd21   : > { %1622 = vrot.lane.b32.xlu0 %v1619_v16, %s4102_s14 }
 0xd8a   : > { %v1596_v18 = vpop.permute.xlu1 %1595 }
 0xd8b   : > { %v1598_v19 = vpop.permute.xlu0 %1597  ;;  %v1601_v22 = vadd.f32 %v1596_v18, %v1511_v30  ;;  %v1606_v30 = vsub.f32 1.0, %v1556_v5 }
 0xd8c   : > { %v1602_v21 = vadd.f32 %v1598_v19, %v1512_v31 }
 0xd8d   : > { %4009 = vtanh.f32 %v1601_v22 }
 0xd8e   : > { %4011 = vtanh.f32 %v1602_v21 }
 0xd93   : > { %v4010_v23 = vpop.eup %4009  ;;  %v1623_v31 = vpop.permute.xlu0 %1622 }
 0xd94   : > { %v4012_v25 = vpop.eup %4011  ;;  %1609 = vrot.lane.b32.xlu1 %v4010_v23, %s4101_s13  ;;  %v1627_v35 = vmul.f32 %v1623_v31, %v1556_v5 }
 0xd95   : > { %1611 = vrot.lane.b32.xlu2 %v4012_v25, %s4101_s13 }
 0xd9d   : > { %1620 = vrot.lane.b32.xlu2 %v1618_v28, %s4102_s14 }
 0xdef   : > { %v1612_v32 = vpop.permute.xlu2 %1611 }
 0xdf0   : > { %v1616_v34 = vmul.f32 %v1612_v32, %v1606_v30 }
 0xdf2   : > { %v4455_v38 = vadd.f32 %v1627_v35, %v1616_v34 }
 0xdf4   : > { %v1657_v24 = vrot.slane %v4455_v38, 7 }
 0xdf7   : > { %v1621_v36 = vpop.permute.xlu2 %1620 }
 0xdf8   : > { %v1626_v41 = vmul.f32 %v1621_v36, %v1541_v14 }
 0xe06   : > { %v1610_v40 = vpop.permute.xlu1 %1609 }
 0xe07   : > { %v1615_v33 = vmul.f32 %v1610_v40, %v1605_v39 }
 0xe09   : > { %v4458_v43 = vadd.f32 %v1626_v41, %v1615_v33 }
 0xe0b   : > { %v1659_v44 = vsel %vm1658_vm11, %v1657_v24, %v4458_v43 }
 0xe0c   : > { %1660 = vrot.lane.b32.xlu0 %v1659_v44, %s4101_s13 }
 0xe7e   : > { %v1661_v49 = vpop.permute.xlu0 %1660 }
 0xe7f   : > { %1664 = vst.msk [vmem:[#allocation2 - $0x6] sm:$0xc0] %vm1663_vm12, %v1661_v49 }
 0xe86   : > { %v4471_v26 = vld [vmem:[#allocation2] sm:$0x3] }
 0xe87   : > { %v1671_v50 = vpack.c.bf16 %v4471_v26, %v4471_v26  ;;  %v1811_v45 = vrot.slane %v4471_v26, 2 }
 0xe89   : > { %3659 = vmatmul.msk.bf16.vlgmr.msrb.gmra.mxu2 %vm348_vm1, %v1671_v50  ;;  %3670 = vmatmul.msk.bf16.vlgmr.msrb.gmra.mxu3 %vm348_vm1, %v1671_v50 }
 0xf0c   : > { %v1697_v57 = vpop.f32.mrf.mxu2  ;;  %v1774_v58 = vpop.f32.mrf.mxu3 }
 0xf0d   : > { %v1706_v48 = vrot.slane %v1697_v57, 1  ;;  %v1707_v60 = vrot.slane %v1697_v57, 2  ;;  %v1775_v18 = vadd.f32 %v4441_v54, %v1774_v58  ;;  %v1810_v57 = vrot.slane %v4471_v26, 1  ;;  %v3859_v26 = vld [vmem:[%s4850_s1 + $0x8] sm:$0xff] }
 0xf0e   : > { %1888 = vmatpush.bf16.msra.mxu0 %v3859_v26 }
 0xf0f   : > { %v1710_v61 = vadd.f32 %v1706_v48, %v1703_v53  ;;  %v1711_v62 = vadd.f32 %v1707_v60, %v1704_v56  ;;  %v1779_v34 = vrot.slane %v1775_v18, 1  ;;  %v1780_v39 = vrot.slane %v1775_v18, 2  ;;  %v1895_v18 = vld [vmem:[%s4176_s9 + $0x4] sm:$0x1] }
 0xf11   : > { %v3660_v63 = vmul.f32 -1.442695, %v1710_v61  ;;  %v3661_v0 = vmul.f32 -1.442695, %v1711_v62 }
 0xf13   : > { %4013 = vpow2.f32 %v3660_v63 }
 0xf14   : > { %4015 = vpow2.f32 %v3661_v0  ;;  %v1699_v4 = vpop.f32.mrf.mxu2  ;;  %v1776_v6 = vpop.f32.mrf.mxu3 }
 0xf19   : > { %v4014_v9 = vpop.eup %4013 }
 0xf1a   : > { %v4016_v10 = vpop.eup %4015  ;;  %v1718_v1 = vadd.f32 1.0, %v4014_v9 }
 0xf1b   : > { %v1719_v12 = vadd.f32 1.0, %v4016_v10 }
 0xf1c   : > { %4017 = vrcp.f32 %v1718_v1  ;;  %v1731_v22 = vand.u32 2147483648, %v1718_v1  ;;  %v1729_v25 = vand.u32 2147483647, %v1718_v1  ;;  %vm1725_vm4 = vweird.f32 %v1718_v1 }
 0xf1d   : > { %4019 = vrcp.f32 %v1719_v12  ;;  %v1746_v21 = vand.u32 2147483648, %v1719_v12  ;;  %v1744_v29 = vand.u32 2147483647, %v1719_v12  ;;  %vm1740_vm7 = vweird.f32 %v1719_v12 }
 0xf1e   : > { %v1732_v31 = vor.u32 1.1754944e-38, %v1731_v22  ;;  %vm1730_vm11 = vcmp.eq.f32.partialorder %v1729_v25, 8.507059e+37  ;;  %v1897_v22 = vunpack.c.l.bf16 %v1895_v18 }
 0xf1f   : > { %v1747_v35 = vor.u32 1.1754944e-38, %v1746_v21  ;;  %vm1745_vm12 = vcmp.eq.f32.partialorder %v1744_v29, 8.507059e+37 }
 0xf22   : > { %v4018_v14 = vpop.eup %4017 }
 0xf23   : > { %v4020_v5 = vpop.eup %4019  ;;  %v1721_v7 = vmul.f32 %v4018_v14, %v1718_v1  ;;  %vm1726_vm13 = vweird.f32 %v4018_v14  ;;  %v3843_v1 = vld [vmem:[%s4850_s1] sm:$0xff] }
 0xf24   : > { %v1736_v15 = vmul.f32 %v4020_v5, %v1719_v12  ;;  %vm1741_vm14 = vweird.f32 %v4020_v5  ;;  %vm1727_vm8 = vmor %vm1725_vm4, %vm1726_vm13  ;;  %vm503_vm13 = vcmask 253952   ;;  %v3891_v12 = vld [vmem:[%s4851_s2 + $0x8] sm:$0xff]  ;;  %1889 = vmatpush.bf16.msra.mxu0 %v3843_v1 }
 0xf25   : > { %v1722_v16 = vsub.f32 1.0, %v1721_v7  ;;  %vm1742_vm9 = vmor %vm1740_vm7, %vm1741_vm14  ;;  %1964 = vmatpush.bf16.msra.mxu1 %v3891_v12  ;;  %vm4856_vm14 = vcmask 261127  }
 0xf26   : > { %v1737_v19 = vsub.f32 1.0, %v1736_v15 }
 0xf27   : > { %v1723_v23 = vmul.f32 %v4018_v14, %v1722_v16 }
 0xf28   : > { %v1738_v28 = vmul.f32 %v4020_v5, %v1737_v19  ;;  %v1896_v19 = vld [vmem:[%s4176_s9 + $0xc] sm:$0x1] }
 0xf29   : > { %v1724_v32 = vadd.f32 %v4018_v14, %v1723_v23  ;;  %v1898_v21 = vunpack.c.l.bf16 %v1896_v19 }
 0xf2a   : > { %v1739_v30 = vadd.f32 %v4020_v5, %v1738_v28 }
 0xf2b   : > { %v1728_v36 = vsel %vm1727_vm8, %v4018_v14, %v1724_v32 }
 0xf2c   : > { %v1743_v40 = vsel %vm1742_vm9, %v4020_v5, %v1739_v30  ;;  %v1733_v41 = vsel %vm1730_vm11, %v1732_v31, %v1728_v36  ;;  %v3875_v5 = vld [vmem:[%s4851_s2] sm:$0xff] }
 0xf2d   : > { %v1748_v33 = vsel %vm1745_vm12, %v1747_v35, %v1743_v40  ;;  %v1783_v24 = vmul.f32 %v1779_v34, %v1733_v41  ;;  %v1797_v4 = vsub.f32 1.0, %v1733_v41  ;;  %1965 = vmatpush.bf16.msra.mxu1 %v3875_v5 }
 0xf2e   : > { %v1784_v44 = vmul.f32 %v1780_v39, %v1748_v33  ;;  %v1798_v48 = vsub.f32 1.0, %v1748_v33 }
 0xf2f   : > { %1787 = vrot.lane.b32.xlu2 %v1783_v24, %s4100_s12 }
 0xf30   : > { %1789 = vrot.lane.b32.xlu1 %v1784_v44, %s4100_s12 }
 0xf38   : > { %1814 = vrot.lane.b32.xlu1 %v1811_v45, %s4102_s14 }
 0xf89   : > { %v1788_v46 = vpop.permute.xlu2 %1787 }
 0xf8a   : > { %v1793_v47 = vadd.f32 %v1788_v46, %v1703_v53 }
 0xf8c   : > { %4021 = vtanh.f32 %v1793_v47 }
 0xf92   : > { %v4022_v49 = vpop.eup %4021 }
 0xf93   : > { %1801 = vrot.lane.b32.xlu2 %v4022_v49, %s4101_s13 }
 0xfa2   : > { %v1790_v50 = vpop.permute.xlu1 %1789 }
 0xfa3   : > { %v1794_v51 = vadd.f32 %v1790_v50, %v1704_v56 }
 0xfa5   : > { %4023 = vtanh.f32 %v1794_v51 }
 0xfaa   : > { %v1815_v58 = vpop.permute.xlu1 %1814 }
 0xfab   : > { %v4024_v52 = vpop.eup %4023  ;;  %v1819_v61 = vmul.f32 %v1815_v58, %v1748_v33 }
 0xfac   : > { %1803 = vrot.lane.b32.xlu0 %v4024_v52, %s4101_s13 }
 0xfb4   : > { %1812 = vrot.lane.b32.xlu0 %v1810_v57, %s4102_s14 }
 0xfed   : > { %v1802_v0 = vpop.permute.xlu2 %1801 }
 0xfee   : > { %v1807_v6 = vmul.f32 %v1802_v0, %v1797_v4 }
0x101e   : > { %v1804_v60 = vpop.permute.xlu0 %1803 }
0x101f   : > { %v1808_v62 = vmul.f32 %v1804_v60, %v1798_v48 }
0x1021   : > { %v4491_v53 = vadd.f32 %v1819_v61, %v1808_v62 }
0x1023   : > { %v1849_v63 = vrot.slane %v4491_v53, 7 }
0x1025   : > { %1852 = vrot.lane.b32.xlu2 %v1849_v63, %s4101_s13 }
0x1026   : > { %v1813_v56 = vpop.permute.xlu0 %1812 }
0x1027   : > { %v1818_v9 = vmul.f32 %v1813_v56, %v1733_v41 }
0x1029   : > { %v4495_v10 = vadd.f32 %v1818_v9, %v1807_v6 }
0x102b   : > { %1850 = vrot.lane.b32.xlu1 %v4495_v10, %s4101_s13 }
0x107f   : > { %v1853_v14 = vpop.permute.xlu2 %1852 }
0x1080   : > { %1858 = vst.msk [vmem:[#allocation2 + $0x1] sm:$0x1] %vm503_vm13, %v1853_v14 }
0x109d   : > { %v1851_v7 = vpop.permute.xlu1 %1850 }
0x109e   : > { %1856 = vst.msk [vmem:[#allocation2 - $0x7] sm:$0x80] %vm4856_vm14, %v1851_v7 }
0x10a5   : > { %v4513_v15 = vld [vmem:[#allocation2] sm:$0x3] }
0x10a6   : > { %v1865_v16 = vpack.c.bf16 %v4513_v15, %v4513_v15  ;;  %v2002_v12 = vrot.slane %v4513_v15, 1 }
0x10a8   : > { %3679 = vmatmul.msk.bf16.vlgmr.msra.gmra.mxu0 %vm348_vm1, %v1865_v16  ;;  %3690 = vmatmul.msk.bf16.vlgmr.msra.gmra.mxu1 %vm348_vm1, %v1865_v16 }
0x1125   : > { %v1891_v23 = vpop.f32.mrf.mxu0  ;;  %v1967_v25 = vpop.f32.mrf.mxu1 }
0x1126   : > { %v1900_v28 = vrot.slane %v1891_v23, 1  ;;  %v1903_v29 = vadd.f32 %v1897_v22, %v1891_v23  ;;  %v1968_v52 = vadd.f32 %v4441_v54, %v1967_v25  ;;  %v3858_v23 = vld [vmem:[%s4850_s1 + $0x8] sm:$0xff] }
0x1127   : > { %2075 = vmatpush.bf16.msra.mxu2 %v3858_v23 }
0x1128   : > { %v1904_v32 = vadd.f32 %v1900_v28, %v1898_v21  ;;  %v3680_v30 = vmul.f32 -1.442695, %v1903_v29  ;;  %v1972_v56 = vrot.slane %v1968_v52, 1 }
0x112a   : > { %4025 = vpow2.f32 %v3680_v30  ;;  %v3681_v31 = vmul.f32 -1.442695, %v1904_v32 }
0x112c   : > { %4027 = vpow2.f32 %v3681_v31 }
0x112d   : > { %v1893_v34 = vpop.f32.mrf.mxu0  ;;  %v1969_v35 = vpop.f32.mrf.mxu1 }
0x1130   : > { %v4026_v36 = vpop.eup %4025 }
0x1131   : > { %v1911_v39 = vadd.f32 1.0, %v4026_v36 }
0x1132   : > { %v4028_v40 = vpop.eup %4027 }
0x1133   : > { %v1912_v41 = vadd.f32 1.0, %v4028_v40  ;;  %4029 = vrcp.f32 %v1911_v39  ;;  %v1924_v47 = vand.u32 2147483648, %v1911_v39  ;;  %v1922_v50 = vand.u32 2147483647, %v1911_v39 }
0x1134   : > { %vm1918_vm7 = vweird.f32 %v1911_v39 }
0x1135   : > { %4031 = vrcp.f32 %v1912_v41  ;;  %v1939_v57 = vand.u32 2147483648, %v1912_v41  ;;  %v1937_v60 = vand.u32 2147483647, %v1912_v41  ;;  %v1925_v61 = vor.u32 1.1754944e-38, %v1924_v47  ;;  %v4558_v47 = vld [vmem:[%s4176_s9 + $0xc] sm:$0x1] }
0x1136   : > { %vm1923_vm11 = vcmp.eq.f32.partialorder %v1922_v50, 8.507059e+37  ;;  %vm1933_vm12 = vweird.f32 %v1912_v41  ;;  %v2085_v50 = vunpack.c.l.bf16 %v4558_v47 }
0x1137   : > { %v1940_v4 = vor.u32 1.1754944e-38, %v1939_v57  ;;  %vm1938_vm15 = vcmp.eq.f32.partialorder %v1937_v60, 8.507059e+37 }
0x1139   : > { %v4030_v33 = vpop.eup %4029 }
0x113a   : > { %v1914_v24 = vmul.f32 %v4030_v33, %v1911_v39  ;;  %vm1919_vm4 = vweird.f32 %v4030_v33 }
0x113b   : > { %v4032_v44 = vpop.eup %4031  ;;  %vm1920_vm9 = vmor %vm1918_vm7, %vm1919_vm4 }
0x113c   : > { %v1915_v45 = vsub.f32 1.0, %v1914_v24  ;;  %v1929_v46 = vmul.f32 %v4032_v44, %v1912_v41  ;;  %vm1934_vm8 = vweird.f32 %v4032_v44  ;;  %v3842_v41 = vld [vmem:[%s4850_s1] sm:$0xff] }
0x113d   : > { %vm1935_vm14 = vmor %vm1933_vm12, %vm1934_vm8  ;;  %2076 = vmatpush.bf16.msra.mxu2 %v3842_v41  ;;  %v3874_v24 = vld [vmem:[%s4851_s2] sm:$0xff] }
0x113e   : > { %v1916_v49 = vmul.f32 %v4030_v33, %v1915_v45  ;;  %v1930_v51 = vsub.f32 1.0, %v1929_v46 }
0x1140   : > { %v1917_v58 = vadd.f32 %v4030_v33, %v1916_v49  ;;  %v1931_v48 = vmul.f32 %v4032_v44, %v1930_v51  ;;  %v2082_v49 = vld [vmem:[%s4176_s9 + $0x4] sm:$0x1] }
0x1141   : > { %v2084_v51 = vunpack.c.l.bf16 %v2082_v49 }
0x1142   : > { %v1921_v62 = vsel %vm1920_vm9, %v4030_v33, %v1917_v58  ;;  %v1932_v63 = vadd.f32 %v4032_v44, %v1931_v48  ;;  %v3890_v33 = vld [vmem:[%s4851_s2 + $0x8] sm:$0xff] }
0x1143   : > { %v1926_v0 = vsel %vm1923_vm11, %v1925_v61, %v1921_v62  ;;  %2151 = vmatpush.bf16.msra.mxu3 %v3890_v33 }
0x1144   : > { %v1975_v6 = vmul.f32 %v1968_v52, %v1926_v0  ;;  %v1936_v9 = vsel %vm1935_vm14, %v4032_v44, %v1932_v63  ;;  %v1989_v31 = vsub.f32 1.0, %v1926_v0 }
0x1145   : > { %v1941_v26 = vsel %vm1938_vm15, %v1940_v4, %v1936_v9 }
0x1146   : > { %1979 = vrot.lane.b32.xlu1 %v1975_v6, %s4100_s12  ;;  %v1976_v1 = vmul.f32 %v1972_v56, %v1941_v26 }
0x1147   : > { %2152 = vmatpush.bf16.msra.mxu3 %v3874_v24 }
0x1148   : > { %1981 = vrot.lane.b32.xlu0 %v1976_v1, %s4100_s12 }
0x1150   : > { %2005 = vrot.lane.b32.xlu0 %v2002_v12, %s4102_s14 }
0x11b8   : > { %v1980_v14 = vpop.permute.xlu1 %1979 }
0x11b9   : > { %v1985_v5 = vadd.f32 %v1980_v14, %v1897_v22  ;;  %v1990_v22 = vsub.f32 1.0, %v1941_v26 }
0x11ba   : > { %v1982_v7 = vpop.permute.xlu0 %1981 }
0x11bb   : > { %4033 = vtanh.f32 %v1985_v5  ;;  %v1986_v16 = vadd.f32 %v1982_v7, %v1898_v21 }
0x11bd   : > { %4035 = vtanh.f32 %v1986_v16 }
0x11c1   : > { %v4034_v18 = vpop.eup %4033 }
0x11c2   : > { %1993 = vrot.lane.b32.xlu1 %v4034_v18, %s4101_s13  ;;  %v2006_v28 = vpop.permute.xlu0 %2005 }
0x11c3   : > { %v4036_v19 = vpop.eup %4035  ;;  %v2010_v21 = vmul.f32 %v2006_v28, %v1941_v26 }
0x11c4   : > { %1995 = vrot.lane.b32.xlu2 %v4036_v19, %s4101_s13 }
0x11cc   : > { %2003 = vrot.lane.b32.xlu2 %v4513_v15, %s4102_s14 }
0x121e   : > { %v1996_v25 = vpop.permute.xlu2 %1995 }
0x121f   : > { %v2000_v29 = vmul.f32 %v1996_v25, %v1990_v22 }
0x1221   : > { %v4533_v30 = vadd.f32 %v2010_v21, %v2000_v29 }
0x1223   : > { %v2038_v39 = vrot.slane %v4533_v30, 7 }
0x1226   : > { %v2004_v32 = vpop.permute.xlu2 %2003 }
0x1227   : > { %v2009_v35 = vmul.f32 %v2004_v32, %v1926_v0 }
0x1234   : > { %v1994_v34 = vpop.permute.xlu1 %1993 }
0x1235   : > { %v1999_v36 = vmul.f32 %v1994_v34, %v1989_v31 }
0x1237   : > { %v4536_v15 = vadd.f32 %v2009_v35, %v1999_v36 }
0x1239   : > { %v2040_v40 = vsel %vm509_vm10, %v2038_v39, %v4536_v15 }
0x123a   : > { %2041 = vrot.lane.b32.xlu0 %v2040_v40, %s4101_s13 }
0x12ac   : > { %v2042_v44 = vpop.permute.xlu0 %2041 }
0x12ad   : > { %2045 = vst.msk [vmem:[#allocation2] sm:$0x3] %vm318_vm0, %v2042_v44 }
0x12b4   : > { %v4551_v45 = vld [vmem:[#allocation2] sm:$0x3] }
0x12b5   : > { %v2052_v46 = vpack.c.bf16 %v4551_v45, %v4551_v45 }
0x12b7   : > { %3699 = vmatmul.msk.bf16.vlgmr.msra.gmra.mxu2 %vm348_vm1, %v2052_v46  ;;  %3710 = vmatmul.msk.bf16.vlgmr.msra.gmra.mxu3 %vm348_vm1, %v2052_v46 }
0x133a   : > { %v2078_v52 = vpop.f32.mrf.mxu2  ;;  %v2154_v57 = vpop.f32.mrf.mxu3 }
0x133b   : > { %v2087_v58 = vrot.slane %v2078_v52, 7  ;;  %v2091_v48 = vadd.f32 %v2085_v50, %v2078_v52  ;;  %v2155_v23 = vadd.f32 %v4441_v54, %v2154_v57  ;;  %v2189_v57 = vrot.slane %v4551_v45, 7 }
0x133d   : > { %v2090_v60 = vadd.f32 %v2087_v58, %v2084_v51  ;;  %v3701_v61 = vmul.f32 -1.442695, %v2091_v48  ;;  %v2159_v36 = vrot.slane %v2155_v23, 7  ;;  %v3857_v58 = vld [vmem:[%s4850_s1 + $0x8] sm:$0xff] }
0x133e   : > { %2264 = vmatpush.bf16.msrb.mxu0 %v3857_v58 }
0x133f   : > { %v3700_v62 = vmul.f32 -1.442695, %v2090_v60  ;;  %4037 = vpow2.f32 %v3701_v61 }
0x1341   : > { %4039 = vpow2.f32 %v3700_v62 }
0x1342   : > { %v2080_v63 = vpop.f32.mrf.mxu2  ;;  %v2156_v0 = vpop.f32.mrf.mxu3 }
0x1345   : > { %v4038_v4 = vpop.eup %4037 }
0x1346   : > { %v2099_v56 = vadd.f32 1.0, %v4038_v4 }
0x1347   : > { %v4040_v6 = vpop.eup %4039 }
0x1348   : > { %v2098_v9 = vadd.f32 1.0, %v4040_v6  ;;  %4041 = vrcp.f32 %v2099_v56  ;;  %v2126_v7 = vand.u32 2147483648, %v2099_v56  ;;  %v2124_v18 = vand.u32 2147483647, %v2099_v56 }
0x1349   : > { %vm2120_vm10 = vweird.f32 %v2099_v56 }
0x134a   : > { %4043 = vrcp.f32 %v2098_v9  ;;  %v2111_v25 = vand.u32 2147483648, %v2098_v9  ;;  %v2109_v29 = vand.u32 2147483647, %v2098_v9  ;;  %v2127_v21 = vor.u32 1.1754944e-38, %v2126_v7 }
0x134b   : > { %vm2125_vm4 = vcmp.eq.f32.partialorder %v2124_v18, 8.507059e+37  ;;  %vm2105_vm7 = vweird.f32 %v2098_v9  ;;  %v4599_v18 = vld [vmem:[%s4176_s9 + $0x4] sm:$0x2] }
0x134c   : > { %v2112_v35 = vor.u32 1.1754944e-38, %v2111_v25  ;;  %vm2110_vm9 = vcmp.eq.f32.partialorder %v2109_v29, 8.507059e+37 }
0x134e   : > { %v4042_v26 = vpop.eup %4041 }
0x134f   : > { %v2116_v1 = vmul.f32 %v4042_v26, %v2099_v56  ;;  %vm2121_vm0 = vweird.f32 %v4042_v26 }
0x1350   : > { %v4044_v12 = vpop.eup %4043  ;;  %vm2122_vm14 = vmor %vm2120_vm10, %vm2121_vm0 }
0x1351   : > { %v2117_v14 = vsub.f32 1.0, %v2116_v1  ;;  %v2101_v5 = vmul.f32 %v4044_v12, %v2098_v9  ;;  %vm2106_vm15 = vweird.f32 %v4044_v12  ;;  %v3841_v1 = vld [vmem:[%s4850_s1] sm:$0xff] }
0x1352   : > { %vm2107_vm8 = vmor %vm2105_vm7, %vm2106_vm15  ;;  %2265 = vmatpush.bf16.msrb.mxu0 %v3841_v1 }
0x1353   : > { %v2118_v16 = vmul.f32 %v4042_v26, %v2117_v14  ;;  %v2102_v19 = vsub.f32 1.0, %v2101_v5  ;;  %v3873_v14 = vld [vmem:[%s4851_s2] sm:$0xff] }
0x1355   : > { %v2119_v22 = vadd.f32 %v4042_v26, %v2118_v16  ;;  %v2103_v28 = vmul.f32 %v4044_v12, %v2102_v19  ;;  %v2272_v19 = vld [vmem:[%s4176_s9 + $0xc] sm:$0x2] }
0x1356   : > { %v2274_v25 = vunpack.c.l.bf16 %v2272_v19 }
0x1357   : > { %v2123_v32 = vsel %vm2122_vm14, %v4042_v26, %v2119_v22  ;;  %v2104_v31 = vadd.f32 %v4044_v12, %v2103_v28 }
0x1358   : > { %v2128_v34 = vsel %vm2125_vm4, %v2127_v21, %v2123_v32  ;;  %vm1076_vm4 = vcmask 257027  }
0x1359   : > { %v2163_v39 = vmul.f32 %v2155_v23, %v2128_v34  ;;  %v2108_v40 = vsel %vm2107_vm8, %v4044_v12, %v2104_v31  ;;  %v2177_v48 = vsub.f32 1.0, %v2128_v34  ;;  %v3889_v12 = vld [vmem:[%s4851_s2 + $0x8] sm:$0xff]  ;;  %v2273_v23 = vunpack.c.l.bf16 %v4599_v18 }
0x135a   : > { %v2113_v41 = vsel %vm2110_vm9, %v2112_v35, %v2108_v40  ;;  %2341 = vmatpush.bf16.msrb.mxu1 %v3889_v12 }
0x135b   : > { %2168 = vrot.lane.b32.xlu1 %v2163_v39, %s4100_s12  ;;  %v2162_v33 = vmul.f32 %v2159_v36, %v2113_v41 }
0x135d   : > { %2166 = vrot.lane.b32.xlu2 %v2162_v33, %s4100_s12 }
0x135e   : > { %2342 = vmatpush.bf16.msrb.mxu1 %v3873_v14 }
0x1363   : > { %2192 = vrot.lane.b32.xlu1 %v4551_v45, %s4102_s14 }
0x13b7   : > { %v2167_v24 = vpop.permute.xlu2 %2166 }
0x13b8   : > { %v2172_v44 = vadd.f32 %v2167_v24, %v2084_v51 }
0x13ba   : > { %4045 = vtanh.f32 %v2172_v44 }
0x13c0   : > { %v4046_v46 = vpop.eup %4045 }
0x13c1   : > { %2180 = vrot.lane.b32.xlu2 %v4046_v46, %s4101_s13 }
0x13cd   : > { %v2169_v47 = vpop.permute.xlu1 %2168 }
0x13ce   : > { %v2173_v49 = vadd.f32 %v2169_v47, %v2085_v50  ;;  %v2176_v50 = vsub.f32 1.0, %v2113_v41 }
0x13d0   : > { %4047 = vtanh.f32 %v2173_v49 }
0x13d5   : > { %v2193_v60 = vpop.permute.xlu1 %2192 }
0x13d6   : > { %v4048_v52 = vpop.eup %4047  ;;  %v2197_v62 = vmul.f32 %v2193_v60, %v2128_v34 }
0x13d7   : > { %2182 = vrot.lane.b32.xlu0 %v4048_v52, %s4101_s13 }
0x13df   : > { %2190 = vrot.lane.b32.xlu0 %v2189_v57, %s4102_s14 }
0x141b   : > { %v2181_v63 = vpop.permute.xlu2 %2180 }
0x141c   : > { %v2186_v56 = vmul.f32 %v2181_v63, %v2176_v50 }
0x1449   : > { %v2183_v51 = vpop.permute.xlu0 %2182 }
0x144a   : > { %v2187_v61 = vmul.f32 %v2183_v51, %v2177_v48 }
0x144c   : > { %v4574_v0 = vadd.f32 %v2197_v62, %v2187_v61 }
0x144e   : > { %v2227_v45 = vrot.slane %v4574_v0, 7 }
0x1451   : > { %v2191_v4 = vpop.permute.xlu0 %2190 }
0x1452   : > { %v2196_v6 = vmul.f32 %v2191_v4, %v2113_v41 }
0x1454   : > { %v4577_v9 = vadd.f32 %v2196_v6, %v2186_v56 }
0x1456   : > { %v2229_v26 = vsel %vm698_vm5, %v2227_v45, %v4577_v9 }
0x1457   : > { %2230 = vrot.lane.b32.xlu1 %v2229_v26, %s4101_s13 }
0x14c9   : > { %v2231_v5 = vpop.permute.xlu1 %2230 }
0x14ca   : > { %2234 = vst.msk [vmem:[#allocation2 - $0x1] sm:$0x6] %vm703_vm6, %v2231_v5 }
0x14d1   : > { %v4592_v7 = vld [vmem:[#allocation2] sm:$0x3] }
0x14d2   : > { %v2241_v16 = vpack.c.bf16 %v4592_v7, %v4592_v7  ;;  %v2381_v19 = vrot.slane %v4592_v7, 7 }
0x14d4   : > { %3719 = vmatmul.msk.bf16.vlgmr.msrb.gmra.mxu0 %vm348_vm1, %v2241_v16  ;;  %3730 = vmatmul.msk.bf16.vlgmr.msrb.gmra.mxu1 %vm348_vm1, %v2241_v16 }
0x1551   : > { %v2267_v22 = vpop.f32.mrf.mxu0  ;;  %v2344_v28 = vpop.f32.mrf.mxu1 }
0x1552   : > { %v2276_v29 = vrot.slane %v2267_v22, 6  ;;  %v2277_v21 = vrot.slane %v2267_v22, 7  ;;  %v2345_v57 = vadd.f32 %v4441_v54, %v2344_v28 }
0x1554   : > { %v2280_v32 = vadd.f32 %v2276_v29, %v2273_v23  ;;  %v2281_v31 = vadd.f32 %v2277_v21, %v2274_v25  ;;  %v2349_v6 = vrot.slane %v2345_v57, 6  ;;  %v2350_v54 = vrot.slane %v2345_v57, 7 }
0x1555   : > { %v2380_v21 = vrot.slane %v4592_v7, 6  ;;  %v670_v7 = vld [vmem:[%s4619_s15 + $0x1] sm:$0x1] }
0x1556   : > { %v3720_v34 = vmul.f32 -1.442695, %v2280_v32  ;;  %v3721_v35 = vmul.f32 -1.442695, %v2281_v31 }
0x1558   : > { %4049 = vpow2.f32 %v3720_v34  ;;  %v674_v34 = vrot.slane %v670_v7, 7 }
0x1559   : > { %4051 = vpow2.f32 %v3721_v35  ;;  %v2269_v36 = vpop.f32.mrf.mxu0  ;;  %v2346_v39 = vpop.f32.mrf.mxu1 }
0x155a   : > { %v483_v36 = vld [vmem:[%s4619_s15] sm:$0x1] }
0x155e   : > { %v4050_v40 = vpop.eup %4049 }
0x155f   : > { %v4052_v41 = vpop.eup %4051  ;;  %v2288_v33 = vadd.f32 1.0, %v4050_v40 }
0x1560   : > { %v2289_v24 = vadd.f32 1.0, %v4052_v41 }
0x1561   : > { %4053 = vrcp.f32 %v2288_v33  ;;  %v2301_v51 = vand.u32 2147483648, %v2288_v33  ;;  %v2299_v61 = vand.u32 2147483647, %v2288_v33  ;;  %vm2295_vm11 = vweird.f32 %v2288_v33 }
0x1562   : > { %4055 = vrcp.f32 %v2289_v24  ;;  %v2316_v48 = vand.u32 2147483648, %v2289_v24  ;;  %v2314_v63 = vand.u32 2147483647, %v2289_v24  ;;  %vm2310_vm12 = vweird.f32 %v2289_v24 }
0x1563   : > { %v2302_v56 = vor.u32 1.1754944e-38, %v2301_v51  ;;  %vm2300_vm15 = vcmp.eq.f32.partialorder %v2299_v61, 8.507059e+37  ;;  %v863_v61 = vld [vmem:[%s4619_s15 + $0x12] sm:$0x1] }
0x1564   : > { %v2317_v45 = vor.u32 1.1754944e-38, %v2316_v48  ;;  %vm2315_vm14 = vcmp.eq.f32.partialorder %v2314_v63, 8.507059e+37  ;;  %v867_v63 = vrot.slane %v863_v61, 6 }
0x1567   : > { %v4054_v44 = vpop.eup %4053 }
0x1568   : > { %v4056_v46 = vpop.eup %4055  ;;  %v2291_v47 = vmul.f32 %v4054_v44, %v2288_v33  ;;  %vm2296_vm5 = vweird.f32 %v4054_v44 }
0x1569   : > { %v2306_v49 = vmul.f32 %v4056_v46, %v2289_v24  ;;  %vm2311_vm6 = vweird.f32 %v4056_v46  ;;  %vm2297_vm0 = vmor %vm2295_vm11, %vm2296_vm5 }
0x156a   : > { %v2292_v52 = vsub.f32 1.0, %v2291_v47  ;;  %vm2312_vm10 = vmor %vm2310_vm12, %vm2311_vm6 }
0x156b   : > { %v2307_v58 = vsub.f32 1.0, %v2306_v49 }
0x156c   : > { %v2293_v60 = vmul.f32 %v4054_v44, %v2292_v52 }
0x156d   : > { %v2308_v62 = vmul.f32 %v4056_v46, %v2307_v58 }
0x156e   : > { %v2294_v50 = vadd.f32 %v4054_v44, %v2293_v60 }
0x156f   : > { %v2309_v4 = vadd.f32 %v4056_v46, %v2308_v62  ;;  %v3856_v62 = vld [vmem:[%s4850_s1 + $0x8] sm:$0xff] }
0x1570   : > { %v2298_v26 = vsel %vm2297_vm0, %v4054_v44, %v2294_v50  ;;  %2456 = vmatpush.bf16.msrb.mxu2 %v3856_v62 }
0x1571   : > { %v2313_v1 = vsel %vm2312_vm10, %v4056_v46, %v2309_v4  ;;  %v2303_v12 = vsel %vm2300_vm15, %v2302_v56, %v2298_v26  ;;  %v1055_v4 = vld [vmem:[%s4619_s15 + $0x13] sm:$0x1]  ;;  %v671_v56 = vld [vmem:[%s4619_s15 + $0x11] sm:$0x1]  ;;  %v1246_v26 = vld [vmem:[%s4619_s15 + $0x4] sm:$0x1] }
0x1572   : > { %v2318_v14 = vsel %vm2315_vm14, %v2317_v45, %v2313_v1  ;;  %v2353_v5 = vmul.f32 %v2349_v6, %v2303_v12  ;;  %v2367_v47 = vsub.f32 1.0, %v2303_v12  ;;  %v1059_v6 = vrot.slane %v1055_v4, 5 }
0x1573   : > { %v2354_v16 = vmul.f32 %v2350_v54, %v2318_v14  ;;  %v2368_v41 = vsub.f32 1.0, %v2318_v14  ;;  %v675_v45 = vrot.slane %v671_v56, 7  ;;  %v862_v54 = vld [vmem:[%s4619_s15 + $0x2] sm:$0x1]  ;;  %v1250_v1 = vrot.slane %v1246_v26, 4 }
0x1574   : > { %2357 = vrot.lane.b32.xlu0 %v2353_v5, %s4100_s12  ;;  %v3840_v5 = vld [vmem:[%s4850_s1] sm:$0xff]  ;;  %vm1460_vm10 = vcmask 259077   ;;  %vm1652_vm15 = vcmask 260102   ;;  %vm4859_vm14 = vcmask 261127  }
0x1575   : > { %2359 = vrot.lane.b32.xlu2 %v2354_v16, %s4100_s12  ;;  %v3888_v16 = vld [vmem:[%s4851_s2 + $0x8] sm:$0xff]  ;;  %2457 = vmatpush.bf16.msrb.mxu2 %v3840_v5 }
0x1576   : > { %2533 = vmatpush.bf16.msrb.mxu3 %v3888_v16 }
0x157d   : > { %2384 = vrot.lane.b32.xlu2 %v2381_v19, %s4102_s14  ;;  %v3872_v19 = vld [vmem:[%s4851_s2] sm:$0xff] }
0x157e   : > { %2534 = vmatpush.bf16.msrb.mxu3 %v3872_v19 }
0x15cf   : > { %v2360_v22 = vpop.permute.xlu2 %2359 }
0x15d0   : > { %v2364_v28 = vadd.f32 %v2360_v22, %v2274_v25  ;;  %v484_v25 = vld [vmem:[%s4619_s15 + $0x10] sm:$0x1] }
0x15d2   : > { %4057 = vtanh.f32 %v2364_v28 }
0x15d7   : > { %v2385_v24 = vpop.permute.xlu2 %2384 }
0x15d8   : > { %v4058_v29 = vpop.eup %4057  ;;  %v2389_v44 = vmul.f32 %v2385_v24, %v2318_v14 }
0x15d9   : > { %2373 = vrot.lane.b32.xlu1 %v4058_v29, %s4101_s13 }
0x15e1   : > { %2382 = vrot.lane.b32.xlu1 %v2380_v21, %s4102_s14 }
0x15e6   : > { %v2358_v32 = vpop.permute.xlu0 %2357 }
0x15e7   : > { %v2363_v31 = vadd.f32 %v2358_v32, %v2273_v23 }
0x15e9   : > { %4059 = vtanh.f32 %v2363_v31  ;;  %489 = vrot.lane.b32.xlu1 %v484_v25, %s4102_s14 }
0x15ef   : > { %v4060_v35 = vpop.eup %4059 }
0x15f0   : > { %2371 = vrot.lane.b32.xlu0 %v4060_v35, %s4101_s13 }
0x15f1   : > { %676 = vrot.lane.b32.xlu1 %v674_v34, %s4102_s14 }
0x15f8   : > { %487 = vrot.lane.b32.xlu0 %v483_v36, %s4102_s14 }
0x164b   : > { %v2374_v39 = vpop.permute.xlu1 %2373 }
0x164c   : > { %v2378_v23 = vmul.f32 %v2374_v39, %v2368_v41 }
0x164e   : > { %v4632_v46 = vadd.f32 %v2389_v44, %v2378_v23 }
0x1650   : > { %v2419_v48 = vrot.slane %v4632_v46, 7 }
0x1653   : > { %v2383_v40 = vpop.permute.xlu1 %2382 }
0x1654   : > { %v2388_v52 = vmul.f32 %v2383_v40, %v2303_v12  ;;  %v866_v12 = vrot.slane %v862_v54, 6 }
0x165b   : > { %v490_v33 = vpop.permute.xlu1 %489 }
0x165c   : > { %v494_v18 = vadd.f32 %v490_v33, %v4197_v2 }
0x165e   : > { %499 = vrot.lane.b32.xlu0 %v494_v18, %s4101_s13 }
0x1662   : > { %v2372_v49 = vpop.permute.xlu0 %2371 }
0x1663   : > { %v677_v57 = vpop.permute.xlu1 %676  ;;  %v2377_v58 = vmul.f32 %v2372_v49, %v2367_v47  ;;  %v4707_v47 = vld [vmem:[%s4176_s9 + $0x4] sm:$0x2]  ;;  %v4710_v49 = vld [vmem:[%s4176_s9 + $0xc] sm:$0x2] }
0x1664   : > { %v682_v51 = vadd.f32 %v677_v57, %v4244_v13  ;;  %v2465_v57 = vunpack.c.l.bf16 %v4707_v47  ;;  %v2392_v47 = vld [vmem:[%s4619_s15 + $0xa] sm:$0x1] }
0x1665   : > { %v4636_v60 = vadd.f32 %v2388_v52, %v2377_v58  ;;  %v2466_v58 = vunpack.c.l.bf16 %v4710_v49  ;;  %v2393_v49 = vld [vmem:[%s4619_s15 + $0x1a] sm:$0x1] }
0x1666   : > { %686 = vrot.lane.b32.xlu0 %v682_v51, %s4101_s13 }
0x1667   : > { %v2421_v2 = vsel %vm890_vm2, %v2419_v48, %v4636_v60  ;;  %vm692_vm2 = vcmask 254977  }
0x1668   : > { %2422 = vrot.lane.b32.xlu2 %v2421_v2, %s4101_s13 }
0x166a   : > { %v488_v13 = vpop.permute.xlu0 %487 }
0x166b   : > { %v493_v50 = vadd.f32 %v488_v13, %v4199_v3  ;;  %v1054_v3 = vld [vmem:[%s4619_s15 + $0x3] sm:$0x1] }
0x166c   : > { %v1058_v14 = vrot.slane %v1054_v3, 5 }
0x166e   : > { %870 = vrot.lane.b32.xlu0 %v867_v63, %s4102_s14 }
0x1670   : > { %497 = vrot.lane.b32.xlu2 %v493_v50, %s4101_s13 }
0x1676   : > { %1062 = vrot.lane.b32.xlu0 %v1059_v6, %s4102_s14 }
0x1678   : > { %678 = vrot.lane.b32.xlu2 %v675_v45, %s4102_s14 }
0x167e   : > { %1252 = vrot.lane.b32.xlu0 %v1250_v1, %s4102_s14 }
0x1680   : > { %868 = vrot.lane.b32.xlu2 %v866_v12, %s4102_s14 }
0x1688   : > { %1060 = vrot.lane.b32.xlu2 %v1058_v14, %s4102_s14 }
0x16c2   : > { %v2423_v22 = vpop.permute.xlu2 %2422 }
0x16c3   : > { %2426 = vst.msk [vmem:[#allocation2 - $0x2] sm:$0xc] %vm895_vm3, %v2423_v22  ;;  %vm884_vm3 = vcmask 256002   ;;  %v4074_v22 = vld [vmem:[%s4852_s3] ss:$0 sm:$0xff] }
0x16ca   : > { %v498_v28 = vpop.permute.xlu2 %497  ;;  %v4676_v29 = vld [vmem:[#allocation2] sm:$0x3] }
0x16cb   : > { %504 = vst.msk [vmem:[%s4674_s29] sm:$0x1] %vm503_vm13, %v498_v28  ;;  %v2433_v21 = vpack.c.bf16 %v4676_v29, %v4676_v29 }
0x16cd   : > { %3739 = vmatmul.msk.bf16.vlgmr.msrb.gmra.mxu2 %vm348_vm1, %v2433_v21  ;;  %3750 = vmatmul.msk.bf16.vlgmr.msrb.gmra.mxu3 %vm348_vm1, %v2433_v21  ;;  %vm1268_vm1 = vcmask 258052  }
0x16d0   : > { %v500_v32 = vpop.permute.xlu0 %499 }
0x16d1   : > { %505 = vst.msk [vmem:[%s4674_s29 + $0x10] sm:$0x1] %vm503_vm13, %v500_v32 }
0x16d2   : > { %v679_v25 = vpop.permute.xlu2 %678 }
0x16d3   : > { %v683_v31 = vadd.f32 %v679_v25, %v4241_v8 }
0x16d5   : > { %688 = vrot.lane.b32.xlu1 %v683_v31, %s4101_s13 }
0x16d8   : > { %v687_v7 = vpop.permute.xlu0 %686 }
0x16d9   : > { %693 = vst.msk [vmem:[%s4674_s29] sm:$0x2] %vm692_vm2, %v687_v7 }
0x16da   : > { %v869_v34 = vpop.permute.xlu2 %868 }
0x16db   : > { %v874_v35 = vadd.f32 %v869_v34, %v4289_v27  ;;  %v1247_v27 = vld [vmem:[%s4619_s15 + $0x14] sm:$0x1] }
0x16dc   : > { %v1251_v18 = vrot.slane %v1247_v27, 4 }
0x16dd   : > { %878 = vrot.lane.b32.xlu1 %v874_v35, %s4101_s13 }
0x16e0   : > { %v871_v36 = vpop.permute.xlu0 %870 }
0x16e1   : > { %v875_v39 = vadd.f32 %v871_v36, %v4286_v20 }
0x16e2   : > { %v1061_v40 = vpop.permute.xlu2 %1060 }
0x16e3   : > { %v1066_v33 = vadd.f32 %v1061_v40, %v4327_v42 }
0x16e5   : > { %880 = vrot.lane.b32.xlu1 %v875_v39, %s4101_s13 }
0x16e8   : > { %v1063_v8 = vpop.permute.xlu0 %1062 }
0x16e9   : > { %v1067_v41 = vadd.f32 %v1063_v8, %v4324_v37  ;;  %v1438_v37 = vld [vmem:[%s4619_s15 + $0x5] sm:$0x1] }
0x16ea   : > { %v1442_v23 = vrot.slane %v1438_v37, 3 }
0x16eb   : > { %1072 = vrot.lane.b32.xlu2 %v1067_v41, %s4101_s13 }
0x16ed   : > { %1070 = vrot.lane.b32.xlu1 %v1066_v33, %s4101_s13 }
0x16f0   : > { %v1253_v24 = vpop.permute.xlu0 %1252 }
0x16f1   : > { %v1258_v20 = vadd.f32 %v1253_v24, %v4368_v59 }
0x16f3   : > { %1262 = vrot.lane.b32.xlu2 %v1258_v20, %s4101_s13 }
0x16f5   : > { %1254 = vrot.lane.b32.xlu1 %v1251_v18, %s4102_s14 }
0x16fd   : > { %1444 = vrot.lane.b32.xlu1 %v1442_v23, %s4102_s14 }
0x1745   : > { %v1073_v42 = vpop.permute.xlu2 %1072 }
0x1746   : > { %1078 = vst.msk [vmem:[%s4674_s29 + $0x10] sm:$0x8] %vm1076_vm4, %v1073_v42  ;;  %v1439_v42 = vld [vmem:[%s4619_s15 + $0x15] sm:$0x1] }
0x1747   : > { %v689_v44 = vpop.permute.xlu1 %688 }
0x1748   : > { %694 = vst.msk [vmem:[%s4674_s29 + $0x10] sm:$0x2] %vm692_vm2, %v689_v44 }
0x174d   : > { %v1263_v59 = vpop.permute.xlu2 %1262 }
0x174e   : > { %1269 = vst.msk [vmem:[%s4674_s29] sm:$0x10] %vm1268_vm1, %v1263_v59  ;;  %v1443_v59 = vrot.slane %v1439_v42, 3 }
0x174f   : > { %v879_v52 = vpop.permute.xlu1 %878 }
0x1750   : > { %885 = vst.msk [vmem:[%s4674_s29] sm:$0x4] %vm884_vm3, %v879_v52  ;;  %v2459_v51 = vpop.f32.mrf.mxu2  ;;  %v2536_v48 = vpop.f32.mrf.mxu3 }
0x1751   : > { %v2468_v2 = vrot.slane %v2459_v51, 5  ;;  %v2469_v61 = vrot.slane %v2459_v51, 6  ;;  %v2537_v28 = vadd.f32 %v4074_v22, %v2536_v48  ;;  %v1630_v51 = vld [vmem:[%s4619_s15 + $0x6] sm:$0x1] }
0x1753   : > { %v2472_v62 = vadd.f32 %v2468_v2, %v2465_v57  ;;  %v2473_v63 = vadd.f32 %v2469_v61, %v2466_v58  ;;  %v2541_v8 = vrot.slane %v2537_v28, 5  ;;  %v2542_v27 = vrot.slane %v2537_v28, 6 }
0x1754   : > { %v1634_v2 = vrot.slane %v1630_v51, 2 }
0x1755   : > { %v3740_v13 = vmul.f32 -1.442695, %v2472_v62  ;;  %v3741_v50 = vmul.f32 -1.442695, %v2473_v63  ;;  %v2572_v62 = vrot.slane %v4676_v29, 5 }
0x1756   : > { %v2200_v63 = vld [vmem:[%s4619_s15 + $0x9] sm:$0x1] }
0x1757   : > { %4061 = vpow2.f32 %v3740_v13  ;;  %v881_v4 = vpop.permute.xlu1 %880  ;;  %v2204_v13 = vrot.slane %v2200_v63, 7 }
0x1758   : > { %4063 = vpow2.f32 %v3741_v50  ;;  %886 = vst.msk [vmem:[%s4674_s29 + $0x10] sm:$0x4] %vm884_vm3, %v881_v4  ;;  %v2461_v56 = vpop.f32.mrf.mxu2  ;;  %v2538_v6 = vpop.f32.mrf.mxu3  ;;  %v2013_v50 = vld [vmem:[%s4619_s15 + $0x8] sm:$0x1]  ;;  %v1631_v4 = vld [vmem:[%s4619_s15 + $0x16] sm:$0x1] }
0x1759   : > { %v1635_v6 = vrot.slane %v1631_v4, 2 }
0x175d   : > { %v4062_v45 = vpop.eup %4061 }
0x175e   : > { %v4064_v26 = vpop.eup %4063  ;;  %v2480_v54 = vadd.f32 1.0, %v4062_v45  ;;  %v2585_v45 = vld [vmem:[%s4619_s15 + $0x1b] sm:$0x1] }
0x175f   : > { %v2481_v1 = vadd.f32 1.0, %v4064_v26  ;;  %v1071_v12 = vpop.permute.xlu1 %1070  ;;  %v2589_v26 = vrot.slane %v2585_v45, 5 }
0x1760   : > { %4065 = vrcp.f32 %v2480_v54  ;;  %1077 = vst.msk [vmem:[%s4674_s29] sm:$0x8] %vm1076_vm4, %v1071_v12  ;;  %v2493_v32 = vand.u32 2147483648, %v2480_v54  ;;  %v2491_v7 = vand.u32 2147483647, %v2480_v54  ;;  %vm2487_vm9 = vweird.f32 %v2480_v54 }
0x1761   : > { %4067 = vrcp.f32 %v2481_v1  ;;  %v2508_v25 = vand.u32 2147483648, %v2481_v1  ;;  %v2506_v35 = vand.u32 2147483647, %v2481_v1  ;;  %vm2502_vm5 = vweird.f32 %v2481_v1 }
0x1762   : > { %v2494_v40 = vor.u32 1.1754944e-38, %v2493_v32  ;;  %vm2492_vm12 = vcmp.eq.f32.partialorder %v2491_v7, 8.507059e+37 }
0x1763   : > { %v2509_v41 = vor.u32 1.1754944e-38, %v2508_v25  ;;  %vm2507_vm0 = vcmp.eq.f32.partialorder %v2506_v35, 8.507059e+37  ;;  %v1823_v25 = vld [vmem:[%s4619_s15 + $0x17] sm:$0x1] }
0x1766   : > { %v4066_v3 = vpop.eup %4065 }
0x1767   : > { %v4068_v14 = vpop.eup %4067  ;;  %v2483_v5 = vmul.f32 %v4066_v3, %v2480_v54  ;;  %vm2488_vm7 = vweird.f32 %v4066_v3  ;;  %v1255_v44 = vpop.permute.xlu1 %1254 }
0x1768   : > { %v2498_v16 = vmul.f32 %v4068_v14, %v2481_v1  ;;  %vm2503_vm8 = vweird.f32 %v4068_v14  ;;  %vm2489_vm6 = vmor %vm2487_vm9, %vm2488_vm7  ;;  %v1259_v52 = vadd.f32 %v1255_v44, %v4365_v55  ;;  %v2573_v55 = vrot.slane %v4676_v29, 6  ;;  %v2014_v29 = vld [vmem:[%s4619_s15 + $0x18] sm:$0x1] }
0x1769   : > { %v2484_v19 = vsub.f32 1.0, %v2483_v5  ;;  %vm2504_vm11 = vmor %vm2502_vm5, %vm2503_vm8  ;;  %v2201_v5 = vld [vmem:[%s4619_s15 + $0x19] sm:$0x1]  ;;  %vm4861_vm7 = vcmask 258051  }
0x176a   : > { %v2499_v21 = vsub.f32 1.0, %v2498_v16  ;;  %v1822_v16 = vld [vmem:[%s4619_s15 + $0x7] sm:$0x1] }
0x176b   : > { %v2485_v31 = vmul.f32 %v4066_v3, %v2484_v19  ;;  %v2205_v19 = vrot.slane %v2201_v5, 7  ;;  %v1826_v22 = vrot.slane %v1822_v16, 1 }
0x176c   : > { %v2500_v34 = vmul.f32 %v4068_v14, %v2499_v21 }
0x176d   : > { %v2486_v36 = vadd.f32 %v4066_v3, %v2485_v31  ;;  %v1827_v31 = vrot.slane %v1823_v25, 1 }
0x176e   : > { %v2501_v39 = vadd.f32 %v4068_v14, %v2500_v34 }
0x176f   : > { %v2490_v33 = vsel %vm2489_vm6, %v4066_v3, %v2486_v36  ;;  %v1445_v48 = vpop.permute.xlu1 %1444 }
0x1770   : > { %v2505_v24 = vsel %vm2504_vm11, %v4068_v14, %v2501_v39  ;;  %v4731_v20 = vsel %vm2492_vm12, %v2494_v40, %v2490_v33  ;;  %v1450_v61 = vadd.f32 %v1445_v48, %v4411_v17  ;;  %v2584_v17 = vld [vmem:[%s4619_s15 + $0xb] sm:$0x1] }
0x1771   : > { %v4733_v18 = vsel %vm2507_vm0, %v2509_v41, %v2505_v24  ;;  %v2545_v37 = vmul.f32 %v2541_v8, %v4731_v20  ;;  %v2588_v56 = vrot.slane %v2584_v17, 5  ;;  %v2559_v42 = vsub.f32 1.0, %v4731_v20 }
0x1772   : > { %v2546_v23 = vmul.f32 %v2542_v27, %v4733_v18 }
0x1773   : > { %2549 = vrot.lane.b32.xlu2 %v2545_v37, %s4100_s12 }
0x1774   : > { %2551 = vrot.lane.b32.xlu0 %v2546_v23, %s4100_s12 }
0x177b   : > { %1446 = vrot.lane.b32.xlu2 %v1443_v59, %s4102_s14 }
0x177c   : > { %1264 = vrot.lane.b32.xlu0 %v1259_v52, %s4101_s13 }
0x1783   : > { %1636 = vrot.lane.b32.xlu2 %v1634_v2, %s4102_s14 }
0x1784   : > { %1454 = vrot.lane.b32.xlu0 %v1450_v61, %s4101_s13 }
0x178b   : > { %2574 = vrot.lane.b32.xlu2 %v2572_v62, %s4102_s14 }
0x178c   : > { %2576 = vrot.lane.b32.xlu0 %v2573_v55, %s4102_s14 }
0x1793   : > { %2017 = vrot.lane.b32.xlu2 %v2013_v50, %s4102_s14 }
0x1794   : > { %2206 = vrot.lane.b32.xlu0 %v2204_v13, %s4102_s14 }
0x179b   : > { %2590 = vrot.lane.b32.xlu2 %v2588_v56, %s4102_s14 }
0x179c   : > { %1638 = vrot.lane.b32.xlu0 %v1635_v6, %s4102_s14 }
0x17a3   : > { %2019 = vrot.lane.b32.xlu2 %v2014_v29, %s4102_s14 }
0x17ab   : > { %2592 = vrot.lane.b32.xlu2 %v2589_v26, %s4102_s14 }
0x17cd   : > { %v2550_v54 = vpop.permute.xlu2 %2549 }
0x17ce   : > { %v2555_v1 = vadd.f32 %v2550_v54, %v2465_v57  ;;  %v2396_v57 = vrot.slane %v2392_v47, 6 }
0x17d0   : > { %4069 = vtanh.f32 %v2555_v1 }
0x17d5   : > { %v1447_v12 = vpop.permute.xlu2 %1446 }
0x17d6   : > { %v4070_v3 = vpop.eup %4069  ;;  %v1451_v14 = vadd.f32 %v1447_v12, %v4408_v11 }
0x17d7   : > { %2563 = vrot.lane.b32.xlu0 %v4070_v3, %s4101_s13 }
0x17d8   : > { %1456 = vrot.lane.b32.xlu1 %v1451_v14, %s4101_s13 }
0x17dd   : > { %v1637_v28 = vpop.permute.xlu2 %1636 }
0x17de   : > { %v1642_v21 = vadd.f32 %v1637_v28, %v4458_v43 }
0x17df   : > { %2208 = vrot.lane.b32.xlu0 %v2205_v19, %s4102_s14 }
0x17e0   : > { %1828 = vrot.lane.b32.xlu1 %v1826_v22, %s4102_s14 }
0x17e5   : > { %v2575_v11 = vpop.permute.xlu2 %2574 }
0x17e6   : > { %v2552_v32 = vpop.permute.xlu0 %2551  ;;  %v2580_v44 = vmul.f32 %v2575_v11, %v4731_v20 }
0x17e7   : > { %1646 = vrot.lane.b32.xlu0 %v1642_v21, %s4101_s13  ;;  %v2556_v7 = vadd.f32 %v2552_v32, %v2466_v58  ;;  %v2397_v58 = vrot.slane %v2393_v49, 6 }
0x17e8   : > { %2398 = vrot.lane.b32.xlu1 %v2396_v57, %s4102_s14 }
0x17e9   : > { %4071 = vtanh.f32 %v2556_v7 }
0x17ed   : > { %v2018_v34 = vpop.permute.xlu2 %2017 }
0x17ee   : > { %v1265_v35 = vpop.permute.xlu0 %1264  ;;  %v2023_v36 = vadd.f32 %v2018_v34, %v4536_v15 }
0x17ef   : > { %1270 = vst.msk [vmem:[%s4674_s29 + $0x10] sm:$0x10] %vm1268_vm1, %v1265_v35  ;;  %v4072_v40 = vpop.eup %4071  ;;  %vm4860_vm1 = vmmov %vm4859_vm14 }
0x17f0   : > { %1830 = vrot.lane.b32.xlu1 %v1827_v31, %s4102_s14  ;;  %2027 = vrot.lane.b32.xlu2 %v2023_v36, %s4101_s13 }
0x17f5   : > { %v2591_v43 = vpop.permute.xlu2 %2590 }
0x17f6   : > { %v1455_v39 = vpop.permute.xlu0 %1454 }
0x17f7   : > { %1461 = vst.msk [vmem:[%s4674_s29] sm:$0x20] %vm1460_vm10, %v1455_v39 }
0x17f8   : > { %2565 = vrot.lane.b32.xlu1 %v4072_v40, %s4101_s13 }
0x17fd   : > { %v2020_v8 = vpop.permute.xlu2 %2019 }
0x17fe   : > { %v2577_v41 = vpop.permute.xlu0 %2576  ;;  %v2024_v15 = vadd.f32 %v2020_v8, %v4533_v30 }
0x17ff   : > { %v2581_v4 = vmul.f32 %v2577_v41, %v4733_v18 }
0x1800   : > { %2400 = vrot.lane.b32.xlu1 %v2397_v58, %s4102_s14  ;;  %2029 = vrot.lane.b32.xlu2 %v2024_v15, %s4101_s13 }
0x1805   : > { %v2593_v23 = vpop.permute.xlu2 %2592 }
0x1806   : > { %v2207_v33 = vpop.permute.xlu0 %2206 }
0x1807   : > { %v2212_v27 = vadd.f32 %v2207_v33, %v4577_v9 }
0x1809   : > { %2216 = vrot.lane.b32.xlu0 %v2212_v27, %s4101_s13 }
0x180e   : > { %v1639_v24 = vpop.permute.xlu0 %1638 }
0x180f   : > { %v1643_v37 = vadd.f32 %v1639_v24, %v4455_v38 }
0x1811   : > { %1648 = vrot.lane.b32.xlu0 %v1643_v37, %s4101_s13 }
0x1849   : > { %v2564_v30 = vpop.permute.xlu0 %2563 }
0x184a   : > { %v2569_v59 = vmul.f32 %v2564_v30, %v2559_v42  ;;  %v1457_v52 = vpop.permute.xlu1 %1456  ;;  %v2028_v51 = vpop.permute.xlu2 %2027 }
0x184b   : > { %1462 = vst.msk [vmem:[%s4674_s29 + $0x10] sm:$0x20] %vm1460_vm10, %v1457_v52 }
0x184c   : > { %v2582_v9 = vadd.f32 %v2580_v44, %v2569_v59  ;;  %2034 = vst.msk [vmem:[%s4674_s29 + $0x8] sm:$0x1] %vm503_vm13, %v2028_v51 }
0x184e   : > { %v2596_v48 = vadd.f32 %v2591_v43, %v2582_v9 }
0x1850   : > { %2600 = vrot.lane.b32.xlu2 %v2596_v48, %s4101_s13 }
0x1851   : > { %v2209_v38 = vpop.permute.xlu0 %2208 }
0x1852   : > { %v2213_v2 = vadd.f32 %v2209_v38, %v4574_v0  ;;  %v1829_v61 = vpop.permute.xlu1 %1828 }
0x1853   : > { %v1834_v62 = vadd.f32 %v1829_v61, %v4495_v10  ;;  %v2560_v10 = vsub.f32 1.0, %v4733_v18 }
0x1854   : > { %2218 = vrot.lane.b32.xlu0 %v2213_v2, %s4101_s13 }
0x1855   : > { %1838 = vrot.lane.b32.xlu1 %v1834_v62, %s4101_s13 }
0x1859   : > { %v1647_v20 = vpop.permute.xlu0 %1646 }
0x185a   : > { %1653 = vst.msk [vmem:[%s4674_s29] sm:$0x40] %vm1652_vm15, %v1647_v20  ;;  %v2399_v55 = vpop.permute.xlu1 %2398  ;;  %v2030_v63 = vpop.permute.xlu2 %2029 }
0x185b   : > { %v2404_v13 = vadd.f32 %v2399_v55, %v4636_v60  ;;  %2035 = vst.msk [vmem:[%s4674_s29 + $0x18] sm:$0x1] %vm503_vm13, %v2030_v63  ;;  %vm4858_vm13 = vcmask 1044484  }
0x185d   : > { %2408 = vrot.lane.b32.xlu1 %v2404_v13, %s4101_s13 }
0x1862   : > { %v1831_v0 = vpop.permute.xlu1 %1830 }
0x1863   : > { %v1835_v50 = vadd.f32 %v1831_v0, %v4491_v53 }
0x1865   : > { %1840 = vrot.lane.b32.xlu1 %v1835_v50, %s4101_s13 }
0x186a   : > { %v2566_v17 = vpop.permute.xlu1 %2565 }
0x186b   : > { %v2570_v56 = vmul.f32 %v2566_v17, %v2560_v10 }
0x186d   : > { %v2583_v6 = vadd.f32 %v2581_v4, %v2570_v56 }
0x186f   : > { %v2611_v60 = vrot.slane %v2583_v6, 7  ;;  %v2597_v29 = vadd.f32 %v2593_v23, %v2583_v6 }
0x1871   : > { %2602 = vrot.lane.b32.xlu2 %v2597_v29, %s4101_s13  ;;  %v2613_v53 = vsel %vm4858_vm13, %v2611_v60, %v2582_v9 }
0x1872   : > { %v2401_v45 = vpop.permute.xlu1 %2400  ;;  %2614 = vrot.lane.b32.xlu0 %v2613_v53, %s4101_s13 }
0x1873   : > { %v2405_v26 = vadd.f32 %v2401_v45, %v4632_v46 }
0x1875   : > { %2410 = vrot.lane.b32.xlu1 %v2405_v26, %s4101_s13 }
0x187b   : > { %v2217_v18 = vpop.permute.xlu0 %2216 }
0x187c   : > { %2223 = vst.msk [vmem:[%s4674_s29 + $0x8] sm:$0x2] %vm692_vm2, %v2217_v18 }
0x1883   : > { %v1649_v54 = vpop.permute.xlu0 %1648 }
0x1884   : > { %1654 = vst.msk [vmem:[%s4674_s29 + $0x10] sm:$0x40] %vm1652_vm15, %v1649_v54 }
0x18aa   : > { %v2601_v1 = vpop.permute.xlu2 %2600 }
0x18ab   : > { %2607 = vst.msk [vmem:[%s4674_s29 + $0x8] sm:$0x8] %vm1076_vm4, %v2601_v1 }
0x18c6   : > { %v2219_v12 = vpop.permute.xlu0 %2218 }
0x18c7   : > { %2224 = vst.msk [vmem:[%s4674_s29 + $0x18] sm:$0x2] %vm692_vm2, %v2219_v12  ;;  %v1839_v3 = vpop.permute.xlu1 %1838 }
0x18c8   : > { %1845 = vst.msk [vmem:[%s4674_s29] sm:$0x80] %vm4859_vm14, %v1839_v3 }
0x18cb   : > { %v2603_v46 = vpop.permute.xlu2 %2602 }
0x18cc   : > { %2608 = vst.msk [vmem:[%s4674_s29 + $0x18] sm:$0x8] %vm1076_vm4, %v2603_v46 }
0x18cf   : > { %v2409_v14 = vpop.permute.xlu1 %2408 }
0x18d0   : > { %2415 = vst.msk [vmem:[%s4674_s29 + $0x8] sm:$0x4] %vm884_vm3, %v2409_v14 }
0x18d7   : > { %v1841_v5 = vpop.permute.xlu1 %1840 }
0x18d8   : > { %1846 = vst.msk [vmem:[%s4674_s29 + $0x10] sm:$0x80] %vm4860_vm1, %v1841_v5 }
0x18e4   : > { %v2615_v16 = vpop.permute.xlu0 %2614 }
0x18e5   : > { %2618 = vst.msk [vmem:[#allocation2 - $0x3] sm:$0x18] %vm4861_vm7, %v2615_v16 }
0x18e7   : > { %v2411_v19 = vpop.permute.xlu1 %2410 }
0x18e8   : > { %2416 = vst.msk [vmem:[%s4674_s29 + $0x18] sm:$0x4] %vm884_vm3, %v2411_v19 }
0x18e9 PF: > { %s15_s20 = sadd.s32 1, %s4097_s20   ;;  %s4862_s18 = smov %s4093_s19 }
0x18ea   : > { %p12_p5 = scmp.ge.s32.totalorder %s15_s20, 4   ;;  %s4863_s19 = smov %s4865_s21 }
0x18ec   :  { %14 = sbr.rel (!%p12_p5) target bundleno = 2 (0x2), region = 141 }

</bundles_post_ra>
